<compile_context>
chip_gen: v6e
topology: v6e:2x2x1
jax: 0.10.0
libtpu: 0.0.40
codegen_flags: <defaults>
</compile_context>

<pallas_src>
import functools

import jax
import jax.numpy as jnp
from jax import lax
from jax.experimental import pallas as pl
from jax.experimental.pallas import tpu as pltpu


def _round_up(x, m):
    return ((x + m - 1) // m) * m


def _slab_offsets(H, S, O):
    """128-lane-aligned field offsets inside the packed per-step output slab."""
    OUT0 = 0
    CTX0 = OUT0 + _round_up(O, 128)
    HID0 = CTX0 + _round_up(2 * H, 128)
    CEL0 = HID0 + _round_up(H, 128)
    ATT0 = CEL0 + _round_up(H, 128)
    PACK = ATT0 + _round_up(S, 128)
    return OUT0, CTX0, HID0, CEL0, ATT0, PACK


def _bias_offsets(H, O):
    """128-lane-aligned field offsets inside the packed bias/vector row."""
    B_EN = 0                                   # energy vector      (H)
    B_O2 = B_EN + _round_up(H, 128)            # out2 bias          (O)
    B_BH = B_O2 + _round_up(O, 128)            # bridge bias        (H)
    B_BC = B_BH + _round_up(H, 128)            # bridge_cell bias   (H)
    B_O1 = B_BC + _round_up(H, 128)            # out1 bias          (2H)
    B_RN = B_O1 + _round_up(2 * H, 128)        # fused LSTM bias    (4H)
    TOT = B_RN + _round_up(4 * H, 128)
    return B_EN, B_O2, B_BH, B_BC, B_O1, B_RN, TOT


def decoder_kernel(E, H, S, O, T,
                   embs_ref, bridge_hc_ref, enc_ref,
                   wH_ref, w2H_ref, wE_ref, o2w_ref, bias_ref,
                   slab_ref,
                   h_scr, c_scr, pproj_scr, cproj_scr):
    dot = lambda a, b: jnp.dot(a, b, preferred_element_type=jnp.float32)
    OUT0, CTX0, HID0, CEL0, ATT0, _ = _slab_offsets(H, S, O)
    B_EN, B_O2, B_BH, B_BC, B_O1, B_RN, _ = _bias_offsets(H, O)

    # ---- one-time work, amortized over the T decode steps ----
    # bridge init (previous_state is None / last_cell is None path), one fused dot:
    #   [bridge_hidden ; bridge_cell] (2,H) @ [bridge_w | bridge_cell_w] (H,2H)
    bproj = dot(bridge_hc_ref[...], wH_ref[:, 7 * H:9 * H])              # (2, 2H)
    h_scr[...] = jnp.tanh(bproj[0:1, 0:H] + bias_ref[:, B_BH:B_BH + H])  # (1, H)
    c_scr[...] = jnp.tanh(bproj[1:2, H:2 * H] + bias_ref[:, B_BC:B_BC + H])

    enc = enc_ref[...]                                                   # (S, 2H)
    keys = dot(enc, w2H_ref[:, 6 * H:7 * H])                             # (S, H)
    e_row = bias_ref[:, B_EN:B_EN + H]                                   # (1, H)
    o2b = bias_ref[:, B_O2:B_O2 + O]                                     # (1, O)

    # hoisted embedding-dependent projections, biases folded in:
    #   prev_embs @ out1_emb + out1_b            -> (T, 2H)
    #   cur_embs  @ W_ih_emb + (b_ih + b_hh)     -> (T, 4H)
    pproj_scr[...] = (dot(embs_ref[0:T, :], wE_ref[:, 0:2 * H])
                      + bias_ref[:, B_O1:B_O1 + 2 * H])
    cproj_scr[...] = (dot(embs_ref[T:2 * T, :], wE_ref[:, 2 * H:6 * H])
                      + bias_ref[:, B_RN:B_RN + 4 * H])

    @pl.loop(0, T, unroll=True)   # T small here; partially unroll for long decodes
    def _step(t):
        h = h_scr[...]                                    # (1, H) carried state
        c = c_scr[...]

        # fused h projection: [query | out1_h | gates_h]
        h_all = dot(h, wH_ref[:, 0:7 * H])                # (1, 7H)

        # ---- Bahdanau attention (Attn.forward, do_ney=False), lane-dense (1, S) ----
        scored = jnp.tanh(h_all[:, 0:H] + keys)           # (S, H)
        e = lax.dot_general(e_row, scored,                # A·Bᵀ — no per-step transpose
                            (((1,), (1,)), ((), ())),
                            preferred_element_type=jnp.float32)          # (1, S)
        m = jnp.max(e, axis=1, keepdims=True)
        p = jnp.exp(e - m)
        attn = p / jnp.sum(p, axis=1, keepdims=True)      # softmax over the sequence
        ctx = dot(attn, enc)                              # (1, 2H) context on the MXU

        # fused ctx projection: [out1_ctx | gates_ctx]
        c_all = dot(ctx, w2H_ref[:, 0:6 * H])             # (1, 6H)

        # ---- output head: log_softmax(out2(tanh(out1([prev_emb | h | ctx])))) ----
        o1 = jnp.tanh(pproj_scr[pl.ds(t, 1), :]
                      + h_all[:, H:3 * H] + c_all[:, 0:2 * H])           # (1, 2H)
        logits = dot(o1, o2w_ref[...]) + o2b                             # (1, O)
        lmax = jnp.max(logits, axis=1, keepdims=True)
        lse = jnp.log(jnp.sum(jnp.exp(logits - lmax), axis=1, keepdims=True)) + lmax
        out = logits - lse

        # ---- LSTM step on [cur_emb | ctx] (+ h through W_hh), gate order i,f,g,o ----
        gates = (cproj_scr[pl.ds(t, 1), :]
                 + h_all[:, 3 * H:7 * H] + c_all[:, 2 * H:6 * H])        # (1, 4H)
        i_g = jax.nn.sigmoid(gates[:, 0:H])
        f_g = jax.nn.sigmoid(gates[:, H:2 * H])
        g_g = jnp.tanh(gates[:, 2 * H:3 * H])
        o_g = jax.nn.sigmoid(gates[:, 3 * H:4 * H])
        c_new = f_g * c + i_g * g_g
        h_new = o_g * jnp.tanh(c_new)
        h_scr[...] = h_new
        c_scr[...] = c_new

        # ---- packed writeback: one slab row per step, every field 128-lane aligned ----
        row = pl.ds(t, 1)
        slab_ref[row, OUT0:OUT0 + O] = out
        slab_ref[row, CTX0:CTX0 + 2 * H] = ctx
        slab_ref[row, HID0:HID0 + H] = h_new
        slab_ref[row, CEL0:CEL0 + H] = c_new
        slab_ref[row, ATT0:ATT0 + S] = attn


def bahdanau_decode(params, tokens, prev_word_emb0, bridge_hidden, bridge_cell,
                    encoder_outputs):
    """Runs T forced-decode steps (force_current=True) of BahdanauAttnDecoderRNN,
    with previous_state=None / last_cell=None (bridge path) at step 0 and the
    hidden/cell state carried across steps, all inside one pallas_call."""
    H = params["hidden_size"]
    E = params["emb_size"]
    O = params["output_size"]
    S = encoder_outputs.shape[0]
    T = tokens.shape[0]
    OUT0, CTX0, HID0, CEL0, ATT0, PACK = _slab_offsets(H, S, O)
    B_EN, B_O2, B_BH, B_BC, B_O1, B_RN, BTOT = _bias_offsets(H, O)

    # glue: embedding lookups (+ dropout, identity in eval mode) for all steps,
    # stacked [prev_embs ; cur_embs] so they travel as one DMA.
    cur_embs = params["embedding"][tokens]                                 # (T, E)
    prev_embs = jnp.concatenate([prev_word_emb0, cur_embs[:-1]], axis=0)   # (T, E)
    embs = jnp.concatenate([prev_embs, cur_embs], axis=0)                  # (2T, E)
    bridge_hc = jnp.concatenate([bridge_hidden, bridge_cell], axis=0)      # (2, H)

    # trace-time weight repacking into 3 lane-stacked slabs + 1 packed bias row
    o1w, wih, whh = params["out1_w"], params["lstm_wih"], params["lstm_whh"]
    # H-row slab: per-step fused weight first (starts at lane 0), bridge weights after
    wH = jnp.concatenate([params["query_w"],         # 0:H   -> attention query
                          o1w[E:E + H],              # H:3H  -> out1(h)
                          whh,                       # 3H:7H -> gates(h)
                          params["bridge_w"],        # 7H:8H (one-time)
                          params["bridge_cell_w"]],  # 8H:9H (one-time)
                         axis=1)                                           # (H, 9H)
    # 2H-row slab: per-step fused ctx weight first, key projection (one-time) after
    w2H = jnp.concatenate([o1w[E + H:E + 3 * H],     # 0:2H  -> out1(ctx)
                           wih[E:E + 2 * H],         # 2H:6H -> gates(ctx)
                           params["key_w"]],         # 6H:7H (one-time)
                          axis=1)                                          # (2H, 7H)
    # E-row slab: hoisted embedding projections (one-time)
    wE = jnp.concatenate([o1w[0:E], wih[0:E]], axis=1)                     # (E, 6H)

    # packed bias / vector row, every field 128-lane aligned
    def put(row, off, x):
        return row.at[:, off:off + x.shape[1]].set(x)
    bias_row = jnp.zeros((1, BTOT), jnp.float32)
    bias_row = put(bias_row, B_EN, params["energy_w"].T)                   # (1, H)
    bias_row = put(bias_row, B_O2, params["out2_b"])
    bias_row = put(bias_row, B_BH, params["bridge_b"])
    bias_row = put(bias_row, B_BC, params["bridge_cell_b"])
    bias_row = put(bias_row, B_O1, params["out1_b"])
    bias_row = put(bias_row, B_RN, params["lstm_bih"] + params["lstm_bhh"])

    vmem = pl.BlockSpec(memory_space=pltpu.MemorySpace.VMEM)
    kernel = functools.partial(decoder_kernel, E, H, S, O, T)
    inputs = (embs, bridge_hc, encoder_outputs, wH, w2H, wE,
              params["out2_w"], bias_row)

    slab = pl.pallas_call(
        kernel,
        out_shape=jax.ShapeDtypeStruct((T, PACK), jnp.float32),
        in_specs=[vmem] * len(inputs),
        out_specs=vmem,
        scratch_shapes=[
            pltpu.VMEM((1, H), jnp.float32),          # hidden-state carry
            pltpu.VMEM((1, H), jnp.float32),          # cell-state carry
            pltpu.VMEM((T, 2 * H), jnp.float32),      # hoisted prev-emb out1 rows
            pltpu.VMEM((T, 4 * H), jnp.float32),      # hoisted cur-emb gate rows
        ],
    )(*inputs)

    outputs = slab[:, OUT0:OUT0 + O]          # (T, O)  per-step log-softmax
    contexts = slab[:, CTX0:CTX0 + 2 * H]     # (T, 2H)
    states = slab[:, HID0:HID0 + H]           # (T, H)
    cells = slab[:, CEL0:CEL0 + H]            # (T, H)
    attns = slab[:, ATT0:ATT0 + S]            # (T, S)
    return outputs, contexts, states, cells, attns, cur_embs


def reference_decode(params, tokens, prev_word_emb0, bridge_hidden, bridge_cell,
                     encoder_outputs):
    """Pure-JAX reference: T sequential applications of the module's forward."""
    H = params["hidden_size"]
    h = jnp.tanh(bridge_hidden @ params["bridge_w"] + params["bridge_b"])
    c = jnp.tanh(bridge_cell @ params["bridge_cell_w"] + params["bridge_cell_b"])
    prev_emb = prev_word_emb0
    outs, ctxs, hs, cs, attns = [], [], [], [], []
    for t in range(tokens.shape[0]):
        cur_emb = params["embedding"][tokens[t]][None, :]
        keys = encoder_outputs @ params["key_w"]
        query = h @ params["query_w"]
        e = jnp.tanh(query + keys) @ params["energy_w"]          # (S, 1)
        attn = jax.nn.softmax(e[:, 0], axis=0)[None, :]          # (1, S)
        context = attn @ encoder_outputs                          # (1, 2H)
        pre_out = jnp.concatenate([prev_emb, h, context], axis=1)
        o1 = jnp.tanh(pre_out @ params["out1_w"] + params["out1_b"])
        logits = o1 @ params["out2_w"] + params["out2_b"]
        out = jax.nn.log_softmax(logits, axis=1)
        rnn_in = jnp.concatenate([cur_emb, context], axis=1)
        gates = (rnn_in @ params["lstm_wih"] + params["lstm_bih"]
                 + h @ params["lstm_whh"] + params["lstm_bhh"])
        i_g = jax.nn.sigmoid(gates[:, 0:H])
        f_g = jax.nn.sigmoid(gates[:, H:2 * H])
        g_g = jnp.tanh(gates[:, 2 * H:3 * H])
        o_g = jax.nn.sigmoid(gates[:, 3 * H:4 * H])
        c = f_g * c + i_g * g_g
        h = o_g * jnp.tanh(c)
        outs.append(out); ctxs.append(context); hs.append(h); cs.append(c); attns.append(attn)
        prev_emb = cur_emb
    return (jnp.concatenate(outs, 0), jnp.concatenate(ctxs, 0),
            jnp.concatenate(hs, 0), jnp.concatenate(cs, 0), jnp.concatenate(attns, 0))


def make_params(key, hidden_size, emb_size, output_size):
    ks = jax.random.split(key, 16)
    n = lambda k, shape: (0.1 * jax.random.normal(k, shape)).astype(jnp.float32)
    H, E, O = hidden_size, emb_size, output_size
    return {
        "hidden_size": H, "emb_size": E, "output_size": O,
        "embedding": n(ks[0], (O, E)),
        # Linear weights stored as (in, out)  (i.e. PyTorch weight.T)
        "bridge_w": n(ks[1], (H, H)), "bridge_b": n(ks[2], (1, H)),
        "bridge_cell_w": n(ks[3], (H, H)), "bridge_cell_b": n(ks[4], (1, H)),
        "key_w": n(ks[5], (2 * H, H)),
        "query_w": n(ks[6], (H, H)),
        "energy_w": n(ks[7], (H, 1)),
        "out1_w": n(ks[8], (E + 3 * H, 2 * H)), "out1_b": n(ks[9], (1, 2 * H)),
        "out2_w": n(ks[10], (2 * H, O)), "out2_b": n(ks[11], (1, O)),
        "lstm_wih": n(ks[12], (E + 2 * H, 4 * H)),
        "lstm_whh": n(ks[13], (H, 4 * H)),
        "lstm_bih": n(ks[14], (1, 4 * H)),
        "lstm_bhh": n(ks[15], (1, 4 * H)),
    }


if __name__ == "__main__":
    H, E, O, S, T = 32, 16, 40, 8, 6
    key = jax.random.PRNGKey(0)
    kp, k1, k2, k3, k4, k5 = jax.random.split(key, 6)

    params = make_params(kp, H, E, O)
    encoder_outputs = (0.5 * jax.random.normal(k1, (S, 2 * H))).astype(jnp.float32)
    bridge_hidden = (0.5 * jax.random.normal(k2, (1, H))).astype(jnp.float32)
    bridge_cell = (0.5 * jax.random.normal(k3, (1, H))).astype(jnp.float32)
    prev_word_emb0 = (0.5 * jax.random.normal(k4, (1, E))).astype(jnp.float32)
    tokens = jax.random.randint(k5, (T,), 0, O, dtype=jnp.int32)

    res = bahdanau_decode(params, tokens, prev_word_emb0, bridge_hidden, bridge_cell,
                          encoder_outputs)
    res = jax.block_until_ready(res)
    out, ctx, states, cells, attns, cur_embs = res

    r_out, r_ctx, r_h, r_c, r_attn = reference_decode(
        params, tokens, prev_word_emb0, bridge_hidden, bridge_cell, encoder_outputs)

    assert jnp.allclose(out, r_out, atol=1e-4, rtol=1e-4)
    assert jnp.allclose(ctx, r_ctx, atol=1e-4, rtol=1e-4)
    assert jnp.allclose(states, r_h, atol=1e-4, rtol=1e-4)
    assert jnp.allclose(cells, r_c, atol=1e-4, rtol=1e-4)
    assert jnp.allclose(attns, r_attn, atol=1e-4, rtol=1e-4)
    assert jnp.allclose(cur_embs, params["embedding"][tokens], atol=0, rtol=0)

    print("KERNEL_OK")
</pallas_src>

<mosaic_0001>
module attributes {stable_mosaic.version = 11 : i64} {
  func.func @decoder_kernel(%arg0: memref<12x16xf32, #tpu.memory_space<vmem>>, %arg1: memref<2x32xf32, #tpu.memory_space<vmem>>, %arg2: memref<8x64xf32, #tpu.memory_space<vmem>>, %arg3: memref<32x288xf32, #tpu.memory_space<vmem>>, %arg4: memref<64x224xf32, #tpu.memory_space<vmem>>, %arg5: memref<16x192xf32, #tpu.memory_space<vmem>>, %arg6: memref<64x40xf32, #tpu.memory_space<vmem>>, %arg7: memref<1x768xf32, #tpu.memory_space<vmem>>, %arg8: memref<6x640xf32, #tpu.memory_space<vmem>>, %arg9: memref<1x32xf32, #tpu.memory_space<vmem>>, %arg10: memref<1x32xf32, #tpu.memory_space<vmem>>, %arg11: memref<6x64xf32, #tpu.memory_space<vmem>>, %arg12: memref<6x128xf32, #tpu.memory_space<vmem>>) attributes {dimension_semantics = [], scalar_prefetch = 0 : i64, scratch_operands = 4 : i64, tpu.core_type = #tpu.core_type<tc>} {
    %c0 = arith.constant 0 : index
    %c0_0 = arith.constant 0 : index
    %0 = vector.load %arg1[%c0, %c0_0] : memref<2x32xf32, #tpu.memory_space<vmem>>, vector<2x32xf32>
    %c0_1 = arith.constant 0 : index
    %c224 = arith.constant 224 : index
    %1 = vector.load %arg3[%c0_1, %c224] : memref<32x288xf32, #tpu.memory_space<vmem>>, vector<32x64xf32>
    %cst = arith.constant dense<0.000000e+00> : vector<2x64xf32>
    %2 = tpu.matmul %0, %1, %cst {dimension_numbers = #tpu.dot_dimension_numbers<[1], [0], [0], [1], [0, 0, 1, 1], [], []>} : vector<2x32xf32>, vector<32x64xf32>, vector<2x64xf32> -> vector<2x64xf32>
    %3 = vector.extract_strided_slice %2 {offsets = [0, 0], sizes = [1, 32], strides = [1, 1]} : vector<2x64xf32> to vector<1x32xf32>
    %c0_2 = arith.constant 0 : index
    %c256 = arith.constant 256 : index
    %4 = vector.load %arg7[%c0_2, %c256] : memref<1x768xf32, #tpu.memory_space<vmem>>, vector<1x32xf32>
    %5 = arith.addf %3, %4 : vector<1x32xf32>
    %6 = math.tanh %5 : vector<1x32xf32>
    %c0_3 = arith.constant 0 : index
    %c0_4 = arith.constant 0 : index
    %7 = vector.load %arg9[%c0_3, %c0_4] : memref<1x32xf32, #tpu.memory_space<vmem>>, vector<1x32xf32>
    tpu.vector_store %arg9[%c0_3, %c0_4], %6 {strides = array<i32>} : memref<1x32xf32, #tpu.memory_space<vmem>>, vector<1x32xf32>,
    %8 = vector.extract_strided_slice %2 {offsets = [1, 32], sizes = [1, 32], strides = [1, 1]} : vector<2x64xf32> to vector<1x32xf32>
    %c0_5 = arith.constant 0 : index
    %c384 = arith.constant 384 : index
    %9 = vector.load %arg7[%c0_5, %c384] : memref<1x768xf32, #tpu.memory_space<vmem>>, vector<1x32xf32>
    %10 = arith.addf %8, %9 : vector<1x32xf32>
    %11 = math.tanh %10 : vector<1x32xf32>
    %c0_6 = arith.constant 0 : index
    %c0_7 = arith.constant 0 : index
    %12 = vector.load %arg10[%c0_6, %c0_7] : memref<1x32xf32, #tpu.memory_space<vmem>>, vector<1x32xf32>
    tpu.vector_store %arg10[%c0_6, %c0_7], %11 {strides = array<i32>} : memref<1x32xf32, #tpu.memory_space<vmem>>, vector<1x32xf32>,
    %c0_8 = arith.constant 0 : index
    %c0_9 = arith.constant 0 : index
    %13 = vector.load %arg2[%c0_8, %c0_9] : memref<8x64xf32, #tpu.memory_space<vmem>>, vector<8x64xf32>
    %c0_10 = arith.constant 0 : index
    %c192 = arith.constant 192 : index
    %14 = vector.load %arg4[%c0_10, %c192] : memref<64x224xf32, #tpu.memory_space<vmem>>, vector<64x32xf32>
    %cst_11 = arith.constant dense<0.000000e+00> : vector<8x32xf32>
    %15 = tpu.matmul %13, %14, %cst_11 {dimension_numbers = #tpu.dot_dimension_numbers<[1], [0], [0], [1], [0, 0, 1, 1], [], []>} : vector<8x64xf32>, vector<64x32xf32>, vector<8x32xf32> -> vector<8x32xf32>
    %c0_12 = arith.constant 0 : index
    %c0_13 = arith.constant 0 : index
    %16 = vector.load %arg7[%c0_12, %c0_13] : memref<1x768xf32, #tpu.memory_space<vmem>>, vector<1x32xf32>
    %c0_14 = arith.constant 0 : index
    %c128 = arith.constant 128 : index
    %17 = vector.load %arg7[%c0_14, %c128] : memref<1x768xf32, #tpu.memory_space<vmem>>, vector<1x40xf32>
    %c0_15 = arith.constant 0 : index
    %c0_16 = arith.constant 0 : index
    %18 = vector.load %arg0[%c0_15, %c0_16] : memref<12x16xf32, #tpu.memory_space<vmem>>, vector<6x16xf32>
    %c0_17 = arith.constant 0 : index
    %c0_18 = arith.constant 0 : index
    %19 = vector.load %arg5[%c0_17, %c0_18] : memref<16x192xf32, #tpu.memory_space<vmem>>, vector<16x64xf32>
    %cst_19 = arith.constant dense<0.000000e+00> : vector<6x64xf32>
    %20 = tpu.matmul %18, %19, %cst_19 {dimension_numbers = #tpu.dot_dimension_numbers<[1], [0], [0], [1], [0, 0, 1, 1], [], []>} : vector<6x16xf32>, vector<16x64xf32>, vector<6x64xf32> -> vector<6x64xf32>
    %c0_20 = arith.constant 0 : index
    %c512 = arith.constant 512 : index
    %21 = vector.load %arg7[%c0_20, %c512] : memref<1x768xf32, #tpu.memory_space<vmem>>, vector<1x64xf32>
    %22 = vector.broadcast %21 : vector<1x64xf32> to vector<6x64xf32>
    %23 = arith.addf %20, %22 : vector<6x64xf32>
    %c0_21 = arith.constant 0 : index
    %c0_22 = arith.constant 0 : index
    %24 = vector.load %arg11[%c0_21, %c0_22] : memref<6x64xf32, #tpu.memory_space<vmem>>, vector<6x64xf32>
    tpu.vector_store %arg11[%c0_21, %c0_22], %23 {strides = array<i32>} : memref<6x64xf32, #tpu.memory_space<vmem>>, vector<6x64xf32>,
    %c6 = arith.constant 6 : index
    %c0_23 = arith.constant 0 : index
    %25 = vector.load %arg0[%c6, %c0_23] : memref<12x16xf32, #tpu.memory_space<vmem>>, vector<6x16xf32>
    %c0_24 = arith.constant 0 : index
    %c64 = arith.constant 64 : index
    %26 = vector.load %arg5[%c0_24, %c64] : memref<16x192xf32, #tpu.memory_space<vmem>>, vector<16x128xf32>
    %cst_25 = arith.constant dense<0.000000e+00> : vector<6x128xf32>
    %27 = tpu.matmul %25, %26, %cst_25 {dimension_numbers = #tpu.dot_dimension_numbers<[1], [0], [0], [1], [0, 0, 1, 1], [], []>} : vector<6x16xf32>, vector<16x128xf32>, vector<6x128xf32> -> vector<6x128xf32>
    %c0_26 = arith.constant 0 : index
    %c640 = arith.constant 640 : index
    %28 = vector.load %arg7[%c0_26, %c640] : memref<1x768xf32, #tpu.memory_space<vmem>>, vector<1x128xf32>
    %29 = vector.broadcast %28 : vector<1x128xf32> to vector<6x128xf32>
    %30 = arith.addf %27, %29 : vector<6x128xf32>
    %c0_27 = arith.constant 0 : index
    %c0_28 = arith.constant 0 : index
    %31 = vector.load %arg12[%c0_27, %c0_28] : memref<6x128xf32, #tpu.memory_space<vmem>>, vector<6x128xf32>
    tpu.vector_store %arg12[%c0_27, %c0_28], %30 {strides = array<i32>} : memref<6x128xf32, #tpu.memory_space<vmem>>, vector<6x128xf32>,
    %c0_i32 = arith.constant 0 : i32
    %c1_i32 = arith.constant 1 : i32
    %32 = arith.muli %c0_i32, %c1_i32 : i32
    %c0_i32_29 = arith.constant 0 : i32
    %33 = arith.addi %c0_i32_29, %32 : i32
    %c0_30 = arith.constant 0 : index
    %c0_31 = arith.constant 0 : index
    %34 = vector.load %arg9[%c0_30, %c0_31] : memref<1x32xf32, #tpu.memory_space<vmem>>, vector<1x32xf32>
    %c0_32 = arith.constant 0 : index
    %c0_33 = arith.constant 0 : index
    %35 = vector.load %arg10[%c0_32, %c0_33] : memref<1x32xf32, #tpu.memory_space<vmem>>, vector<1x32xf32>
    %c0_34 = arith.constant 0 : index
    %c0_35 = arith.constant 0 : index
    %36 = vector.load %arg3[%c0_34, %c0_35] : memref<32x288xf32, #tpu.memory_space<vmem>>, vector<32x224xf32>
    %cst_36 = arith.constant dense<0.000000e+00> : vector<1x224xf32>
    %37 = tpu.matmul %34, %36, %cst_36 {dimension_numbers = #tpu.dot_dimension_numbers<[1], [0], [0], [1], [0, 0, 1, 1], [], []>} : vector<1x32xf32>, vector<32x224xf32>, vector<1x224xf32> -> vector<1x224xf32>
    %38 = vector.extract_strided_slice %37 {offsets = [0, 0], sizes = [1, 32], strides = [1, 1]} : vector<1x224xf32> to vector<1x32xf32>
    %39 = vector.broadcast %38 : vector<1x32xf32> to vector<8x32xf32>
    %40 = arith.addf %39, %15 : vector<8x32xf32>
    %41 = math.tanh %40 : vector<8x32xf32>
    %cst_37 = arith.constant dense<0.000000e+00> : vector<1x8xf32>
    %42 = tpu.matmul %16, %41, %cst_37 {dimension_numbers = #tpu.dot_dimension_numbers<[1], [1], [0], [0], [0, 0, 1, 0], [], []>} : vector<1x32xf32>, vector<8x32xf32>, vector<1x8xf32> -> vector<1x8xf32>
    %cst_38 = arith.constant dense<0xFF800000> : vector<1xf32>
    %43 = vector.multi_reduction <maximumf>, %42, %cst_38 [1] : vector<1x8xf32> to vector<1xf32>
    %44 = vector.shape_cast %43 : vector<1xf32> to vector<1x1xf32>
    %45 = vector.broadcast %44 : vector<1x1xf32> to vector<1x8xf32>
    %46 = arith.subf %42, %45 : vector<1x8xf32>
    %47 = math.exp %46 : vector<1x8xf32>
    %cst_39 = arith.constant dense<0.000000e+00> : vector<1xf32>
    %48 = vector.multi_reduction <add>, %47, %cst_39 [1] : vector<1x8xf32> to vector<1xf32>
    %49 = vector.shape_cast %48 : vector<1xf32> to vector<1x1xf32>
    %50 = vector.broadcast %49 : vector<1x1xf32> to vector<1x8xf32>
    %51 = arith.divf %47, %50 : vector<1x8xf32>
    %cst_40 = arith.constant dense<0.000000e+00> : vector<1x64xf32>
    %52 = tpu.matmul %51, %13, %cst_40 {dimension_numbers = #tpu.dot_dimension_numbers<[1], [0], [0], [1], [0, 0, 1, 1], [], []>} : vector<1x8xf32>, vector<8x64xf32>, vector<1x64xf32> -> vector<1x64xf32>
    %c0_41 = arith.constant 0 : index
    %c0_42 = arith.constant 0 : index
    %53 = vector.load %arg4[%c0_41, %c0_42] : memref<64x224xf32, #tpu.memory_space<vmem>>, vector<64x192xf32>
    %cst_43 = arith.constant dense<0.000000e+00> : vector<1x192xf32>
    %54 = tpu.matmul %52, %53, %cst_43 {dimension_numbers = #tpu.dot_dimension_numbers<[1], [0], [0], [1], [0, 0, 1, 1], [], []>} : vector<1x64xf32>, vector<64x192xf32>, vector<1x192xf32> -> vector<1x192xf32>
    %55 = arith.index_cast %33 : i32 to index
    %c0_44 = arith.constant 0 : index
    %56 = vector.load %arg11[%55, %c0_44] : memref<6x64xf32, #tpu.memory_space<vmem>>, vector<1x64xf32>
    %57 = vector.extract_strided_slice %37 {offsets = [0, 32], sizes = [1, 64], strides = [1, 1]} : vector<1x224xf32> to vector<1x64xf32>
    %58 = arith.addf %56, %57 : vector<1x64xf32>
    %59 = vector.extract_strided_slice %54 {offsets = [0, 0], sizes = [1, 64], strides = [1, 1]} : vector<1x192xf32> to vector<1x64xf32>
    %60 = arith.addf %58, %59 : vector<1x64xf32>
    %61 = math.tanh %60 : vector<1x64xf32>
    %c0_45 = arith.constant 0 : index
    %c0_46 = arith.constant 0 : index
    %62 = vector.load %arg6[%c0_45, %c0_46] : memref<64x40xf32, #tpu.memory_space<vmem>>, vector<64x40xf32>
    %cst_47 = arith.constant dense<0.000000e+00> : vector<1x40xf32>
    %63 = tpu.matmul %61, %62, %cst_47 {dimension_numbers = #tpu.dot_dimension_numbers<[1], [0], [0], [1], [0, 0, 1, 1], [], []>} : vector<1x64xf32>, vector<64x40xf32>, vector<1x40xf32> -> vector<1x40xf32>
    %64 = arith.addf %63, %17 : vector<1x40xf32>
    %cst_48 = arith.constant dense<0xFF800000> : vector<1xf32>
    %65 = vector.multi_reduction <maximumf>, %64, %cst_48 [1] : vector<1x40xf32> to vector<1xf32>
    %66 = vector.shape_cast %65 : vector<1xf32> to vector<1x1xf32>
    %67 = vector.broadcast %66 : vector<1x1xf32> to vector<1x40xf32>
    %68 = arith.subf %64, %67 : vector<1x40xf32>
    %69 = math.exp %68 : vector<1x40xf32>
    %cst_49 = arith.constant dense<0.000000e+00> : vector<1xf32>
    %70 = vector.multi_reduction <add>, %69, %cst_49 [1] : vector<1x40xf32> to vector<1xf32>
    %71 = vector.shape_cast %70 : vector<1xf32> to vector<1x1xf32>
    %72 = math.log %71 : vector<1x1xf32>
    %73 = arith.addf %72, %66 : vector<1x1xf32>
    %74 = vector.broadcast %73 : vector<1x1xf32> to vector<1x40xf32>
    %75 = arith.subf %64, %74 : vector<1x40xf32>
    %76 = arith.index_cast %33 : i32 to index
    %c0_50 = arith.constant 0 : index
    %77 = vector.load %arg12[%76, %c0_50] : memref<6x128xf32, #tpu.memory_space<vmem>>, vector<1x128xf32>
    %78 = vector.extract_strided_slice %37 {offsets = [0, 96], sizes = [1, 128], strides = [1, 1]} : vector<1x224xf32> to vector<1x128xf32>
    %79 = arith.addf %77, %78 : vector<1x128xf32>
    %80 = vector.extract_strided_slice %54 {offsets = [0, 64], sizes = [1, 128], strides = [1, 1]} : vector<1x192xf32> to vector<1x128xf32>
    %81 = arith.addf %79, %80 : vector<1x128xf32>
    %82 = vector.extract_strided_slice %81 {offsets = [0, 0], sizes = [1, 32], strides = [1, 1]} : vector<1x128xf32> to vector<1x32xf32>
    %83 = arith.negf %82 : vector<1x32xf32>
    %84 = math.exp %83 : vector<1x32xf32>
    %cst_51 = arith.constant 1.000000e+00 : f32
    %85 = vector.broadcast %cst_51 : f32 to vector<1x32xf32>
    %86 = arith.addf %85, %84 : vector<1x32xf32>
    %87 = arith.divf %85, %86 : vector<1x32xf32>
    %88 = vector.extract_strided_slice %81 {offsets = [0, 32], sizes = [1, 32], strides = [1, 1]} : vector<1x128xf32> to vector<1x32xf32>
    %89 = arith.negf %88 : vector<1x32xf32>
    %90 = math.exp %89 : vector<1x32xf32>
    %cst_52 = arith.constant 1.000000e+00 : f32
    %91 = vector.broadcast %cst_52 : f32 to vector<1x32xf32>
    %92 = arith.addf %91, %90 : vector<1x32xf32>
    %93 = arith.divf %91, %92 : vector<1x32xf32>
    %94 = vector.extract_strided_slice %81 {offsets = [0, 64], sizes = [1, 32], strides = [1, 1]} : vector<1x128xf32> to vector<1x32xf32>
    %95 = math.tanh %94 : vector<1x32xf32>
    %96 = vector.extract_strided_slice %81 {offsets = [0, 96], sizes = [1, 32], strides = [1, 1]} : vector<1x128xf32> to vector<1x32xf32>
    %97 = arith.negf %96 : vector<1x32xf32>
    %98 = math.exp %97 : vector<1x32xf32>
    %cst_53 = arith.constant 1.000000e+00 : f32
    %99 = vector.broadcast %cst_53 : f32 to vector<1x32xf32>
    %100 = arith.addf %99, %98 : vector<1x32xf32>
    %101 = arith.divf %99, %100 : vector<1x32xf32>
    %102 = arith.mulf %93, %35 : vector<1x32xf32>
    %103 = arith.mulf %87, %95 : vector<1x32xf32>
    %104 = arith.addf %102, %103 : vector<1x32xf32>
    %105 = math.tanh %104 : vector<1x32xf32>
    %106 = arith.mulf %101, %105 : vector<1x32xf32>
    %c0_54 = arith.constant 0 : index
    %c0_55 = arith.constant 0 : index
    %107 = vector.load %arg9[%c0_54, %c0_55] : memref<1x32xf32, #tpu.memory_space<vmem>>, vector<1x32xf32>
    tpu.vector_store %arg9[%c0_54, %c0_55], %106 {strides = array<i32>} : memref<1x32xf32, #tpu.memory_space<vmem>>, vector<1x32xf32>,
    %c0_56 = arith.constant 0 : index
    %c0_57 = arith.constant 0 : index
    %108 = vector.load %arg10[%c0_56, %c0_57] : memref<1x32xf32, #tpu.memory_space<vmem>>, vector<1x32xf32>
    tpu.vector_store %arg10[%c0_56, %c0_57], %104 {strides = array<i32>} : memref<1x32xf32, #tpu.memory_space<vmem>>, vector<1x32xf32>,
    %109 = arith.index_cast %33 : i32 to index
    %c0_58 = arith.constant 0 : index
    %110 = vector.load %arg8[%109, %c0_58] : memref<6x640xf32, #tpu.memory_space<vmem>>, vector<1x40xf32>
    tpu.vector_store %arg8[%109, %c0_58], %75 {strides = array<i32>} : memref<6x640xf32, #tpu.memory_space<vmem>>, vector<1x40xf32>,
    %111 = arith.index_cast %33 : i32 to index
    %c128_59 = arith.constant 128 : index
    %112 = vector.load %arg8[%111, %c128_59] : memref<6x640xf32, #tpu.memory_space<vmem>>, vector<1x64xf32>
    tpu.vector_store %arg8[%111, %c128_59], %52 {strides = array<i32>} : memref<6x640xf32, #tpu.memory_space<vmem>>, vector<1x64xf32>,
    %113 = arith.index_cast %33 : i32 to index
    %c256_60 = arith.constant 256 : index
    %114 = vector.load %arg8[%113, %c256_60] : memref<6x640xf32, #tpu.memory_space<vmem>>, vector<1x32xf32>
    tpu.vector_store %arg8[%113, %c256_60], %106 {strides = array<i32>} : memref<6x640xf32, #tpu.memory_space<vmem>>, vector<1x32xf32>,
    %115 = arith.index_cast %33 : i32 to index
    %c384_61 = arith.constant 384 : index
    %116 = vector.load %arg8[%115, %c384_61] : memref<6x640xf32, #tpu.memory_space<vmem>>, vector<1x32xf32>
    tpu.vector_store %arg8[%115, %c384_61], %104 {strides = array<i32>} : memref<6x640xf32, #tpu.memory_space<vmem>>, vector<1x32xf32>,
    %117 = arith.index_cast %33 : i32 to index
    %c512_62 = arith.constant 512 : index
    %118 = vector.load %arg8[%117, %c512_62] : memref<6x640xf32, #tpu.memory_space<vmem>>, vector<1x8xf32>
    tpu.vector_store %arg8[%117, %c512_62], %51 {strides = array<i32>} : memref<6x640xf32, #tpu.memory_space<vmem>>, vector<1x8xf32>,
    %c1_i32_63 = arith.constant 1 : i32
    %c1_i32_64 = arith.constant 1 : i32
    %119 = arith.muli %c1_i32_63, %c1_i32_64 : i32
    %c0_i32_65 = arith.constant 0 : i32
    %120 = arith.addi %c0_i32_65, %119 : i32
    %c0_66 = arith.constant 0 : index
    %c0_67 = arith.constant 0 : index
    %121 = vector.load %arg9[%c0_66, %c0_67] : memref<1x32xf32, #tpu.memory_space<vmem>>, vector<1x32xf32>
    %c0_68 = arith.constant 0 : index
    %c0_69 = arith.constant 0 : index
    %122 = vector.load %arg10[%c0_68, %c0_69] : memref<1x32xf32, #tpu.memory_space<vmem>>, vector<1x32xf32>
    %c0_70 = arith.constant 0 : index
    %c0_71 = arith.constant 0 : index
    %123 = vector.load %arg3[%c0_70, %c0_71] : memref<32x288xf32, #tpu.memory_space<vmem>>, vector<32x224xf32>
    %cst_72 = arith.constant dense<0.000000e+00> : vector<1x224xf32>
    %124 = tpu.matmul %121, %123, %cst_72 {dimension_numbers = #tpu.dot_dimension_numbers<[1], [0], [0], [1], [0, 0, 1, 1], [], []>} : vector<1x32xf32>, vector<32x224xf32>, vector<1x224xf32> -> vector<1x224xf32>
    %125 = vector.extract_strided_slice %124 {offsets = [0, 0], sizes = [1, 32], strides = [1, 1]} : vector<1x224xf32> to vector<1x32xf32>
    %126 = vector.broadcast %125 : vector<1x32xf32> to vector<8x32xf32>
    %127 = arith.addf %126, %15 : vector<8x32xf32>
    %128 = math.tanh %127 : vector<8x32xf32>
    %cst_73 = arith.constant dense<0.000000e+00> : vector<1x8xf32>
    %129 = tpu.matmul %16, %128, %cst_73 {dimension_numbers = #tpu.dot_dimension_numbers<[1], [1], [0], [0], [0, 0, 1, 0], [], []>} : vector<1x32xf32>, vector<8x32xf32>, vector<1x8xf32> -> vector<1x8xf32>
    %cst_74 = arith.constant dense<0xFF800000> : vector<1xf32>
    %130 = vector.multi_reduction <maximumf>, %129, %cst_74 [1] : vector<1x8xf32> to vector<1xf32>
    %131 = vector.shape_cast %130 : vector<1xf32> to vector<1x1xf32>
    %132 = vector.broadcast %131 : vector<1x1xf32> to vector<1x8xf32>
    %133 = arith.subf %129, %132 : vector<1x8xf32>
    %134 = math.exp %133 : vector<1x8xf32>
    %cst_75 = arith.constant dense<0.000000e+00> : vector<1xf32>
    %135 = vector.multi_reduction <add>, %134, %cst_75 [1] : vector<1x8xf32> to vector<1xf32>
    %136 = vector.shape_cast %135 : vector<1xf32> to vector<1x1xf32>
    %137 = vector.broadcast %136 : vector<1x1xf32> to vector<1x8xf32>
    %138 = arith.divf %134, %137 : vector<1x8xf32>
    %cst_76 = arith.constant dense<0.000000e+00> : vector<1x64xf32>
    %139 = tpu.matmul %138, %13, %cst_76 {dimension_numbers = #tpu.dot_dimension_numbers<[1], [0], [0], [1], [0, 0, 1, 1], [], []>} : vector<1x8xf32>, vector<8x64xf32>, vector<1x64xf32> -> vector<1x64xf32>
    %c0_77 = arith.constant 0 : index
    %c0_78 = arith.constant 0 : index
    %140 = vector.load %arg4[%c0_77, %c0_78] : memref<64x224xf32, #tpu.memory_space<vmem>>, vector<64x192xf32>
    %cst_79 = arith.constant dense<0.000000e+00> : vector<1x192xf32>
    %141 = tpu.matmul %139, %140, %cst_79 {dimension_numbers = #tpu.dot_dimension_numbers<[1], [0], [0], [1], [0, 0, 1, 1], [], []>} : vector<1x64xf32>, vector<64x192xf32>, vector<1x192xf32> -> vector<1x192xf32>
    %142 = arith.index_cast %120 : i32 to index
    %c0_80 = arith.constant 0 : index
    %143 = vector.load %arg11[%142, %c0_80] : memref<6x64xf32, #tpu.memory_space<vmem>>, vector<1x64xf32>
    %144 = vector.extract_strided_slice %124 {offsets = [0, 32], sizes = [1, 64], strides = [1, 1]} : vector<1x224xf32> to vector<1x64xf32>
    %145 = arith.addf %143, %144 : vector<1x64xf32>
    %146 = vector.extract_strided_slice %141 {offsets = [0, 0], sizes = [1, 64], strides = [1, 1]} : vector<1x192xf32> to vector<1x64xf32>
    %147 = arith.addf %145, %146 : vector<1x64xf32>
    %148 = math.tanh %147 : vector<1x64xf32>
    %c0_81 = arith.constant 0 : index
    %c0_82 = arith.constant 0 : index
    %149 = vector.load %arg6[%c0_81, %c0_82] : memref<64x40xf32, #tpu.memory_space<vmem>>, vector<64x40xf32>
    %cst_83 = arith.constant dense<0.000000e+00> : vector<1x40xf32>
    %150 = tpu.matmul %148, %149, %cst_83 {dimension_numbers = #tpu.dot_dimension_numbers<[1], [0], [0], [1], [0, 0, 1, 1], [], []>} : vector<1x64xf32>, vector<64x40xf32>, vector<1x40xf32> -> vector<1x40xf32>
    %151 = arith.addf %150, %17 : vector<1x40xf32>
    %cst_84 = arith.constant dense<0xFF800000> : vector<1xf32>
    %152 = vector.multi_reduction <maximumf>, %151, %cst_84 [1] : vector<1x40xf32> to vector<1xf32>
    %153 = vector.shape_cast %152 : vector<1xf32> to vector<1x1xf32>
    %154 = vector.broadcast %153 : vector<1x1xf32> to vector<1x40xf32>
    %155 = arith.subf %151, %154 : vector<1x40xf32>
    %156 = math.exp %155 : vector<1x40xf32>
    %cst_85 = arith.constant dense<0.000000e+00> : vector<1xf32>
    %157 = vector.multi_reduction <add>, %156, %cst_85 [1] : vector<1x40xf32> to vector<1xf32>
    %158 = vector.shape_cast %157 : vector<1xf32> to vector<1x1xf32>
    %159 = math.log %158 : vector<1x1xf32>
    %160 = arith.addf %159, %153 : vector<1x1xf32>
    %161 = vector.broadcast %160 : vector<1x1xf32> to vector<1x40xf32>
    %162 = arith.subf %151, %161 : vector<1x40xf32>
    %163 = arith.index_cast %120 : i32 to index
    %c0_86 = arith.constant 0 : index
    %164 = vector.load %arg12[%163, %c0_86] : memref<6x128xf32, #tpu.memory_space<vmem>>, vector<1x128xf32>
    %165 = vector.extract_strided_slice %124 {offsets = [0, 96], sizes = [1, 128], strides = [1, 1]} : vector<1x224xf32> to vector<1x128xf32>
    %166 = arith.addf %164, %165 : vector<1x128xf32>
    %167 = vector.extract_strided_slice %141 {offsets = [0, 64], sizes = [1, 128], strides = [1, 1]} : vector<1x192xf32> to vector<1x128xf32>
    %168 = arith.addf %166, %167 : vector<1x128xf32>
    %169 = vector.extract_strided_slice %168 {offsets = [0, 0], sizes = [1, 32], strides = [1, 1]} : vector<1x128xf32> to vector<1x32xf32>
    %170 = arith.negf %169 : vector<1x32xf32>
    %171 = math.exp %170 : vector<1x32xf32>
    %cst_87 = arith.constant 1.000000e+00 : f32
    %172 = vector.broadcast %cst_87 : f32 to vector<1x32xf32>
    %173 = arith.addf %172, %171 : vector<1x32xf32>
    %174 = arith.divf %172, %173 : vector<1x32xf32>
    %175 = vector.extract_strided_slice %168 {offsets = [0, 32], sizes = [1, 32], strides = [1, 1]} : vector<1x128xf32> to vector<1x32xf32>
    %176 = arith.negf %175 : vector<1x32xf32>
    %177 = math.exp %176 : vector<1x32xf32>
    %cst_88 = arith.constant 1.000000e+00 : f32
    %178 = vector.broadcast %cst_88 : f32 to vector<1x32xf32>
    %179 = arith.addf %178, %177 : vector<1x32xf32>
    %180 = arith.divf %178, %179 : vector<1x32xf32>
    %181 = vector.extract_strided_slice %168 {offsets = [0, 64], sizes = [1, 32], strides = [1, 1]} : vector<1x128xf32> to vector<1x32xf32>
    %182 = math.tanh %181 : vector<1x32xf32>
    %183 = vector.extract_strided_slice %168 {offsets = [0, 96], sizes = [1, 32], strides = [1, 1]} : vector<1x128xf32> to vector<1x32xf32>
    %184 = arith.negf %183 : vector<1x32xf32>
    %185 = math.exp %184 : vector<1x32xf32>
    %cst_89 = arith.constant 1.000000e+00 : f32
    %186 = vector.broadcast %cst_89 : f32 to vector<1x32xf32>
    %187 = arith.addf %186, %185 : vector<1x32xf32>
    %188 = arith.divf %186, %187 : vector<1x32xf32>
    %189 = arith.mulf %180, %122 : vector<1x32xf32>
    %190 = arith.mulf %174, %182 : vector<1x32xf32>
    %191 = arith.addf %189, %190 : vector<1x32xf32>
    %192 = math.tanh %191 : vector<1x32xf32>
    %193 = arith.mulf %188, %192 : vector<1x32xf32>
    %c0_90 = arith.constant 0 : index
    %c0_91 = arith.constant 0 : index
    %194 = vector.load %arg9[%c0_90, %c0_91] : memref<1x32xf32, #tpu.memory_space<vmem>>, vector<1x32xf32>
    tpu.vector_store %arg9[%c0_90, %c0_91], %193 {strides = array<i32>} : memref<1x32xf32, #tpu.memory_space<vmem>>, vector<1x32xf32>,
    %c0_92 = arith.constant 0 : index
    %c0_93 = arith.constant 0 : index
    %195 = vector.load %arg10[%c0_92, %c0_93] : memref<1x32xf32, #tpu.memory_space<vmem>>, vector<1x32xf32>
    tpu.vector_store %arg10[%c0_92, %c0_93], %191 {strides = array<i32>} : memref<1x32xf32, #tpu.memory_space<vmem>>, vector<1x32xf32>,
    %196 = arith.index_cast %120 : i32 to index
    %c0_94 = arith.constant 0 : index
    %197 = vector.load %arg8[%196, %c0_94] : memref<6x640xf32, #tpu.memory_space<vmem>>, vector<1x40xf32>
    tpu.vector_store %arg8[%196, %c0_94], %162 {strides = array<i32>} : memref<6x640xf32, #tpu.memory_space<vmem>>, vector<1x40xf32>,
    %198 = arith.index_cast %120 : i32 to index
    %c128_95 = arith.constant 128 : index
    %199 = vector.load %arg8[%198, %c128_95] : memref<6x640xf32, #tpu.memory_space<vmem>>, vector<1x64xf32>
    tpu.vector_store %arg8[%198, %c128_95], %139 {strides = array<i32>} : memref<6x640xf32, #tpu.memory_space<vmem>>, vector<1x64xf32>,
    %200 = arith.index_cast %120 : i32 to index
    %c256_96 = arith.constant 256 : index
    %201 = vector.load %arg8[%200, %c256_96] : memref<6x640xf32, #tpu.memory_space<vmem>>, vector<1x32xf32>
    tpu.vector_store %arg8[%200, %c256_96], %193 {strides = array<i32>} : memref<6x640xf32, #tpu.memory_space<vmem>>, vector<1x32xf32>,
    %202 = arith.index_cast %120 : i32 to index
    %c384_97 = arith.constant 384 : index
    %203 = vector.load %arg8[%202, %c384_97] : memref<6x640xf32, #tpu.memory_space<vmem>>, vector<1x32xf32>
    tpu.vector_store %arg8[%202, %c384_97], %191 {strides = array<i32>} : memref<6x640xf32, #tpu.memory_space<vmem>>, vector<1x32xf32>,
    %204 = arith.index_cast %120 : i32 to index
    %c512_98 = arith.constant 512 : index
    %205 = vector.load %arg8[%204, %c512_98] : memref<6x640xf32, #tpu.memory_space<vmem>>, vector<1x8xf32>
    tpu.vector_store %arg8[%204, %c512_98], %138 {strides = array<i32>} : memref<6x640xf32, #tpu.memory_space<vmem>>, vector<1x8xf32>,
    %c2_i32 = arith.constant 2 : i32
    %c1_i32_99 = arith.constant 1 : i32
    %206 = arith.muli %c2_i32, %c1_i32_99 : i32
    %c0_i32_100 = arith.constant 0 : i32
    %207 = arith.addi %c0_i32_100, %206 : i32
    %c0_101 = arith.constant 0 : index
    %c0_102 = arith.constant 0 : index
    %208 = vector.load %arg9[%c0_101, %c0_102] : memref<1x32xf32, #tpu.memory_space<vmem>>, vector<1x32xf32>
    %c0_103 = arith.constant 0 : index
    %c0_104 = arith.constant 0 : index
    %209 = vector.load %arg10[%c0_103, %c0_104] : memref<1x32xf32, #tpu.memory_space<vmem>>, vector<1x32xf32>
    %c0_105 = arith.constant 0 : index
    %c0_106 = arith.constant 0 : index
    %210 = vector.load %arg3[%c0_105, %c0_106] : memref<32x288xf32, #tpu.memory_space<vmem>>, vector<32x224xf32>
    %cst_107 = arith.constant dense<0.000000e+00> : vector<1x224xf32>
    %211 = tpu.matmul %208, %210, %cst_107 {dimension_numbers = #tpu.dot_dimension_numbers<[1], [0], [0], [1], [0, 0, 1, 1], [], []>} : vector<1x32xf32>, vector<32x224xf32>, vector<1x224xf32> -> vector<1x224xf32>
    %212 = vector.extract_strided_slice %211 {offsets = [0, 0], sizes = [1, 32], strides = [1, 1]} : vector<1x224xf32> to vector<1x32xf32>
    %213 = vector.broadcast %212 : vector<1x32xf32> to vector<8x32xf32>
    %214 = arith.addf %213, %15 : vector<8x32xf32>
    %215 = math.tanh %214 : vector<8x32xf32>
    %cst_108 = arith.constant dense<0.000000e+00> : vector<1x8xf32>
    %216 = tpu.matmul %16, %215, %cst_108 {dimension_numbers = #tpu.dot_dimension_numbers<[1], [1], [0], [0], [0, 0, 1, 0], [], []>} : vector<1x32xf32>, vector<8x32xf32>, vector<1x8xf32> -> vector<1x8xf32>
    %cst_109 = arith.constant dense<0xFF800000> : vector<1xf32>
    %217 = vector.multi_reduction <maximumf>, %216, %cst_109 [1] : vector<1x8xf32> to vector<1xf32>
    %218 = vector.shape_cast %217 : vector<1xf32> to vector<1x1xf32>
    %219 = vector.broadcast %218 : vector<1x1xf32> to vector<1x8xf32>
    %220 = arith.subf %216, %219 : vector<1x8xf32>
    %221 = math.exp %220 : vector<1x8xf32>
    %cst_110 = arith.constant dense<0.000000e+00> : vector<1xf32>
    %222 = vector.multi_reduction <add>, %221, %cst_110 [1] : vector<1x8xf32> to vector<1xf32>
    %223 = vector.shape_cast %222 : vector<1xf32> to vector<1x1xf32>
    %224 = vector.broadcast %223 : vector<1x1xf32> to vector<1x8xf32>
    %225 = arith.divf %221, %224 : vector<1x8xf32>
    %cst_111 = arith.constant dense<0.000000e+00> : vector<1x64xf32>
    %226 = tpu.matmul %225, %13, %cst_111 {dimension_numbers = #tpu.dot_dimension_numbers<[1], [0], [0], [1], [0, 0, 1, 1], [], []>} : vector<1x8xf32>, vector<8x64xf32>, vector<1x64xf32> -> vector<1x64xf32>
    %c0_112 = arith.constant 0 : index
    %c0_113 = arith.constant 0 : index
    %227 = vector.load %arg4[%c0_112, %c0_113] : memref<64x224xf32, #tpu.memory_space<vmem>>, vector<64x192xf32>
    %cst_114 = arith.constant dense<0.000000e+00> : vector<1x192xf32>
    %228 = tpu.matmul %226, %227, %cst_114 {dimension_numbers = #tpu.dot_dimension_numbers<[1], [0], [0], [1], [0, 0, 1, 1], [], []>} : vector<1x64xf32>, vector<64x192xf32>, vector<1x192xf32> -> vector<1x192xf32>
    %229 = arith.index_cast %207 : i32 to index
    %c0_115 = arith.constant 0 : index
    %230 = vector.load %arg11[%229, %c0_115] : memref<6x64xf32, #tpu.memory_space<vmem>>, vector<1x64xf32>
    %231 = vector.extract_strided_slice %211 {offsets = [0, 32], sizes = [1, 64], strides = [1, 1]} : vector<1x224xf32> to vector<1x64xf32>
    %232 = arith.addf %230, %231 : vector<1x64xf32>
    %233 = vector.extract_strided_slice %228 {offsets = [0, 0], sizes = [1, 64], strides = [1, 1]} : vector<1x192xf32> to vector<1x64xf32>
    %234 = arith.addf %232, %233 : vector<1x64xf32>
    %235 = math.tanh %234 : vector<1x64xf32>
    %c0_116 = arith.constant 0 : index
    %c0_117 = arith.constant 0 : index
    %236 = vector.load %arg6[%c0_116, %c0_117] : memref<64x40xf32, #tpu.memory_space<vmem>>, vector<64x40xf32>
    %cst_118 = arith.constant dense<0.000000e+00> : vector<1x40xf32>
    %237 = tpu.matmul %235, %236, %cst_118 {dimension_numbers = #tpu.dot_dimension_numbers<[1], [0], [0], [1], [0, 0, 1, 1], [], []>} : vector<1x64xf32>, vector<64x40xf32>, vector<1x40xf32> -> vector<1x40xf32>
    %238 = arith.addf %237, %17 : vector<1x40xf32>
    %cst_119 = arith.constant dense<0xFF800000> : vector<1xf32>
    %239 = vector.multi_reduction <maximumf>, %238, %cst_119 [1] : vector<1x40xf32> to vector<1xf32>
    %240 = vector.shape_cast %239 : vector<1xf32> to vector<1x1xf32>
    %241 = vector.broadcast %240 : vector<1x1xf32> to vector<1x40xf32>
    %242 = arith.subf %238, %241 : vector<1x40xf32>
    %243 = math.exp %242 : vector<1x40xf32>
    %cst_120 = arith.constant dense<0.000000e+00> : vector<1xf32>
    %244 = vector.multi_reduction <add>, %243, %cst_120 [1] : vector<1x40xf32> to vector<1xf32>
    %245 = vector.shape_cast %244 : vector<1xf32> to vector<1x1xf32>
    %246 = math.log %245 : vector<1x1xf32>
    %247 = arith.addf %246, %240 : vector<1x1xf32>
    %248 = vector.broadcast %247 : vector<1x1xf32> to vector<1x40xf32>
    %249 = arith.subf %238, %248 : vector<1x40xf32>
    %250 = arith.index_cast %207 : i32 to index
    %c0_121 = arith.constant 0 : index
    %251 = vector.load %arg12[%250, %c0_121] : memref<6x128xf32, #tpu.memory_space<vmem>>, vector<1x128xf32>
    %252 = vector.extract_strided_slice %211 {offsets = [0, 96], sizes = [1, 128], strides = [1, 1]} : vector<1x224xf32> to vector<1x128xf32>
    %253 = arith.addf %251, %252 : vector<1x128xf32>
    %254 = vector.extract_strided_slice %228 {offsets = [0, 64], sizes = [1, 128], strides = [1, 1]} : vector<1x192xf32> to vector<1x128xf32>
    %255 = arith.addf %253, %254 : vector<1x128xf32>
    %256 = vector.extract_strided_slice %255 {offsets = [0, 0], sizes = [1, 32], strides = [1, 1]} : vector<1x128xf32> to vector<1x32xf32>
    %257 = arith.negf %256 : vector<1x32xf32>
    %258 = math.exp %257 : vector<1x32xf32>
    %cst_122 = arith.constant 1.000000e+00 : f32
    %259 = vector.broadcast %cst_122 : f32 to vector<1x32xf32>
    %260 = arith.addf %259, %258 : vector<1x32xf32>
    %261 = arith.divf %259, %260 : vector<1x32xf32>
    %262 = vector.extract_strided_slice %255 {offsets = [0, 32], sizes = [1, 32], strides = [1, 1]} : vector<1x128xf32> to vector<1x32xf32>
    %263 = arith.negf %262 : vector<1x32xf32>
    %264 = math.exp %263 : vector<1x32xf32>
    %cst_123 = arith.constant 1.000000e+00 : f32
    %265 = vector.broadcast %cst_123 : f32 to vector<1x32xf32>
    %266 = arith.addf %265, %264 : vector<1x32xf32>
    %267 = arith.divf %265, %266 : vector<1x32xf32>
    %268 = vector.extract_strided_slice %255 {offsets = [0, 64], sizes = [1, 32], strides = [1, 1]} : vector<1x128xf32> to vector<1x32xf32>
    %269 = math.tanh %268 : vector<1x32xf32>
    %270 = vector.extract_strided_slice %255 {offsets = [0, 96], sizes = [1, 32], strides = [1, 1]} : vector<1x128xf32> to vector<1x32xf32>
    %271 = arith.negf %270 : vector<1x32xf32>
    %272 = math.exp %271 : vector<1x32xf32>
    %cst_124 = arith.constant 1.000000e+00 : f32
    %273 = vector.broadcast %cst_124 : f32 to vector<1x32xf32>
    %274 = arith.addf %273, %272 : vector<1x32xf32>
    %275 = arith.divf %273, %274 : vector<1x32xf32>
    %276 = arith.mulf %267, %209 : vector<1x32xf32>
    %277 = arith.mulf %261, %269 : vector<1x32xf32>
    %278 = arith.addf %276, %277 : vector<1x32xf32>
    %279 = math.tanh %278 : vector<1x32xf32>
    %280 = arith.mulf %275, %279 : vector<1x32xf32>
    %c0_125 = arith.constant 0 : index
    %c0_126 = arith.constant 0 : index
    %281 = vector.load %arg9[%c0_125, %c0_126] : memref<1x32xf32, #tpu.memory_space<vmem>>, vector<1x32xf32>
    tpu.vector_store %arg9[%c0_125, %c0_126], %280 {strides = array<i32>} : memref<1x32xf32, #tpu.memory_space<vmem>>, vector<1x32xf32>,
    %c0_127 = arith.constant 0 : index
    %c0_128 = arith.constant 0 : index
    %282 = vector.load %arg10[%c0_127, %c0_128] : memref<1x32xf32, #tpu.memory_space<vmem>>, vector<1x32xf32>
    tpu.vector_store %arg10[%c0_127, %c0_128], %278 {strides = array<i32>} : memref<1x32xf32, #tpu.memory_space<vmem>>, vector<1x32xf32>,
    %283 = arith.index_cast %207 : i32 to index
    %c0_129 = arith.constant 0 : index
    %284 = vector.load %arg8[%283, %c0_129] : memref<6x640xf32, #tpu.memory_space<vmem>>, vector<1x40xf32>
    tpu.vector_store %arg8[%283, %c0_129], %249 {strides = array<i32>} : memref<6x640xf32, #tpu.memory_space<vmem>>, vector<1x40xf32>,
    %285 = arith.index_cast %207 : i32 to index
    %c128_130 = arith.constant 128 : index
    %286 = vector.load %arg8[%285, %c128_130] : memref<6x640xf32, #tpu.memory_space<vmem>>, vector<1x64xf32>
    tpu.vector_store %arg8[%285, %c128_130], %226 {strides = array<i32>} : memref<6x640xf32, #tpu.memory_space<vmem>>, vector<1x64xf32>,
    %287 = arith.index_cast %207 : i32 to index
    %c256_131 = arith.constant 256 : index
    %288 = vector.load %arg8[%287, %c256_131] : memref<6x640xf32, #tpu.memory_space<vmem>>, vector<1x32xf32>
    tpu.vector_store %arg8[%287, %c256_131], %280 {strides = array<i32>} : memref<6x640xf32, #tpu.memory_space<vmem>>, vector<1x32xf32>,
    %289 = arith.index_cast %207 : i32 to index
    %c384_132 = arith.constant 384 : index
    %290 = vector.load %arg8[%289, %c384_132] : memref<6x640xf32, #tpu.memory_space<vmem>>, vector<1x32xf32>
    tpu.vector_store %arg8[%289, %c384_132], %278 {strides = array<i32>} : memref<6x640xf32, #tpu.memory_space<vmem>>, vector<1x32xf32>,
    %291 = arith.index_cast %207 : i32 to index
    %c512_133 = arith.constant 512 : index
    %292 = vector.load %arg8[%291, %c512_133] : memref<6x640xf32, #tpu.memory_space<vmem>>, vector<1x8xf32>
    tpu.vector_store %arg8[%291, %c512_133], %225 {strides = array<i32>} : memref<6x640xf32, #tpu.memory_space<vmem>>, vector<1x8xf32>,
    %c3_i32 = arith.constant 3 : i32
    %c1_i32_134 = arith.constant 1 : i32
    %293 = arith.muli %c3_i32, %c1_i32_134 : i32
    %c0_i32_135 = arith.constant 0 : i32
    %294 = arith.addi %c0_i32_135, %293 : i32
    %c0_136 = arith.constant 0 : index
    %c0_137 = arith.constant 0 : index
    %295 = vector.load %arg9[%c0_136, %c0_137] : memref<1x32xf32, #tpu.memory_space<vmem>>, vector<1x32xf32>
    %c0_138 = arith.constant 0 : index
    %c0_139 = arith.constant 0 : index
    %296 = vector.load %arg10[%c0_138, %c0_139] : memref<1x32xf32, #tpu.memory_space<vmem>>, vector<1x32xf32>
    %c0_140 = arith.constant 0 : index
    %c0_141 = arith.constant 0 : index
    %297 = vector.load %arg3[%c0_140, %c0_141] : memref<32x288xf32, #tpu.memory_space<vmem>>, vector<32x224xf32>
    %cst_142 = arith.constant dense<0.000000e+00> : vector<1x224xf32>
    %298 = tpu.matmul %295, %297, %cst_142 {dimension_numbers = #tpu.dot_dimension_numbers<[1], [0], [0], [1], [0, 0, 1, 1], [], []>} : vector<1x32xf32>, vector<32x224xf32>, vector<1x224xf32> -> vector<1x224xf32>
    %299 = vector.extract_strided_slice %298 {offsets = [0, 0], sizes = [1, 32], strides = [1, 1]} : vector<1x224xf32> to vector<1x32xf32>
    %300 = vector.broadcast %299 : vector<1x32xf32> to vector<8x32xf32>
    %301 = arith.addf %300, %15 : vector<8x32xf32>
    %302 = math.tanh %301 : vector<8x32xf32>
    %cst_143 = arith.constant dense<0.000000e+00> : vector<1x8xf32>
    %303 = tpu.matmul %16, %302, %cst_143 {dimension_numbers = #tpu.dot_dimension_numbers<[1], [1], [0], [0], [0, 0, 1, 0], [], []>} : vector<1x32xf32>, vector<8x32xf32>, vector<1x8xf32> -> vector<1x8xf32>
    %cst_144 = arith.constant dense<0xFF800000> : vector<1xf32>
    %304 = vector.multi_reduction <maximumf>, %303, %cst_144 [1] : vector<1x8xf32> to vector<1xf32>
    %305 = vector.shape_cast %304 : vector<1xf32> to vector<1x1xf32>
    %306 = vector.broadcast %305 : vector<1x1xf32> to vector<1x8xf32>
    %307 = arith.subf %303, %306 : vector<1x8xf32>
    %308 = math.exp %307 : vector<1x8xf32>
    %cst_145 = arith.constant dense<0.000000e+00> : vector<1xf32>
    %309 = vector.multi_reduction <add>, %308, %cst_145 [1] : vector<1x8xf32> to vector<1xf32>
    %310 = vector.shape_cast %309 : vector<1xf32> to vector<1x1xf32>
    %311 = vector.broadcast %310 : vector<1x1xf32> to vector<1x8xf32>
    %312 = arith.divf %308, %311 : vector<1x8xf32>
    %cst_146 = arith.constant dense<0.000000e+00> : vector<1x64xf32>
    %313 = tpu.matmul %312, %13, %cst_146 {dimension_numbers = #tpu.dot_dimension_numbers<[1], [0], [0], [1], [0, 0, 1, 1], [], []>} : vector<1x8xf32>, vector<8x64xf32>, vector<1x64xf32> -> vector<1x64xf32>
    %c0_147 = arith.constant 0 : index
    %c0_148 = arith.constant 0 : index
    %314 = vector.load %arg4[%c0_147, %c0_148] : memref<64x224xf32, #tpu.memory_space<vmem>>, vector<64x192xf32>
    %cst_149 = arith.constant dense<0.000000e+00> : vector<1x192xf32>
    %315 = tpu.matmul %313, %314, %cst_149 {dimension_numbers = #tpu.dot_dimension_numbers<[1], [0], [0], [1], [0, 0, 1, 1], [], []>} : vector<1x64xf32>, vector<64x192xf32>, vector<1x192xf32> -> vector<1x192xf32>
    %316 = arith.index_cast %294 : i32 to index
    %c0_150 = arith.constant 0 : index
    %317 = vector.load %arg11[%316, %c0_150] : memref<6x64xf32, #tpu.memory_space<vmem>>, vector<1x64xf32>
    %318 = vector.extract_strided_slice %298 {offsets = [0, 32], sizes = [1, 64], strides = [1, 1]} : vector<1x224xf32> to vector<1x64xf32>
    %319 = arith.addf %317, %318 : vector<1x64xf32>
    %320 = vector.extract_strided_slice %315 {offsets = [0, 0], sizes = [1, 64], strides = [1, 1]} : vector<1x192xf32> to vector<1x64xf32>
    %321 = arith.addf %319, %320 : vector<1x64xf32>
    %322 = math.tanh %321 : vector<1x64xf32>
    %c0_151 = arith.constant 0 : index
    %c0_152 = arith.constant 0 : index
    %323 = vector.load %arg6[%c0_151, %c0_152] : memref<64x40xf32, #tpu.memory_space<vmem>>, vector<64x40xf32>
    %cst_153 = arith.constant dense<0.000000e+00> : vector<1x40xf32>
    %324 = tpu.matmul %322, %323, %cst_153 {dimension_numbers = #tpu.dot_dimension_numbers<[1], [0], [0], [1], [0, 0, 1, 1], [], []>} : vector<1x64xf32>, vector<64x40xf32>, vector<1x40xf32> -> vector<1x40xf32>
    %325 = arith.addf %324, %17 : vector<1x40xf32>
    %cst_154 = arith.constant dense<0xFF800000> : vector<1xf32>
    %326 = vector.multi_reduction <maximumf>, %325, %cst_154 [1] : vector<1x40xf32> to vector<1xf32>
    %327 = vector.shape_cast %326 : vector<1xf32> to vector<1x1xf32>
    %328 = vector.broadcast %327 : vector<1x1xf32> to vector<1x40xf32>
    %329 = arith.subf %325, %328 : vector<1x40xf32>
    %330 = math.exp %329 : vector<1x40xf32>
    %cst_155 = arith.constant dense<0.000000e+00> : vector<1xf32>
    %331 = vector.multi_reduction <add>, %330, %cst_155 [1] : vector<1x40xf32> to vector<1xf32>
    %332 = vector.shape_cast %331 : vector<1xf32> to vector<1x1xf32>
    %333 = math.log %332 : vector<1x1xf32>
    %334 = arith.addf %333, %327 : vector<1x1xf32>
    %335 = vector.broadcast %334 : vector<1x1xf32> to vector<1x40xf32>
    %336 = arith.subf %325, %335 : vector<1x40xf32>
    %337 = arith.index_cast %294 : i32 to index
    %c0_156 = arith.constant 0 : index
    %338 = vector.load %arg12[%337, %c0_156] : memref<6x128xf32, #tpu.memory_space<vmem>>, vector<1x128xf32>
    %339 = vector.extract_strided_slice %298 {offsets = [0, 96], sizes = [1, 128], strides = [1, 1]} : vector<1x224xf32> to vector<1x128xf32>
    %340 = arith.addf %338, %339 : vector<1x128xf32>
    %341 = vector.extract_strided_slice %315 {offsets = [0, 64], sizes = [1, 128], strides = [1, 1]} : vector<1x192xf32> to vector<1x128xf32>
    %342 = arith.addf %340, %341 : vector<1x128xf32>
    %343 = vector.extract_strided_slice %342 {offsets = [0, 0], sizes = [1, 32], strides = [1, 1]} : vector<1x128xf32> to vector<1x32xf32>
    %344 = arith.negf %343 : vector<1x32xf32>
    %345 = math.exp %344 : vector<1x32xf32>
    %cst_157 = arith.constant 1.000000e+00 : f32
    %346 = vector.broadcast %cst_157 : f32 to vector<1x32xf32>
    %347 = arith.addf %346, %345 : vector<1x32xf32>
    %348 = arith.divf %346, %347 : vector<1x32xf32>
    %349 = vector.extract_strided_slice %342 {offsets = [0, 32], sizes = [1, 32], strides = [1, 1]} : vector<1x128xf32> to vector<1x32xf32>
    %350 = arith.negf %349 : vector<1x32xf32>
    %351 = math.exp %350 : vector<1x32xf32>
    %cst_158 = arith.constant 1.000000e+00 : f32
    %352 = vector.broadcast %cst_158 : f32 to vector<1x32xf32>
    %353 = arith.addf %352, %351 : vector<1x32xf32>
    %354 = arith.divf %352, %353 : vector<1x32xf32>
    %355 = vector.extract_strided_slice %342 {offsets = [0, 64], sizes = [1, 32], strides = [1, 1]} : vector<1x128xf32> to vector<1x32xf32>
    %356 = math.tanh %355 : vector<1x32xf32>
    %357 = vector.extract_strided_slice %342 {offsets = [0, 96], sizes = [1, 32], strides = [1, 1]} : vector<1x128xf32> to vector<1x32xf32>
    %358 = arith.negf %357 : vector<1x32xf32>
    %359 = math.exp %358 : vector<1x32xf32>
    %cst_159 = arith.constant 1.000000e+00 : f32
    %360 = vector.broadcast %cst_159 : f32 to vector<1x32xf32>
    %361 = arith.addf %360, %359 : vector<1x32xf32>
    %362 = arith.divf %360, %361 : vector<1x32xf32>
    %363 = arith.mulf %354, %296 : vector<1x32xf32>
    %364 = arith.mulf %348, %356 : vector<1x32xf32>
    %365 = arith.addf %363, %364 : vector<1x32xf32>
    %366 = math.tanh %365 : vector<1x32xf32>
    %367 = arith.mulf %362, %366 : vector<1x32xf32>
    %c0_160 = arith.constant 0 : index
    %c0_161 = arith.constant 0 : index
    %368 = vector.load %arg9[%c0_160, %c0_161] : memref<1x32xf32, #tpu.memory_space<vmem>>, vector<1x32xf32>
    tpu.vector_store %arg9[%c0_160, %c0_161], %367 {strides = array<i32>} : memref<1x32xf32, #tpu.memory_space<vmem>>, vector<1x32xf32>,
    %c0_162 = arith.constant 0 : index
    %c0_163 = arith.constant 0 : index
    %369 = vector.load %arg10[%c0_162, %c0_163] : memref<1x32xf32, #tpu.memory_space<vmem>>, vector<1x32xf32>
    tpu.vector_store %arg10[%c0_162, %c0_163], %365 {strides = array<i32>} : memref<1x32xf32, #tpu.memory_space<vmem>>, vector<1x32xf32>,
    %370 = arith.index_cast %294 : i32 to index
    %c0_164 = arith.constant 0 : index
    %371 = vector.load %arg8[%370, %c0_164] : memref<6x640xf32, #tpu.memory_space<vmem>>, vector<1x40xf32>
    tpu.vector_store %arg8[%370, %c0_164], %336 {strides = array<i32>} : memref<6x640xf32, #tpu.memory_space<vmem>>, vector<1x40xf32>,
    %372 = arith.index_cast %294 : i32 to index
    %c128_165 = arith.constant 128 : index
    %373 = vector.load %arg8[%372, %c128_165] : memref<6x640xf32, #tpu.memory_space<vmem>>, vector<1x64xf32>
    tpu.vector_store %arg8[%372, %c128_165], %313 {strides = array<i32>} : memref<6x640xf32, #tpu.memory_space<vmem>>, vector<1x64xf32>,
    %374 = arith.index_cast %294 : i32 to index
    %c256_166 = arith.constant 256 : index
    %375 = vector.load %arg8[%374, %c256_166] : memref<6x640xf32, #tpu.memory_space<vmem>>, vector<1x32xf32>
    tpu.vector_store %arg8[%374, %c256_166], %367 {strides = array<i32>} : memref<6x640xf32, #tpu.memory_space<vmem>>, vector<1x32xf32>,
    %376 = arith.index_cast %294 : i32 to index
    %c384_167 = arith.constant 384 : index
    %377 = vector.load %arg8[%376, %c384_167] : memref<6x640xf32, #tpu.memory_space<vmem>>, vector<1x32xf32>
    tpu.vector_store %arg8[%376, %c384_167], %365 {strides = array<i32>} : memref<6x640xf32, #tpu.memory_space<vmem>>, vector<1x32xf32>,
    %378 = arith.index_cast %294 : i32 to index
    %c512_168 = arith.constant 512 : index
    %379 = vector.load %arg8[%378, %c512_168] : memref<6x640xf32, #tpu.memory_space<vmem>>, vector<1x8xf32>
    tpu.vector_store %arg8[%378, %c512_168], %312 {strides = array<i32>} : memref<6x640xf32, #tpu.memory_space<vmem>>, vector<1x8xf32>,
    %c4_i32 = arith.constant 4 : i32
    %c1_i32_169 = arith.constant 1 : i32
    %380 = arith.muli %c4_i32, %c1_i32_169 : i32
    %c0_i32_170 = arith.constant 0 : i32
    %381 = arith.addi %c0_i32_170, %380 : i32
    %c0_171 = arith.constant 0 : index
    %c0_172 = arith.constant 0 : index
    %382 = vector.load %arg9[%c0_171, %c0_172] : memref<1x32xf32, #tpu.memory_space<vmem>>, vector<1x32xf32>
    %c0_173 = arith.constant 0 : index
    %c0_174 = arith.constant 0 : index
    %383 = vector.load %arg10[%c0_173, %c0_174] : memref<1x32xf32, #tpu.memory_space<vmem>>, vector<1x32xf32>
    %c0_175 = arith.constant 0 : index
    %c0_176 = arith.constant 0 : index
    %384 = vector.load %arg3[%c0_175, %c0_176] : memref<32x288xf32, #tpu.memory_space<vmem>>, vector<32x224xf32>
    %cst_177 = arith.constant dense<0.000000e+00> : vector<1x224xf32>
    %385 = tpu.matmul %382, %384, %cst_177 {dimension_numbers = #tpu.dot_dimension_numbers<[1], [0], [0], [1], [0, 0, 1, 1], [], []>} : vector<1x32xf32>, vector<32x224xf32>, vector<1x224xf32> -> vector<1x224xf32>
    %386 = vector.extract_strided_slice %385 {offsets = [0, 0], sizes = [1, 32], strides = [1, 1]} : vector<1x224xf32> to vector<1x32xf32>
    %387 = vector.broadcast %386 : vector<1x32xf32> to vector<8x32xf32>
    %388 = arith.addf %387, %15 : vector<8x32xf32>
    %389 = math.tanh %388 : vector<8x32xf32>
    %cst_178 = arith.constant dense<0.000000e+00> : vector<1x8xf32>
    %390 = tpu.matmul %16, %389, %cst_178 {dimension_numbers = #tpu.dot_dimension_numbers<[1], [1], [0], [0], [0, 0, 1, 0], [], []>} : vector<1x32xf32>, vector<8x32xf32>, vector<1x8xf32> -> vector<1x8xf32>
    %cst_179 = arith.constant dense<0xFF800000> : vector<1xf32>
    %391 = vector.multi_reduction <maximumf>, %390, %cst_179 [1] : vector<1x8xf32> to vector<1xf32>
    %392 = vector.shape_cast %391 : vector<1xf32> to vector<1x1xf32>
    %393 = vector.broadcast %392 : vector<1x1xf32> to vector<1x8xf32>
    %394 = arith.subf %390, %393 : vector<1x8xf32>
    %395 = math.exp %394 : vector<1x8xf32>
    %cst_180 = arith.constant dense<0.000000e+00> : vector<1xf32>
    %396 = vector.multi_reduction <add>, %395, %cst_180 [1] : vector<1x8xf32> to vector<1xf32>
    %397 = vector.shape_cast %396 : vector<1xf32> to vector<1x1xf32>
    %398 = vector.broadcast %397 : vector<1x1xf32> to vector<1x8xf32>
    %399 = arith.divf %395, %398 : vector<1x8xf32>
    %cst_181 = arith.constant dense<0.000000e+00> : vector<1x64xf32>
    %400 = tpu.matmul %399, %13, %cst_181 {dimension_numbers = #tpu.dot_dimension_numbers<[1], [0], [0], [1], [0, 0, 1, 1], [], []>} : vector<1x8xf32>, vector<8x64xf32>, vector<1x64xf32> -> vector<1x64xf32>
    %c0_182 = arith.constant 0 : index
    %c0_183 = arith.constant 0 : index
    %401 = vector.load %arg4[%c0_182, %c0_183] : memref<64x224xf32, #tpu.memory_space<vmem>>, vector<64x192xf32>
    %cst_184 = arith.constant dense<0.000000e+00> : vector<1x192xf32>
    %402 = tpu.matmul %400, %401, %cst_184 {dimension_numbers = #tpu.dot_dimension_numbers<[1], [0], [0], [1], [0, 0, 1, 1], [], []>} : vector<1x64xf32>, vector<64x192xf32>, vector<1x192xf32> -> vector<1x192xf32>
    %403 = arith.index_cast %381 : i32 to index
    %c0_185 = arith.constant 0 : index
    %404 = vector.load %arg11[%403, %c0_185] : memref<6x64xf32, #tpu.memory_space<vmem>>, vector<1x64xf32>
    %405 = vector.extract_strided_slice %385 {offsets = [0, 32], sizes = [1, 64], strides = [1, 1]} : vector<1x224xf32> to vector<1x64xf32>
    %406 = arith.addf %404, %405 : vector<1x64xf32>
    %407 = vector.extract_strided_slice %402 {offsets = [0, 0], sizes = [1, 64], strides = [1, 1]} : vector<1x192xf32> to vector<1x64xf32>
    %408 = arith.addf %406, %407 : vector<1x64xf32>
    %409 = math.tanh %408 : vector<1x64xf32>
    %c0_186 = arith.constant 0 : index
    %c0_187 = arith.constant 0 : index
    %410 = vector.load %arg6[%c0_186, %c0_187] : memref<64x40xf32, #tpu.memory_space<vmem>>, vector<64x40xf32>
    %cst_188 = arith.constant dense<0.000000e+00> : vector<1x40xf32>
    %411 = tpu.matmul %409, %410, %cst_188 {dimension_numbers = #tpu.dot_dimension_numbers<[1], [0], [0], [1], [0, 0, 1, 1], [], []>} : vector<1x64xf32>, vector<64x40xf32>, vector<1x40xf32> -> vector<1x40xf32>
    %412 = arith.addf %411, %17 : vector<1x40xf32>
    %cst_189 = arith.constant dense<0xFF800000> : vector<1xf32>
    %413 = vector.multi_reduction <maximumf>, %412, %cst_189 [1] : vector<1x40xf32> to vector<1xf32>
    %414 = vector.shape_cast %413 : vector<1xf32> to vector<1x1xf32>
    %415 = vector.broadcast %414 : vector<1x1xf32> to vector<1x40xf32>
    %416 = arith.subf %412, %415 : vector<1x40xf32>
    %417 = math.exp %416 : vector<1x40xf32>
    %cst_190 = arith.constant dense<0.000000e+00> : vector<1xf32>
    %418 = vector.multi_reduction <add>, %417, %cst_190 [1] : vector<1x40xf32> to vector<1xf32>
    %419 = vector.shape_cast %418 : vector<1xf32> to vector<1x1xf32>
    %420 = math.log %419 : vector<1x1xf32>
    %421 = arith.addf %420, %414 : vector<1x1xf32>
    %422 = vector.broadcast %421 : vector<1x1xf32> to vector<1x40xf32>
    %423 = arith.subf %412, %422 : vector<1x40xf32>
    %424 = arith.index_cast %381 : i32 to index
    %c0_191 = arith.constant 0 : index
    %425 = vector.load %arg12[%424, %c0_191] : memref<6x128xf32, #tpu.memory_space<vmem>>, vector<1x128xf32>
    %426 = vector.extract_strided_slice %385 {offsets = [0, 96], sizes = [1, 128], strides = [1, 1]} : vector<1x224xf32> to vector<1x128xf32>
    %427 = arith.addf %425, %426 : vector<1x128xf32>
    %428 = vector.extract_strided_slice %402 {offsets = [0, 64], sizes = [1, 128], strides = [1, 1]} : vector<1x192xf32> to vector<1x128xf32>
    %429 = arith.addf %427, %428 : vector<1x128xf32>
    %430 = vector.extract_strided_slice %429 {offsets = [0, 0], sizes = [1, 32], strides = [1, 1]} : vector<1x128xf32> to vector<1x32xf32>
    %431 = arith.negf %430 : vector<1x32xf32>
    %432 = math.exp %431 : vector<1x32xf32>
    %cst_192 = arith.constant 1.000000e+00 : f32
    %433 = vector.broadcast %cst_192 : f32 to vector<1x32xf32>
    %434 = arith.addf %433, %432 : vector<1x32xf32>
    %435 = arith.divf %433, %434 : vector<1x32xf32>
    %436 = vector.extract_strided_slice %429 {offsets = [0, 32], sizes = [1, 32], strides = [1, 1]} : vector<1x128xf32> to vector<1x32xf32>
    %437 = arith.negf %436 : vector<1x32xf32>
    %438 = math.exp %437 : vector<1x32xf32>
    %cst_193 = arith.constant 1.000000e+00 : f32
    %439 = vector.broadcast %cst_193 : f32 to vector<1x32xf32>
    %440 = arith.addf %439, %438 : vector<1x32xf32>
    %441 = arith.divf %439, %440 : vector<1x32xf32>
    %442 = vector.extract_strided_slice %429 {offsets = [0, 64], sizes = [1, 32], strides = [1, 1]} : vector<1x128xf32> to vector<1x32xf32>
    %443 = math.tanh %442 : vector<1x32xf32>
    %444 = vector.extract_strided_slice %429 {offsets = [0, 96], sizes = [1, 32], strides = [1, 1]} : vector<1x128xf32> to vector<1x32xf32>
    %445 = arith.negf %444 : vector<1x32xf32>
    %446 = math.exp %445 : vector<1x32xf32>
    %cst_194 = arith.constant 1.000000e+00 : f32
    %447 = vector.broadcast %cst_194 : f32 to vector<1x32xf32>
    %448 = arith.addf %447, %446 : vector<1x32xf32>
    %449 = arith.divf %447, %448 : vector<1x32xf32>
    %450 = arith.mulf %441, %383 : vector<1x32xf32>
    %451 = arith.mulf %435, %443 : vector<1x32xf32>
    %452 = arith.addf %450, %451 : vector<1x32xf32>
    %453 = math.tanh %452 : vector<1x32xf32>
    %454 = arith.mulf %449, %453 : vector<1x32xf32>
    %c0_195 = arith.constant 0 : index
    %c0_196 = arith.constant 0 : index
    %455 = vector.load %arg9[%c0_195, %c0_196] : memref<1x32xf32, #tpu.memory_space<vmem>>, vector<1x32xf32>
    tpu.vector_store %arg9[%c0_195, %c0_196], %454 {strides = array<i32>} : memref<1x32xf32, #tpu.memory_space<vmem>>, vector<1x32xf32>,
    %c0_197 = arith.constant 0 : index
    %c0_198 = arith.constant 0 : index
    %456 = vector.load %arg10[%c0_197, %c0_198] : memref<1x32xf32, #tpu.memory_space<vmem>>, vector<1x32xf32>
    tpu.vector_store %arg10[%c0_197, %c0_198], %452 {strides = array<i32>} : memref<1x32xf32, #tpu.memory_space<vmem>>, vector<1x32xf32>,
    %457 = arith.index_cast %381 : i32 to index
    %c0_199 = arith.constant 0 : index
    %458 = vector.load %arg8[%457, %c0_199] : memref<6x640xf32, #tpu.memory_space<vmem>>, vector<1x40xf32>
    tpu.vector_store %arg8[%457, %c0_199], %423 {strides = array<i32>} : memref<6x640xf32, #tpu.memory_space<vmem>>, vector<1x40xf32>,
    %459 = arith.index_cast %381 : i32 to index
    %c128_200 = arith.constant 128 : index
    %460 = vector.load %arg8[%459, %c128_200] : memref<6x640xf32, #tpu.memory_space<vmem>>, vector<1x64xf32>
    tpu.vector_store %arg8[%459, %c128_200], %400 {strides = array<i32>} : memref<6x640xf32, #tpu.memory_space<vmem>>, vector<1x64xf32>,
    %461 = arith.index_cast %381 : i32 to index
    %c256_201 = arith.constant 256 : index
    %462 = vector.load %arg8[%461, %c256_201] : memref<6x640xf32, #tpu.memory_space<vmem>>, vector<1x32xf32>
    tpu.vector_store %arg8[%461, %c256_201], %454 {strides = array<i32>} : memref<6x640xf32, #tpu.memory_space<vmem>>, vector<1x32xf32>,
    %463 = arith.index_cast %381 : i32 to index
    %c384_202 = arith.constant 384 : index
    %464 = vector.load %arg8[%463, %c384_202] : memref<6x640xf32, #tpu.memory_space<vmem>>, vector<1x32xf32>
    tpu.vector_store %arg8[%463, %c384_202], %452 {strides = array<i32>} : memref<6x640xf32, #tpu.memory_space<vmem>>, vector<1x32xf32>,
    %465 = arith.index_cast %381 : i32 to index
    %c512_203 = arith.constant 512 : index
    %466 = vector.load %arg8[%465, %c512_203] : memref<6x640xf32, #tpu.memory_space<vmem>>, vector<1x8xf32>
    tpu.vector_store %arg8[%465, %c512_203], %399 {strides = array<i32>} : memref<6x640xf32, #tpu.memory_space<vmem>>, vector<1x8xf32>,
    %c5_i32 = arith.constant 5 : i32
    %c1_i32_204 = arith.constant 1 : i32
    %467 = arith.muli %c5_i32, %c1_i32_204 : i32
    %c0_i32_205 = arith.constant 0 : i32
    %468 = arith.addi %c0_i32_205, %467 : i32
    %c0_206 = arith.constant 0 : index
    %c0_207 = arith.constant 0 : index
    %469 = vector.load %arg9[%c0_206, %c0_207] : memref<1x32xf32, #tpu.memory_space<vmem>>, vector<1x32xf32>
    %c0_208 = arith.constant 0 : index
    %c0_209 = arith.constant 0 : index
    %470 = vector.load %arg10[%c0_208, %c0_209] : memref<1x32xf32, #tpu.memory_space<vmem>>, vector<1x32xf32>
    %c0_210 = arith.constant 0 : index
    %c0_211 = arith.constant 0 : index
    %471 = vector.load %arg3[%c0_210, %c0_211] : memref<32x288xf32, #tpu.memory_space<vmem>>, vector<32x224xf32>
    %cst_212 = arith.constant dense<0.000000e+00> : vector<1x224xf32>
    %472 = tpu.matmul %469, %471, %cst_212 {dimension_numbers = #tpu.dot_dimension_numbers<[1], [0], [0], [1], [0, 0, 1, 1], [], []>} : vector<1x32xf32>, vector<32x224xf32>, vector<1x224xf32> -> vector<1x224xf32>
    %473 = vector.extract_strided_slice %472 {offsets = [0, 0], sizes = [1, 32], strides = [1, 1]} : vector<1x224xf32> to vector<1x32xf32>
    %474 = vector.broadcast %473 : vector<1x32xf32> to vector<8x32xf32>
    %475 = arith.addf %474, %15 : vector<8x32xf32>
    %476 = math.tanh %475 : vector<8x32xf32>
    %cst_213 = arith.constant dense<0.000000e+00> : vector<1x8xf32>
    %477 = tpu.matmul %16, %476, %cst_213 {dimension_numbers = #tpu.dot_dimension_numbers<[1], [1], [0], [0], [0, 0, 1, 0], [], []>} : vector<1x32xf32>, vector<8x32xf32>, vector<1x8xf32> -> vector<1x8xf32>
    %cst_214 = arith.constant dense<0xFF800000> : vector<1xf32>
    %478 = vector.multi_reduction <maximumf>, %477, %cst_214 [1] : vector<1x8xf32> to vector<1xf32>
    %479 = vector.shape_cast %478 : vector<1xf32> to vector<1x1xf32>
    %480 = vector.broadcast %479 : vector<1x1xf32> to vector<1x8xf32>
    %481 = arith.subf %477, %480 : vector<1x8xf32>
    %482 = math.exp %481 : vector<1x8xf32>
    %cst_215 = arith.constant dense<0.000000e+00> : vector<1xf32>
    %483 = vector.multi_reduction <add>, %482, %cst_215 [1] : vector<1x8xf32> to vector<1xf32>
    %484 = vector.shape_cast %483 : vector<1xf32> to vector<1x1xf32>
    %485 = vector.broadcast %484 : vector<1x1xf32> to vector<1x8xf32>
    %486 = arith.divf %482, %485 : vector<1x8xf32>
    %cst_216 = arith.constant dense<0.000000e+00> : vector<1x64xf32>
    %487 = tpu.matmul %486, %13, %cst_216 {dimension_numbers = #tpu.dot_dimension_numbers<[1], [0], [0], [1], [0, 0, 1, 1], [], []>} : vector<1x8xf32>, vector<8x64xf32>, vector<1x64xf32> -> vector<1x64xf32>
    %c0_217 = arith.constant 0 : index
    %c0_218 = arith.constant 0 : index
    %488 = vector.load %arg4[%c0_217, %c0_218] : memref<64x224xf32, #tpu.memory_space<vmem>>, vector<64x192xf32>
    %cst_219 = arith.constant dense<0.000000e+00> : vector<1x192xf32>
    %489 = tpu.matmul %487, %488, %cst_219 {dimension_numbers = #tpu.dot_dimension_numbers<[1], [0], [0], [1], [0, 0, 1, 1], [], []>} : vector<1x64xf32>, vector<64x192xf32>, vector<1x192xf32> -> vector<1x192xf32>
    %490 = arith.index_cast %468 : i32 to index
    %c0_220 = arith.constant 0 : index
    %491 = vector.load %arg11[%490, %c0_220] : memref<6x64xf32, #tpu.memory_space<vmem>>, vector<1x64xf32>
    %492 = vector.extract_strided_slice %472 {offsets = [0, 32], sizes = [1, 64], strides = [1, 1]} : vector<1x224xf32> to vector<1x64xf32>
    %493 = arith.addf %491, %492 : vector<1x64xf32>
    %494 = vector.extract_strided_slice %489 {offsets = [0, 0], sizes = [1, 64], strides = [1, 1]} : vector<1x192xf32> to vector<1x64xf32>
    %495 = arith.addf %493, %494 : vector<1x64xf32>
    %496 = math.tanh %495 : vector<1x64xf32>
    %c0_221 = arith.constant 0 : index
    %c0_222 = arith.constant 0 : index
    %497 = vector.load %arg6[%c0_221, %c0_222] : memref<64x40xf32, #tpu.memory_space<vmem>>, vector<64x40xf32>
    %cst_223 = arith.constant dense<0.000000e+00> : vector<1x40xf32>
    %498 = tpu.matmul %496, %497, %cst_223 {dimension_numbers = #tpu.dot_dimension_numbers<[1], [0], [0], [1], [0, 0, 1, 1], [], []>} : vector<1x64xf32>, vector<64x40xf32>, vector<1x40xf32> -> vector<1x40xf32>
    %499 = arith.addf %498, %17 : vector<1x40xf32>
    %cst_224 = arith.constant dense<0xFF800000> : vector<1xf32>
    %500 = vector.multi_reduction <maximumf>, %499, %cst_224 [1] : vector<1x40xf32> to vector<1xf32>
    %501 = vector.shape_cast %500 : vector<1xf32> to vector<1x1xf32>
    %502 = vector.broadcast %501 : vector<1x1xf32> to vector<1x40xf32>
    %503 = arith.subf %499, %502 : vector<1x40xf32>
    %504 = math.exp %503 : vector<1x40xf32>
    %cst_225 = arith.constant dense<0.000000e+00> : vector<1xf32>
    %505 = vector.multi_reduction <add>, %504, %cst_225 [1] : vector<1x40xf32> to vector<1xf32>
    %506 = vector.shape_cast %505 : vector<1xf32> to vector<1x1xf32>
    %507 = math.log %506 : vector<1x1xf32>
    %508 = arith.addf %507, %501 : vector<1x1xf32>
    %509 = vector.broadcast %508 : vector<1x1xf32> to vector<1x40xf32>
    %510 = arith.subf %499, %509 : vector<1x40xf32>
    %511 = arith.index_cast %468 : i32 to index
    %c0_226 = arith.constant 0 : index
    %512 = vector.load %arg12[%511, %c0_226] : memref<6x128xf32, #tpu.memory_space<vmem>>, vector<1x128xf32>
    %513 = vector.extract_strided_slice %472 {offsets = [0, 96], sizes = [1, 128], strides = [1, 1]} : vector<1x224xf32> to vector<1x128xf32>
    %514 = arith.addf %512, %513 : vector<1x128xf32>
    %515 = vector.extract_strided_slice %489 {offsets = [0, 64], sizes = [1, 128], strides = [1, 1]} : vector<1x192xf32> to vector<1x128xf32>
    %516 = arith.addf %514, %515 : vector<1x128xf32>
    %517 = vector.extract_strided_slice %516 {offsets = [0, 0], sizes = [1, 32], strides = [1, 1]} : vector<1x128xf32> to vector<1x32xf32>
    %518 = arith.negf %517 : vector<1x32xf32>
    %519 = math.exp %518 : vector<1x32xf32>
    %cst_227 = arith.constant 1.000000e+00 : f32
    %520 = vector.broadcast %cst_227 : f32 to vector<1x32xf32>
    %521 = arith.addf %520, %519 : vector<1x32xf32>
    %522 = arith.divf %520, %521 : vector<1x32xf32>
    %523 = vector.extract_strided_slice %516 {offsets = [0, 32], sizes = [1, 32], strides = [1, 1]} : vector<1x128xf32> to vector<1x32xf32>
    %524 = arith.negf %523 : vector<1x32xf32>
    %525 = math.exp %524 : vector<1x32xf32>
    %cst_228 = arith.constant 1.000000e+00 : f32
    %526 = vector.broadcast %cst_228 : f32 to vector<1x32xf32>
    %527 = arith.addf %526, %525 : vector<1x32xf32>
    %528 = arith.divf %526, %527 : vector<1x32xf32>
    %529 = vector.extract_strided_slice %516 {offsets = [0, 64], sizes = [1, 32], strides = [1, 1]} : vector<1x128xf32> to vector<1x32xf32>
    %530 = math.tanh %529 : vector<1x32xf32>
    %531 = vector.extract_strided_slice %516 {offsets = [0, 96], sizes = [1, 32], strides = [1, 1]} : vector<1x128xf32> to vector<1x32xf32>
    %532 = arith.negf %531 : vector<1x32xf32>
    %533 = math.exp %532 : vector<1x32xf32>
    %cst_229 = arith.constant 1.000000e+00 : f32
    %534 = vector.broadcast %cst_229 : f32 to vector<1x32xf32>
    %535 = arith.addf %534, %533 : vector<1x32xf32>
    %536 = arith.divf %534, %535 : vector<1x32xf32>
    %537 = arith.mulf %528, %470 : vector<1x32xf32>
    %538 = arith.mulf %522, %530 : vector<1x32xf32>
    %539 = arith.addf %537, %538 : vector<1x32xf32>
    %540 = math.tanh %539 : vector<1x32xf32>
    %541 = arith.mulf %536, %540 : vector<1x32xf32>
    %c0_230 = arith.constant 0 : index
    %c0_231 = arith.constant 0 : index
    %542 = vector.load %arg9[%c0_230, %c0_231] : memref<1x32xf32, #tpu.memory_space<vmem>>, vector<1x32xf32>
    tpu.vector_store %arg9[%c0_230, %c0_231], %541 {strides = array<i32>} : memref<1x32xf32, #tpu.memory_space<vmem>>, vector<1x32xf32>,
    %c0_232 = arith.constant 0 : index
    %c0_233 = arith.constant 0 : index
    %543 = vector.load %arg10[%c0_232, %c0_233] : memref<1x32xf32, #tpu.memory_space<vmem>>, vector<1x32xf32>
    tpu.vector_store %arg10[%c0_232, %c0_233], %539 {strides = array<i32>} : memref<1x32xf32, #tpu.memory_space<vmem>>, vector<1x32xf32>,
    %544 = arith.index_cast %468 : i32 to index
    %c0_234 = arith.constant 0 : index
    %545 = vector.load %arg8[%544, %c0_234] : memref<6x640xf32, #tpu.memory_space<vmem>>, vector<1x40xf32>
    tpu.vector_store %arg8[%544, %c0_234], %510 {strides = array<i32>} : memref<6x640xf32, #tpu.memory_space<vmem>>, vector<1x40xf32>,
    %546 = arith.index_cast %468 : i32 to index
    %c128_235 = arith.constant 128 : index
    %547 = vector.load %arg8[%546, %c128_235] : memref<6x640xf32, #tpu.memory_space<vmem>>, vector<1x64xf32>
    tpu.vector_store %arg8[%546, %c128_235], %487 {strides = array<i32>} : memref<6x640xf32, #tpu.memory_space<vmem>>, vector<1x64xf32>,
    %548 = arith.index_cast %468 : i32 to index
    %c256_236 = arith.constant 256 : index
    %549 = vector.load %arg8[%548, %c256_236] : memref<6x640xf32, #tpu.memory_space<vmem>>, vector<1x32xf32>
    tpu.vector_store %arg8[%548, %c256_236], %541 {strides = array<i32>} : memref<6x640xf32, #tpu.memory_space<vmem>>, vector<1x32xf32>,
    %550 = arith.index_cast %468 : i32 to index
    %c384_237 = arith.constant 384 : index
    %551 = vector.load %arg8[%550, %c384_237] : memref<6x640xf32, #tpu.memory_space<vmem>>, vector<1x32xf32>
    tpu.vector_store %arg8[%550, %c384_237], %539 {strides = array<i32>} : memref<6x640xf32, #tpu.memory_space<vmem>>, vector<1x32xf32>,
    %552 = arith.index_cast %468 : i32 to index
    %c512_238 = arith.constant 512 : index
    %553 = vector.load %arg8[%552, %c512_238] : memref<6x640xf32, #tpu.memory_space<vmem>>, vector<1x8xf32>
    tpu.vector_store %arg8[%552, %c512_238], %486 {strides = array<i32>} : memref<6x640xf32, #tpu.memory_space<vmem>>, vector<1x8xf32>,
    %c6_i32 = arith.constant 6 : i32
    return
  }
}

</mosaic_0001>

<bundles_post_ra>
// kernel: tpu_custom_call.1
= control target key start
LH: loop header
LB: loop body
LE: loop exit
PB: predicated region body
PF: predicated region fallthrough
CT: control target
= control target key end

     0   :  { %13 = vsyncpa [#allocation7], 0  ;;  %s5222_s0 = inlined_call_operand.hbm [shape: f32[12,16], index: 0, kind: input, shape index: {}]   ;;  %s5223_s1 = inlined_call_operand.hbm [shape: f32[2,32], index: 1, kind: input, shape index: {}]   ;;  %s5224_s2 = inlined_call_operand.vmem [shape: f32[8,64], index: 2, kind: input, shape index: {}]   ;;  %s5225_s3 = inlined_call_operand.vmem [shape: f32[32,288], index: 3, kind: input, shape index: {}]   ;;  %s5226_s4 = inlined_call_operand.hbm [shape: f32[64,224], index: 4, kind: input, shape index: {}]   ;;  %s5227_s5 = inlined_call_operand.hbm [shape: f32[16,192], index: 5, kind: input, shape index: {}]   ;;  %s5228_s6 = inlined_call_operand.vmem [shape: f32[64,40], index: 6, kind: input, shape index: {}]   ;;  %s5229_s7 = inlined_call_operand.vmem [shape: f32[1,768], index: 7, kind: input, shape index: {}]   ;;  %s5230_s8 = inlined_call_operand.hbm [shape: f32[6,640], index: 8, kind: output, shape index: {}]  }
   0x1   :  { %14 = vsyncpa [#allocation10], 0 }
   0x2   :  { %15 = vsyncpa [#allocation13], 0 }
   0x3   :  { %16 = vsyncpa [#allocation8], 0  ;;  %s4192_s27 = smov [#allocation9]   ;;  %s4193_s29 = smov [#allocation6]  }
   0x4   :  { %s35_s28 = sshll.u32 %s4192_s27, 4  ;;  %s22_s30 = sshll.u32 %s4193_s29, 4  ;;  %s36_s28 = int_to_ptr.vmem [resolvable:$true] %s35_s28  ;;  %s23_s30 = int_to_ptr.vmem [resolvable:$true] %s22_s30 }
   0x5   :  { %s4092_s9 = scalar_lea.vmem %s36_s28, 32  ;;  %p4097_p1 = scmp.lt.s32.totalorder %s36_s28, %s36_s28 }
   0x6   :  { %p4093_p0 = scmp.ne.s32.totalorder %s36_s28, %s4092_s9  ;;  %p4098_p2 = scmp.lt.s32.totalorder %s4092_s9, %s4092_s9 }
   0x8   :  { %p4099_p3 = por %p4098_p2, %p4097_p1 }
   0xa   :  { %p4100_p4 = pnand %p4099_p3, %p4093_p0 }
   0xc   :  { %4103 = shalt.err (!%p4100_p4)
}
   0xd   :  { %38 = dma.hbm_to_vmem [thread:$0]  %s5223_s1, 32, %s36_s28, [#allocation10]  }
   0xe   :  { %s4112_s12 = scalar_lea.vmem %s23_s30, 256  ;;  %p4117_p6 = scmp.lt.s32.totalorder %s23_s30, %s23_s30 }
   0xf   :  { %p4113_p5 = scmp.ne.s32.totalorder %s23_s30, %s4112_s12  ;;  %p4118_p7 = scmp.lt.s32.totalorder %s4112_s12, %s4112_s12 }
  0x11   :  { %p4119_p8 = por %p4118_p7, %p4117_p6 }
  0x13   :  { %p4120_p9 = pnand %p4119_p8, %p4113_p5 }
  0x15   :  { %4123 = shalt.err (!%p4120_p9)
}
  0x16   :  { %s4194_s13 = smov 128   ;;  %s4195_s14 = smov 8  }
  0x17   :  { %28 = dma.hbm_to_vmem [thread:$0]  %s5222_s0, 256, %s23_s30, [#allocation7], %s4194_s13, %s4194_s13, %s4195_s14  }
  0x18   :  { %s4196_s17 = smov [#allocation11]  }
  0x19   :  { %s48_s18 = sshll.u32 %s4196_s17, 4  ;;  %s49_s18 = int_to_ptr.vmem [resolvable:$true] %s48_s18 }
  0x1a   :  { %s4132_s19 = scalar_lea.vmem %s49_s18, 2048  ;;  %p4137_p11 = scmp.lt.s32.totalorder %s49_s18, %s49_s18 }
  0x1b   :  { %p4133_p10 = scmp.ne.s32.totalorder %s49_s18, %s4132_s19  ;;  %p4138_p12 = scmp.lt.s32.totalorder %s4132_s19, %s4132_s19 }
  0x1d   :  { %p4139_p13 = por %p4138_p12, %p4137_p11 }
  0x1f   :  { %p4140_p0 = pnand %p4139_p13, %p4133_p10 }
  0x21   :  { %4143 = shalt.err (!%p4140_p0)
}
  0x22   :  { %s4197_s1 = smov 256   ;;  %s4198_s20 = smov 16  }
  0x23   :  { %54 = dma.hbm_to_vmem [thread:$0]  %s5226_s4, 2048, %s49_s18, [#allocation10], %s4197_s1, %s4197_s1, %s4198_s20  }
  0x24   :  { %s4199_s23 = smov [#allocation12]  }
  0x25   :  { %s60_s24 = sshll.u32 %s4199_s23, 4  ;;  %s61_s24 = int_to_ptr.vmem [resolvable:$true] %s60_s24 }
  0x26   :  { %s4152_s0 = scalar_lea.vmem %s61_s24, 512  ;;  %p4157_p2 = scmp.lt.s32.totalorder %s61_s24, %s61_s24 }
  0x27   :  { %p4153_p1 = scmp.ne.s32.totalorder %s61_s24, %s4152_s0  ;;  %p4158_p3 = scmp.lt.s32.totalorder %s4152_s0, %s4152_s0 }
  0x29   :  { %p4159_p4 = por %p4158_p3, %p4157_p2 }
  0x2b   :  { %p4160_p5 = pnand %p4159_p4, %p4153_p1 }
  0x2d   :  { %4163 = shalt.err (!%p4160_p5)
}
  0x2e   :  { %66 = dma.hbm_to_vmem [thread:$0]  %s5227_s5, 512, %s61_s24, [#allocation13], %s4197_s1, %s4197_s1, %s4198_s20  }
  0x2f   :  { %4184 = dma.done.wait [#allocation7], 256  }
  0x30   :  { %4185 = vsyncadd [#allocation7], 4294967040 }
  0x31   :  { %4186 = dma.done.wait [#allocation10], 2080  }
  0x32   :  { %4187 = vsyncadd [#allocation10], 4294965216 }
  0x33   :  { %4188 = dma.done.wait [#allocation13], 512  }
  0x34   :  { %4189 = vsyncadd [#allocation13], 4294966784  ;;  %v4200_v0 = vmov 0.0   ;;  %v4268_v1 = vld [vmem:[%s5225_s3 + $0x50] sm:$0xff]  ;;  %v4273_v2 = vld [vmem:[%s5225_s3 + $0x38] sm:$0xff]  ;;  %s4201_s5 = smov 32  }
  0x35   :  { %3726 = vmatprep.subr.mxu0 %v4200_v0  ;;  %3737 = vmatprep.subr.mxu1 %v4200_v0  ;;  %v91_v3 = vld [vmem:[%s5225_s3 + $0x58] sm:$0xff]  ;;  %v89_v4 = vld [vmem:[%s5225_s3 + $0x40] sm:$0xff]  ;;  %vm4202_vm0 = vmmov 0   ;;  %v87_v5 = vld [vmem:[%s5225_s3 + $0x28] sm:$0xff]  ;;  %s4203_s1 = smov 64   ;;  %vm116_vm1 = vcmask 261120  }
  0x36   :  { %112 = vrot.lane.b32.xlu0 %v4268_v1, %s4201_s5  ;;  %108 = vrot.lane.b32.xlu1 %v4273_v2, %s4201_s5  ;;  %v4297_v6 = vld [vmem:[%s5225_s3 + $0x20] sm:$0xff]  ;;  %v85_v7 = vld [vmem:[%s5225_s3 + $0x10] sm:$0xff]  ;;  %vm261_vm2 = vcmask 523264   ;;  %vm347_vm3 = vcmask 130048   ;;  %v423_v45 = vld [vmem:[#allocation6 + $0x6] sm:$0x3f] }
  0x37   :  { %3734 = vmatprep.mubr.msk.f32.mxu0 %vm4202_vm0, %v4200_v0  ;;  %3753 = vmatprep.mubr.msk.f32.mxu1 %vm4202_vm0, %v4200_v0  ;;  %v4308_v8 = vld [vmem:[%s5225_s3 + $0x8] sm:$0xff]  ;;  %v4313_v9 = vld [vmem:[#allocation11 + $0x78] sm:$0xff]  ;;  %v426_v10 = vld [vmem:[#allocation12 + $0x10] sm:$0xff]  ;;  %vm201_vm4 = vcmask 253952   ;;  %vm421_vm5 = vcmask 521216   ;;  %vm691_vm6 = vcmask 57344  }
  0x38   :  { %v427_v11 = vld [vmem:[#allocation12 + $0x18] sm:$0xff]  ;;  %v4318_v12 = vld [vmem:[#allocation11 + $0x68] sm:$0xff]  ;;  %v424_v13 = vld [vmem:[#allocation12] sm:$0xff]  ;;  %vm703_vm7 = vcmask 64512   ;;  %vm1031_vm8 = vcmask 516096   ;;  %s4204_s16 = smov 96  }
  0x39   :  { %v425_v14 = vld [vmem:[#allocation12 + $0x8] sm:$0xff]  ;;  %v4325_v15 = vld [vmem:[#allocation11 + $0x58] sm:$0xff]  ;;  %v3576_v61 = vld [vmem:[%s5229_s7 + $0x4] ss:$0 sm:$0xff]  ;;  %vm218_vm9 = vcmask 254977   ;;  %vm956_vm10 = vcmask 319488  }
  0x3a   :  { %114 = vrot.lane.b32.xlu0 %v91_v3, %s4201_s5  ;;  %110 = vrot.lane.b32.xlu1 %v89_v4, %s4201_s5  ;;  %v4327_v16 = vld [vmem:[#allocation11 + $0x48] sm:$0xff]  ;;  %v4333_v17 = vld [vmem:[#allocation11 + $0x38] sm:$0xff]  ;;  %v3578_v4 = vld [vmem:[%s5229_s7 + $0x5] ss:$0 sm:$0xff] }
  0x3b   :  { %v4335_v18 = vld [vmem:[#allocation11 + $0x28] sm:$0xff]  ;;  %v4341_v19 = vld [vmem:[#allocation11 + $0x18] sm:$0xff] }
  0x3c   :  { %v4343_v20 = vld [vmem:[#allocation11 + $0x8] sm:$0xff]  ;;  %v83_v32 = vld [vmem:[#allocation9] sm:$0x3]  ;;  %v4391_v50 = vld [vmem:[%s5225_s3 + $0x18] sm:$0xff] }
  0x3d   :  { %v337_v38 = vld [vmem:[#allocation6] sm:$0x3f]  ;;  %v4377_v47 = vld [vmem:[%s5225_s3 + $0x48] sm:$0xff]  ;;  %v4399_v52 = vld [vmem:[%s5225_s3] sm:$0xff] }
  0x3e   :  { %106 = vrot.lane.b32.xlu1 %v87_v5, %s4201_s5  ;;  %104 = vrot.lane.b32.xlu0 %v4297_v6, %s4201_s5  ;;  %v4382_v48 = vld [vmem:[%s5225_s3 + $0x30] sm:$0xff]  ;;  %v4405_v53 = vld [vmem:[%s5224_s2] sm:$0xff] }
  0x3f   :  { %v198_v55 = vld [vmem:[%s5229_s7 + $0x2] sm:$0x1] }
  0x42   :  { %102 = vrot.lane.b32.xlu1 %v85_v7, %s4201_s5  ;;  %100 = vrot.lane.b32.xlu0 %v4308_v8, %s4201_s5 }
  0x46   :  { %251 = vrot.lane.b32.xlu0 %v4313_v9, %s4203_s1  ;;  %443 = vrot.lane.b32.xlu1 %v426_v10, %s4203_s1 }
  0x4a   :  { %445 = vrot.lane.b32.xlu0 %v427_v11, %s4203_s1  ;;  %249 = vrot.lane.b32.xlu1 %v4318_v12, %s4203_s1 }
  0x4e   :  { %439 = vrot.lane.b32.xlu0 %v424_v13, %s4203_s1  ;;  %441 = vrot.lane.b32.xlu1 %v425_v14, %s4203_s1  ;;  %v609_v14 = vlaneseq }
  0x52   :  { %247 = vrot.lane.b32.xlu0 %v4325_v15, %s4203_s1  ;;  %245 = vrot.lane.b32.xlu1 %v4327_v16, %s4203_s1 }
  0x56   :  { %243 = vrot.lane.b32.xlu0 %v4333_v17, %s4203_s1  ;;  %241 = vrot.lane.b32.xlu1 %v4335_v18, %s4203_s1 }
  0x5a   :  { %239 = vrot.lane.b32.xlu0 %v4341_v19, %s4203_s1  ;;  %237 = vrot.lane.b32.xlu1 %v4343_v20, %s4203_s1 }
  0xa8   :  { %v113_v21 = vpop.permute.xlu0 %112  ;;  %v109_v22 = vpop.permute.xlu1 %108 }
  0xac   :  { %v115_v23 = vpop.permute.xlu0 %114  ;;  %v111_v24 = vpop.permute.xlu1 %110 }
  0xad   :  { %v120_v25 = vsel %vm116_vm1, %v113_v21, %v115_v23  ;;  %v119_v26 = vsel %vm116_vm1, %v109_v22, %v111_v24  ;;  %v610_v21 = vshrl.u32 %v609_v14, 7 }
  0xae   :  { %3727 = vmatpush3.msra.mxu0 %v120_v25 }
  0xaf   :  { %3728 = vmatprep.subr.mxu0 %v4200_v0  ;;  %v4433_v22 = vsub.s32 0, %v610_v21 }
  0xb0   :  { %3729 = vmatpush3.msra.mxu0 %v119_v26  ;;  %v107_v27 = vpop.permute.xlu1 %106  ;;  %v105_v28 = vpop.permute.xlu0 %104 }
  0xb1   :  { %3730 = vmatprep.subr.mxu0 %v4200_v0  ;;  %v118_v29 = vsel %vm116_vm1, %v105_v28, %v107_v27  ;;  %v4444_v27 = vld [vmem:[%s5229_s7] sm:$0x1] }
  0xb2   :  { %3731 = vmatpush3.msra.mxu0 %v118_v29 }
  0xb3   :  { %3732 = vmatprep.subr.mxu0 %v4200_v0 }
  0xb4   :  { %v103_v30 = vpop.permute.xlu1 %102  ;;  %v101_v31 = vpop.permute.xlu0 %100 }
  0xb5   :  { %v117_v33 = vsel %vm116_vm1, %v101_v31, %v103_v30  ;;  %v3574_v31 = vld [vmem:[%s5229_s7 + $0x3] ss:$0 sm:$0xff] }
  0xb6   :  { %3733 = vmatpush3.msra.mxu0 %v117_v33 }
  0xb7   :  { %3735 = vmatmul.mubr.msk.f32.vlgmr.msra.gmra.mxu0 %vm116_vm1, %v83_v32  ;;  %3756 = vmatprep.subr.mxu0 %v4200_v0 }
  0xb8   :  { %3757 = vmatpush3.msra.mxu0 %v426_v10  ;;  %3760 = vmatprep.mubr.msk.f32.mxu0 %vm4202_vm0, %v4200_v0  ;;  %v252_v34 = vpop.permute.xlu0 %251  ;;  %v444_v35 = vpop.permute.xlu1 %443 }
  0xb9   :  { %3758 = vmatprep.subr.mxu0 %v4200_v0  ;;  %3738 = vmatpush3.msra.mxu1 %v252_v34 }
  0xba   :  { %3759 = vmatpush3.msra.mxu0 %v424_v13  ;;  %3739 = vmatprep.subr.mxu1 %v4200_v0 }
  0xbb   :  { %3763 = vmatprep.subr.mxu0 %v4200_v0  ;;  %3761 = vmatmul.mubr.msk.f32.vlgmr.msra.gmra.mxu0 %vm347_vm3, %v337_v38  ;;  %v4462_v38 = vld [vmem:[#allocation11 + $0x70] sm:$0xff] }
  0xbc   :  { %v446_v36 = vpop.permute.xlu0 %445  ;;  %v250_v39 = vpop.permute.xlu1 %249  ;;  %3767 = vmatprep.mubr.msk.f32.mxu0 %vm4202_vm0, %v4200_v0 }
  0xbd   :  { %v448_v37 = vsel %vm261_vm2, %v444_v35, %v446_v36  ;;  %3740 = vmatpush3.msra.mxu1 %v250_v39  ;;  %v4464_v39 = vld [vmem:[#allocation11 + $0x60] sm:$0xff] }
  0xbe   :  { %3764 = vmatpush3.msra.mxu0 %v448_v37  ;;  %3741 = vmatprep.subr.mxu1 %v4200_v0 }
  0xbf   :  { %3765 = vmatprep.subr.mxu0 %v4200_v0 }
  0xc0   :  { %v440_v40 = vpop.permute.xlu0 %439  ;;  %v442_v41 = vpop.permute.xlu1 %441 }
  0xc1   :  { %v447_v42 = vsel %vm261_vm2, %v440_v40, %v442_v41  ;;  %v4468_v40 = vld [vmem:[#allocation11 + $0x50] sm:$0xff]  ;;  %v4472_v41 = vld [vmem:[#allocation11 + $0x40] sm:$0xff] }
  0xc2   :  { %3766 = vmatpush3.msra.mxu0 %v447_v42  ;;  %v4476_v42 = vld [vmem:[#allocation11 + $0x30] sm:$0xff] }
  0xc3   :  { %562 = vmatprep.subr.mxu0 %v4268_v1  ;;  %3768 = vmatmul.mubr.msk.f32.vlgmr.msra.gmra.mxu0 %vm347_vm3, %v423_v45 }
  0xc4   :  { %v248_v43 = vpop.permute.xlu0 %247  ;;  %v246_v44 = vpop.permute.xlu1 %245  ;;  %602 = vmatprep.mubr.f32.mxu0 %v4200_v0  ;;  %563 = vmatpush1.msra.mxu0 %v4377_v47 }
  0xc5   :  { %3742 = vmatpush3.msra.mxu1 %v248_v43  ;;  %564 = vmatprep.subr.mxu0 %v4273_v2  ;;  %v4480_v43 = vld [vmem:[#allocation11 + $0x20] sm:$0xff] }
  0xc6   :  { %3743 = vmatprep.subr.mxu1 %v4200_v0  ;;  %565 = vmatpush1.msra.mxu0 %v4382_v48 }
  0xc7   :  { %3744 = vmatpush3.msra.mxu1 %v246_v44  ;;  %566 = vmatprep.subr.mxu0 %v4297_v6  ;;  %v4484_v44 = vld [vmem:[#allocation11 + $0x10] sm:$0xff] }
  0xc8   :  { %3745 = vmatprep.subr.mxu1 %v4200_v0  ;;  %v244_v46 = vpop.permute.xlu0 %243  ;;  %v242_v49 = vpop.permute.xlu1 %241  ;;  %567 = vmatpush1.msra.mxu0 %v4391_v50 }
  0xc9   :  { %3746 = vmatpush3.msra.mxu1 %v244_v46  ;;  %568 = vmatprep.subr.mxu0 %v4308_v8 }
  0xca   :  { %3747 = vmatprep.subr.mxu1 %v4200_v0  ;;  %569 = vmatpush1.msra.mxu0 %v4399_v52 }
  0xcb   :  { %3748 = vmatpush3.msra.mxu1 %v242_v49  ;;  %812 = vmatprep.subr.mxu0 %v4313_v9 }
  0xcc   :  { %3749 = vmatprep.subr.mxu1 %v4200_v0  ;;  %v240_v51 = vpop.permute.xlu0 %239  ;;  %v238_v54 = vpop.permute.xlu1 %237 }
  0xcd   :  { %3750 = vmatpush3.msra.mxu1 %v240_v51  ;;  %v4494_v51 = vld [vmem:[#allocation11] sm:$0xff] }
  0xce   :  { %3751 = vmatprep.subr.mxu1 %v4200_v0 }
  0xcf   :  { %3752 = vmatpush3.msra.mxu1 %v238_v54 }
  0xd0   :  { %3754 = vmatmul.mubr.msk.f32.vlgmr.msra.gmra.mxu1 %vm261_vm2, %v4405_v53  ;;  %3770 = vmatprep.subr.mxu1 %v4200_v0 }
  0xd1   :  { %3772 = vmatprep.mubr.msk.f32.mxu1 %vm4202_vm0, %v4200_v0 }
 0x177   :  { %v4419_v56 = vpop.f32.mrf.mxu0 }
 0x178   :  { %v199_v57 = vadd.f32 %v198_v55, %v4419_v56 }
 0x179   :  { %v3736_v58 = vpop.f32.mrf.mxu0 }
 0x17a   :  { %3958 = vtanh.f32 %v199_v57 }
 0x17b   :  { %v417_v62 = vpop.f32.mrf.mxu0 }
 0x17c   :  { %v418_v63 = vadd.f32 %v3576_v61, %v417_v62 }
 0x17d   :  { %v3762_v3 = vpop.f32.mrf.mxu0 }
 0x17e   :  { %422 = vst.msk [vmem:[#allocation4] sm:$0x3f] %vm421_vm5, %v418_v63 }
 0x183   :  { %v520_v5 = vpop.f32.mrf.mxu0 }
 0x184   :  { %v521_v7 = vadd.f32 %v3578_v4, %v520_v5 }
 0x185   :  { %v3769_v10 = vpop.f32.mrf.mxu0 }
 0x186   :  { %524 = vst [vmem:[#allocation5] sm:$0x3f] %v521_v7 }
 0x187   :  { %v3959_v59 = vpop.eup %3958 }
 0x188   :  { %202 = vst.msk [vmem:[#allocation2] sm:$0x1] %vm201_vm4, %v3959_v59 }
 0x18d   :  { %v970_v5 = vld [vmem:[#allocation5] sm:$0x1] }
 0x18f   :  { %v525_v60 = vld [vmem:[#allocation2] sm:$0x1] }
 0x190   :  { %3580 = vmatmul.mubr.msk.f32.vlgmr.msra.gmra.mxu0 %vm116_vm1, %v525_v60  ;;  %v4431_v11 = vpop.f32.mrf.mxu1 }
 0x191   :  { %860 = vmatprep.mubr.f32.mxu0 %v4200_v0  ;;  %813 = vmatpush1.msra.mxu0 %v4462_v38 }
 0x192   :  { %v3755_v13 = vpop.f32.mrf.mxu1  ;;  %814 = vmatprep.subr.mxu0 %v4318_v12 }
 0x193   :  { %815 = vmatpush1.msra.mxu0 %v4464_v39 }
 0x194   :  { %816 = vmatprep.subr.mxu0 %v4325_v15 }
 0x195   :  { %817 = vmatpush1.msra.mxu0 %v4468_v40 }
 0x196   :  { %818 = vmatprep.subr.mxu0 %v4327_v16 }
 0x197   :  { %819 = vmatpush1.msra.mxu0 %v4472_v41 }
 0x198   :  { %820 = vmatprep.subr.mxu0 %v4333_v17 }
 0x199   :  { %821 = vmatpush1.msra.mxu0 %v4476_v42 }
 0x19a   :  { %822 = vmatprep.subr.mxu0 %v4335_v18 }
 0x19b   :  { %823 = vmatpush1.msra.mxu0 %v4480_v43 }
 0x19c   :  { %824 = vmatprep.subr.mxu0 %v4341_v19 }
 0x19d   :  { %825 = vmatpush1.msra.mxu0 %v4484_v44 }
 0x19e   :  { %826 = vmatprep.subr.mxu0 %v4343_v20 }
 0x19f   :  { %827 = vmatpush1.msra.mxu0 %v4494_v51 }
 0x1a0   :  { %1073 = vmatprep.subr.mxu0 %v4268_v1 }
 0x250   :  { %v4435_v23 = vpop.f32.mrf.mxu0 }
 0x251   :  { %v612_v24 = vrot.slane %v4435_v23, %v4433_v22 }
 0x252   :  { %v606_v32 = vpop.f32.mrf.mxu0 }
 0x253   :  { %v613_v25 = vadd.f32 %v612_v24, %v4431_v11 }
 0x255   :  { %3960 = vtanh.f32 %v613_v25 }
 0x262   :  { %v3961_v26 = vpop.eup %3960 }
 0x263   :  { %3771 = vmatpush3.xpose.msk.msra.mxu1 %vm116_vm1, %v3961_v26 }
 0x264   :  { %3775 = vmatprep.subr.mxu1 %v4200_v0 }
 0x266   :  { %3773 = vmatmul.mubr.msk.f32.vlgmr.msra.gmra.mxu1 %vm116_vm1, %v4444_v27 }
 0x267   :  { %3776 = vmatpush3.msra.mxu1 %v4405_v53  ;;  %3777 = vmatprep.mubr.msk.f32.mxu1 %vm4202_vm0, %v4200_v0 }
 0x268   :  { %3780 = vmatprep.subr.mxu1 %v4200_v0 }
 0x326   :  { %v687_v28 = vpop.f32.mrf.mxu1 }
 0x327   :  { %v692_v29 = vsel %vm691_vm6, %v687_v28, -inf }
 0x328   :  { %693 = vmax.xlane.f32.xlu0 %v692_v29  ;;  %v3774_v30 = vpop.f32.mrf.mxu1 }
 0x33e   :  { %209 = vrot.lane.b32.xlu0 %v3574_v31, %s4201_s5 }
 0x342   :  { %974 = vrot.lane.b32.xlu0 %v606_v32, %s4201_s5 }
 0x3b1   :  { %v694_v33 = vpop.xlane.xlu0 %693 }
 0x3b2   :  { %v695_v34 = vsub.f32 %v687_v28, %v694_v33 }
 0x3b4   :  { %v696_v35 = vmul.f32 1.442695, %v695_v34 }
 0x3b5   :  { %v210_v57 = vpop.permute.xlu0 %209 }
 0x3b6   :  { %3962 = vpow2.f32 %v696_v35  ;;  %v212_v58 = vadd.f32 %v210_v57, %v4419_v56  ;;  %v4568_v57 = vld [vmem:[%s5228_s6 + $0x8] sm:$0xff] }
 0x3b9   :  { %v975_v63 = vpop.permute.xlu0 %974 }
 0x3c3   :  { %v3963_v36 = vpop.eup %3962 }
 0x3c4   :  { %v698_v37 = vsel %vm691_vm6, %v3963_v36, 0.0 }
 0x3c5   :  { %699 = vadd.xlane.f32.xlu1 %v698_v37  ;;  %v4534_v37 = vld [vmem:[%s5228_s6 + $0x30] sm:$0xff] }
 0x3d6   :  { %972 = vrot.lane.b32.xlu1 %v4435_v23, %s4201_s5 }
 0x44e   :  { %v700_v45 = vpop.xlane.xlu1 %699 }
 0x44f   :  { %3964 = vrcp.f32 %v700_v45  ;;  %v4539_v45 = vld [vmem:[%s5228_s6 + $0x28] sm:$0xff] }
 0x450   :  { %3966 = vtanh.f32 %v212_v58  ;;  %v4577_v58 = vld [vmem:[%s5228_s6] sm:$0xff] }
 0x452   :  { %v973_v62 = vpop.permute.xlu1 %972 }
 0x453   :  { %v976_v3 = vsel %vm116_vm1, %v973_v62, %v975_v63 }
 0x454   :  { %v978_v56 = vadd.f32 %v976_v3, %v970_v5 }
 0x45c   :  { %v3965_v46 = vpop.eup %3964 }
 0x45d   :  { %v702_v49 = vmul.f32 %v3965_v46, %v3963_v36  ;;  %v3967_v61 = vpop.eup %3966  ;;  %v4527_v36 = vld [vmem:[%s5228_s6 + $0x38] sm:$0xff]  ;;  %v4546_v46 = vld [vmem:[%s5228_s6 + $0x20] sm:$0xff] }
 0x45f   :  { %3778 = vmatmul.mubr.msk.f32.vlgmr.msra.gmra.mxu1 %vm703_vm7, %v702_v49  ;;  %1035 = vst.msk [vmem:[#allocation14 + $0x20] sm:$0x1] %vm691_vm6, %v702_v49 }
 0x460   :  { %3796 = vmatprep.mubr.msk.f32.mxu1 %vm4202_vm0, %v4200_v0  ;;  %3781 = vmatpush3.msra.mxu1 %v4527_v36 }
 0x461   :  { %3782 = vmatprep.subr.mxu1 %v4200_v0 }
 0x462   :  { %3783 = vmatpush3.msra.mxu1 %v4534_v37 }
 0x463   :  { %3784 = vmatprep.subr.mxu1 %v4200_v0 }
 0x464   :  { %3785 = vmatpush3.msra.mxu1 %v4539_v45 }
 0x465   :  { %3786 = vmatprep.subr.mxu1 %v4200_v0 }
 0x466   :  { %3787 = vmatpush3.msra.mxu1 %v4546_v46 }
 0x467   :  { %3788 = vmatprep.subr.mxu1 %v4200_v0 }
 0x51f   :  { %v773_v54 = vpop.f32.mrf.mxu1 }
 0x520   :  { %1032 = vst.msk [vmem:[#allocation14 + $0x8] sm:$0x1] %vm1031_vm8, %v773_v54  ;;  %3584 = vmatmul.mubr.msk.f32.vlgmr.msra.gmra.mxu0 %vm261_vm2, %v773_v54  ;;  %v4553_v54 = vld [vmem:[%s5228_s6 + $0x18] sm:$0xff] }
 0x521   :  { %v3779_v55 = vpop.f32.mrf.mxu1  ;;  %1074 = vmatpush1.msra.mxu0 %v4377_v47  ;;  %1113 = vmatprep.mubr.f32.mxu0 %v4200_v0 }
 0x522   :  { %1075 = vmatprep.subr.mxu0 %v4273_v2  ;;  %v4561_v55 = vld [vmem:[%s5228_s6 + $0x10] sm:$0xff]  ;;  %3789 = vmatpush3.msra.mxu1 %v4553_v54 }
 0x523   :  { %1076 = vmatpush1.msra.mxu0 %v4382_v48  ;;  %3790 = vmatprep.subr.mxu1 %v4200_v0 }
 0x524   :  { %1077 = vmatprep.subr.mxu0 %v4297_v6  ;;  %3791 = vmatpush3.msra.mxu1 %v4561_v55 }
 0x525   :  { %1078 = vmatpush1.msra.mxu0 %v4391_v50  ;;  %3792 = vmatprep.subr.mxu1 %v4200_v0 }
 0x526   :  { %1079 = vmatprep.subr.mxu0 %v4308_v8  ;;  %3793 = vmatpush3.msra.mxu1 %v4568_v57 }
 0x527   :  { %1080 = vmatpush1.msra.mxu0 %v4399_v52  ;;  %3794 = vmatprep.subr.mxu1 %v4200_v0 }
 0x528   :  { %1318 = vmatprep.subr.mxu0 %v4313_v9  ;;  %3795 = vmatpush3.msra.mxu1 %v4577_v58 }
 0x529   :  { %3799 = vmatprep.subr.mxu1 %v4200_v0 }
 0x5e0   :  { %v4510_v59 = vpop.f32.mrf.mxu0 }
 0x5e1   :  { %981 = vrot.lane.b32.xlu1 %v4510_v59, %s4203_s1 }
 0x5e2   :  { %v864_v60 = vpop.f32.mrf.mxu0 }
 0x5e3   :  { %983 = vrot.lane.b32.xlu0 %v864_v60, %s4203_s1 }
 0x5e5   :  { %215 = vrot.lane.b32.xlu1 %v3967_v61, %s4204_s16 }
 0x653   :  { %v982_v4 = vpop.permute.xlu1 %981 }
 0x655   :  { %v984_v7 = vpop.permute.xlu0 %983 }
 0x656   :  { %v985_v10 = vsel %vm261_vm2, %v982_v4, %v984_v7 }
 0x657   :  { %v987_v13 = vadd.f32 %v985_v10, %v978_v56  ;;  %v216_v14 = vpop.permute.xlu1 %215 }
 0x658   :  { %219 = vst.msk [vmem:[#allocation3 - $0x1] sm:$0x2] %vm218_vm9, %v216_v14 }
 0x659   :  { %3968 = vtanh.f32 %v987_v13  ;;  %v3586_v25 = vmul.f32 -1.442695, %v987_v13 }
 0x65b   :  { %3970 = vpow2.f32 %v3586_v25 }
 0x65f   :  { %v3587_v21 = vld [vmem:[#allocation3] ss:$0 sm:$0xff] }
 0x660   :  { %1000 = vrot.lane.b32.xlu1 %v3587_v21, %s4201_s5 }
 0x666   :  { %v3969_v24 = vpop.eup %3968 }
 0x667   :  { %1005 = vrot.lane.b32.xlu0 %v3969_v24, %s4203_s1 }
 0x668   :  { %v3971_v26 = vpop.eup %3970 }
 0x669   :  { %v991_v28 = vadd.f32 1.0, %v3971_v26 }
 0x66b   :  { %3972 = vrcp.f32 %v991_v28 }
 0x678   :  { %v3973_v29 = vpop.eup %3972 }
 0x6d2   :  { %v1001_v32 = vpop.permute.xlu1 %1000 }
 0x6d3   :  { %v1003_v33 = vmul.f32 %v3973_v29, %v1001_v32 }
 0x6d9   :  { %v1006_v30 = vpop.permute.xlu0 %1005 }
 0x6da   :  { %v1008_v31 = vmul.f32 %v3973_v29, %v1006_v30 }
 0x6dc   :  { %1010 = vrot.lane.b32.xlu0 %v1008_v31, %s4201_s5 }
 0x74e   :  { %v1011_v34 = vpop.permute.xlu0 %1010 }
 0x74f   :  { %v4521_v35 = vadd.f32 %v1011_v34, %v1003_v33 }
 0x751   :  { %3974 = vtanh.f32 %v4521_v35 }
 0x75e   :  { %v3975_v49 = vpop.eup %3974 }
 0x75f   :  { %1016 = vrot.lane.b32.xlu1 %v3975_v49, %s4203_s1 }
 0x763   :  { %869 = vrot.lane.b32.xlu1 %v4435_v23, %s4204_s16  ;;  %v867_v23 = vld [vmem:[#allocation4] sm:$0x1] }
 0x7d1   :  { %v1017_v60 = vpop.permute.xlu1 %1016 }
 0x7d2   :  { %v1019_v61 = vmul.f32 %v3973_v29, %v1017_v60 }
 0x7d4   :  { %1021 = vrot.lane.b32.xlu0 %v1019_v61, %s4201_s5 }
 0x7d5   :  { %v870_v62 = vpop.permute.xlu1 %869 }
 0x7d6   :  { %v872_v63 = vadd.f32 %v870_v62, %v867_v23 }
 0x7d8   :  { %v873_v3 = vadd.f32 %v872_v63, %v4510_v59  ;;  %v1475_v63 = vld [vmem:[#allocation5 + $0x1] sm:$0x1] }
 0x7da   :  { %3976 = vtanh.f32 %v873_v3 }
 0x7e7   :  { %v3977_v4 = vpop.eup %3976 }
 0x7e8   :  { %3797 = vmatmul.mubr.msk.f32.vlgmr.msra.gmra.mxu1 %vm261_vm2, %v3977_v4 }
 0x7e9   :  { %3801 = vmatprep.mubr.msk.f32.mxu1 %vm4202_vm0, %v4200_v0 }
 0x846   :  { %v1022_v5 = vpop.permute.xlu0 %1021 }
 0x847   :  { %1024 = vst.msk [vmem:[#allocation2] sm:$0x1] %vm201_vm4, %v1022_v5  ;;  %1033 = vst.msk [vmem:[#allocation14 + $0x10] sm:$0x1] %vm201_vm4, %v1022_v5 }
 0x84e   :  { %v1036_v56 = vld [vmem:[#allocation2] sm:$0x1] }
 0x84f   :  { %3588 = vmatmul.mubr.msk.f32.vlgmr.msra.gmra.mxu0 %vm116_vm1, %v1036_v56 }
 0x850   :  { %1319 = vmatpush1.msra.mxu0 %v4462_v38  ;;  %1366 = vmatprep.mubr.f32.mxu0 %v4200_v0 }
 0x851   :  { %1320 = vmatprep.subr.mxu0 %v4318_v12 }
 0x852   :  { %1321 = vmatpush1.msra.mxu0 %v4464_v39 }
 0x853   :  { %1322 = vmatprep.subr.mxu0 %v4325_v15 }
 0x854   :  { %1323 = vmatpush1.msra.mxu0 %v4468_v40 }
 0x855   :  { %1324 = vmatprep.subr.mxu0 %v4327_v16 }
 0x856   :  { %1325 = vmatpush1.msra.mxu0 %v4472_v41 }
 0x857   :  { %1326 = vmatprep.subr.mxu0 %v4333_v17 }
 0x858   :  { %1327 = vmatpush1.msra.mxu0 %v4476_v42 }
 0x859   :  { %1328 = vmatprep.subr.mxu0 %v4335_v18 }
 0x85a   :  { %1329 = vmatpush1.msra.mxu0 %v4480_v43 }
 0x85b   :  { %1330 = vmatprep.subr.mxu0 %v4341_v19 }
 0x85c   :  { %1331 = vmatpush1.msra.mxu0 %v4484_v44 }
 0x85d   :  { %1332 = vmatprep.subr.mxu0 %v4343_v20 }
 0x85e   :  { %1333 = vmatpush1.msra.mxu0 %v4494_v51 }
 0x85f   :  { %1577 = vmatprep.subr.mxu0 %v4268_v1 }
 0x8a8   :  { %v4608_v59 = vpop.f32.mrf.mxu1 }
 0x8aa   :  { %v3798_v7 = vpop.f32.mrf.mxu1 }
 0x90f   :  { %v4610_v10 = vpop.f32.mrf.mxu0 }
 0x910   :  { %v1123_v13 = vrot.slane %v4610_v10, %v4433_v22 }
 0x911   :  { %v1117_v32 = vpop.f32.mrf.mxu0 }
 0x912   :  { %v1124_v14 = vadd.f32 %v1123_v13, %v4431_v11 }
 0x914   :  { %3978 = vtanh.f32 %v1124_v14 }
 0x921   :  { %v3979_v21 = vpop.eup %3978 }
 0x922   :  { %3800 = vmatpush3.xpose.msk.msra.mxu1 %vm116_vm1, %v3979_v21 }
 0x923   :  { %3804 = vmatprep.subr.mxu1 %v4200_v0 }
 0x925   :  { %3802 = vmatmul.mubr.msk.f32.vlgmr.msra.gmra.mxu1 %vm116_vm1, %v4444_v27 }
 0x926   :  { %3805 = vmatpush3.msra.mxu1 %v4405_v53  ;;  %3806 = vmatprep.mubr.msk.f32.mxu1 %vm4202_vm0, %v4200_v0 }
 0x927   :  { %3809 = vmatprep.subr.mxu1 %v4200_v0 }
 0x9e5   :  { %v1195_v1 = vpop.f32.mrf.mxu1 }
 0x9e6   :  { %v1199_v24 = vsel %vm691_vm6, %v1195_v1, -inf }
 0x9e7   :  { %1200 = vmax.xlane.f32.xlu0 %v1199_v24  ;;  %v3803_v25 = vpop.f32.mrf.mxu1 }
 0x9fd   :  { %1477 = vrot.lane.b32.xlu0 %v4610_v10, %s4201_s5 }
 0xa70   :  { %v1201_v26 = vpop.xlane.xlu0 %1200 }
 0xa71   :  { %v1202_v28 = vsub.f32 %v1195_v1, %v1201_v26 }
 0xa73   :  { %v1203_v29 = vmul.f32 1.442695, %v1202_v28 }
 0xa75   :  { %3980 = vpow2.f32 %v1203_v29 }
 0xa82   :  { %v3981_v30 = vpop.eup %3980 }
 0xa83   :  { %v1205_v31 = vsel %vm691_vm6, %v3981_v30, 0.0 }
 0xa84   :  { %1206 = vadd.xlane.f32.xlu1 %v1205_v31 }
 0xa95   :  { %1479 = vrot.lane.b32.xlu1 %v1117_v32, %s4201_s5 }
 0xb0d   :  { %v1207_v33 = vpop.xlane.xlu1 %1206 }
 0xb0e   :  { %3982 = vrcp.f32 %v1207_v33  ;;  %v1373_v33 = vld [vmem:[#allocation4 + $0x1] sm:$0x1] }
 0xb1b   :  { %v3983_v34 = vpop.eup %3982 }
 0xb1c   :  { %v1209_v49 = vmul.f32 %v3983_v34, %v3981_v30 }
 0xb1e   :  { %3807 = vmatmul.mubr.msk.f32.vlgmr.msra.gmra.mxu1 %vm703_vm7, %v1209_v49  ;;  %1539 = vst.msk [vmem:[#allocation14 + $0x21] sm:$0x1] %vm691_vm6, %v1209_v49 }
 0xb1f   :  { %3810 = vmatpush3.msra.mxu1 %v4527_v36  ;;  %3825 = vmatprep.mubr.msk.f32.mxu1 %vm4202_vm0, %v4200_v0 }
 0xb20   :  { %3811 = vmatprep.subr.mxu1 %v4200_v0 }
 0xb21   :  { %3812 = vmatpush3.msra.mxu1 %v4534_v37 }
 0xb22   :  { %3813 = vmatprep.subr.mxu1 %v4200_v0 }
 0xb23   :  { %3814 = vmatpush3.msra.mxu1 %v4539_v45 }
 0xb24   :  { %3815 = vmatprep.subr.mxu1 %v4200_v0 }
 0xb25   :  { %3816 = vmatpush3.msra.mxu1 %v4546_v46 }
 0xb26   :  { %3817 = vmatprep.subr.mxu1 %v4200_v0 }
 0xb27   :  { %3818 = vmatpush3.msra.mxu1 %v4553_v54 }
 0xb28   :  { %3819 = vmatprep.subr.mxu1 %v4200_v0 }
 0xb29   :  { %3820 = vmatpush3.msra.mxu1 %v4561_v55 }
 0xb2a   :  { %3821 = vmatprep.subr.mxu1 %v4200_v0 }
 0xb2b   :  { %3822 = vmatpush3.msra.mxu1 %v4568_v57 }
 0xb2c   :  { %3823 = vmatprep.subr.mxu1 %v4200_v0 }
 0xb2d   :  { %3824 = vmatpush3.msra.mxu1 %v4577_v58 }
 0xb2e   :  { %3828 = vmatprep.subr.mxu1 %v4200_v0 }
 0xbde   :  { %v1279_v60 = vpop.f32.mrf.mxu1 }
 0xbdf   :  { %1536 = vst.msk [vmem:[#allocation14 + $0x9] sm:$0x1] %vm1031_vm8, %v1279_v60  ;;  %3592 = vmatmul.mubr.msk.f32.vlgmr.msra.gmra.mxu0 %vm261_vm2, %v1279_v60 }
 0xbe0   :  { %v3808_v61 = vpop.f32.mrf.mxu1  ;;  %1578 = vmatpush1.msra.mxu0 %v4377_v47  ;;  %1617 = vmatprep.mubr.f32.mxu0 %v4200_v0 }
 0xbe1   :  { %1579 = vmatprep.subr.mxu0 %v4273_v2  ;;  %v1478_v2 = vpop.permute.xlu0 %1477 }
 0xbe2   :  { %1580 = vmatpush1.msra.mxu0 %v4382_v48  ;;  %v1480_v48 = vpop.permute.xlu1 %1479 }
 0xbe3   :  { %1581 = vmatprep.subr.mxu0 %v4297_v6  ;;  %v1481_v6 = vsel %vm116_vm1, %v1478_v2, %v1480_v48 }
 0xbe4   :  { %1582 = vmatpush1.msra.mxu0 %v4391_v50 }
 0xbe5   :  { %1583 = vmatprep.subr.mxu0 %v4308_v8  ;;  %v1483_v8 = vadd.f32 %v1481_v6, %v1475_v63 }
 0xbe6   :  { %1584 = vmatpush1.msra.mxu0 %v4399_v52 }
 0xbe7   :  { %1822 = vmatprep.subr.mxu0 %v4313_v9 }
 0xc9f   :  { %v1368_v23 = vpop.f32.mrf.mxu0 }
 0xca0   :  { %1486 = vrot.lane.b32.xlu0 %v1368_v23, %s4203_s1 }
 0xca1   :  { %v1370_v47 = vpop.f32.mrf.mxu0 }
 0xca2   :  { %1488 = vrot.lane.b32.xlu1 %v1370_v47, %s4203_s1 }
 0xca4   :  { %1026 = vrot.lane.b32.xlu0 %v4521_v35, %s4204_s16 }
 0xd12   :  { %v1487_v62 = vpop.permute.xlu0 %1486 }
 0xd14   :  { %v1489_v3 = vpop.permute.xlu1 %1488 }
 0xd15   :  { %v1490_v4 = vsel %vm261_vm2, %v1487_v62, %v1489_v3 }
 0xd16   :  { %v1492_v9 = vadd.f32 %v1490_v4, %v1483_v8  ;;  %v1027_v5 = vpop.permute.xlu0 %1026 }
 0xd17   :  { %1029 = vst.msk [vmem:[#allocation3] sm:$0x1] %vm201_vm4, %v1027_v5  ;;  %1034 = vst.msk [vmem:[#allocation14 + $0x18] sm:$0x1] %vm201_vm4, %v1027_v5 }
 0xd18   :  { %3984 = vtanh.f32 %v1492_v9  ;;  %v3594_v7 = vmul.f32 -1.442695, %v1492_v9 }
 0xd1a   :  { %3986 = vpow2.f32 %v3594_v7 }
 0xd1e   :  { %v3595_v56 = vld [vmem:[#allocation3] ss:$0 sm:$0xff] }
 0xd1f   :  { %1505 = vrot.lane.b32.xlu0 %v3595_v56, %s4201_s5 }
 0xd25   :  { %v3985_v35 = vpop.eup %3984 }
 0xd26   :  { %1510 = vrot.lane.b32.xlu1 %v3985_v35, %s4203_s1 }
 0xd27   :  { %v3987_v13 = vpop.eup %3986 }
 0xd28   :  { %v1496_v14 = vadd.f32 1.0, %v3987_v13 }
 0xd2a   :  { %3988 = vrcp.f32 %v1496_v14 }
 0xd37   :  { %v3989_v21 = vpop.eup %3988 }
 0xd91   :  { %v1506_v25 = vpop.permute.xlu0 %1505 }
 0xd92   :  { %v1508_v26 = vmul.f32 %v3989_v21, %v1506_v25  ;;  %v1979_v25 = vld [vmem:[#allocation5 + $0x2] sm:$0x1] }
 0xd98   :  { %v1511_v1 = vpop.permute.xlu1 %1510 }
 0xd99   :  { %v1513_v24 = vmul.f32 %v3989_v21, %v1511_v1 }
 0xd9b   :  { %1515 = vrot.lane.b32.xlu1 %v1513_v24, %s4201_s5 }
 0xe0d   :  { %v1516_v28 = vpop.permute.xlu1 %1515 }
 0xe0e   :  { %v4670_v29 = vadd.f32 %v1516_v28, %v1508_v26 }
 0xe10   :  { %3990 = vtanh.f32 %v4670_v29 }
 0xe1d   :  { %v3991_v30 = vpop.eup %3990 }
 0xe1e   :  { %1521 = vrot.lane.b32.xlu0 %v3991_v30, %s4203_s1 }
 0xe22   :  { %1375 = vrot.lane.b32.xlu0 %v4610_v10, %s4204_s16 }
 0xe90   :  { %v1522_v31 = vpop.permute.xlu0 %1521 }
 0xe91   :  { %v1524_v32 = vmul.f32 %v3989_v21, %v1522_v31 }
 0xe93   :  { %1526 = vrot.lane.b32.xlu1 %v1524_v32, %s4201_s5 }
 0xe94   :  { %v1376_v34 = vpop.permute.xlu0 %1375 }
 0xe95   :  { %v1378_v49 = vadd.f32 %v1376_v34, %v1373_v33 }
 0xe97   :  { %v1379_v60 = vadd.f32 %v1378_v49, %v1368_v23 }
 0xe99   :  { %3992 = vtanh.f32 %v1379_v60 }
 0xea6   :  { %v3993_v61 = vpop.eup %3992 }
 0xea7   :  { %3826 = vmatmul.mubr.msk.f32.vlgmr.msra.gmra.mxu1 %vm261_vm2, %v3993_v61 }
 0xea8   :  { %3830 = vmatprep.mubr.msk.f32.mxu1 %vm4202_vm0, %v4200_v0 }
 0xf05   :  { %v1527_v47 = vpop.permute.xlu1 %1526 }
 0xf06   :  { %1529 = vst.msk [vmem:[#allocation2] sm:$0x1] %vm201_vm4, %v1527_v47  ;;  %1537 = vst.msk [vmem:[#allocation14 + $0x11] sm:$0x1] %vm201_vm4, %v1527_v47 }
 0xf0d   :  { %v1540_v10 = vld [vmem:[#allocation2] sm:$0x1] }
 0xf0e   :  { %3596 = vmatmul.mubr.msk.f32.vlgmr.msra.gmra.mxu0 %vm116_vm1, %v1540_v10 }
 0xf0f   :  { %1823 = vmatpush1.msra.mxu0 %v4462_v38  ;;  %1870 = vmatprep.mubr.f32.mxu0 %v4200_v0 }
 0xf10   :  { %1824 = vmatprep.subr.mxu0 %v4318_v12 }
 0xf11   :  { %1825 = vmatpush1.msra.mxu0 %v4464_v39 }
 0xf12   :  { %1826 = vmatprep.subr.mxu0 %v4325_v15 }
 0xf13   :  { %1827 = vmatpush1.msra.mxu0 %v4468_v40 }
 0xf14   :  { %1828 = vmatprep.subr.mxu0 %v4327_v16 }
 0xf15   :  { %1829 = vmatpush1.msra.mxu0 %v4472_v41 }
 0xf16   :  { %1830 = vmatprep.subr.mxu0 %v4333_v17 }
 0xf17   :  { %1831 = vmatpush1.msra.mxu0 %v4476_v42 }
 0xf18   :  { %1832 = vmatprep.subr.mxu0 %v4335_v18 }
 0xf19   :  { %1833 = vmatpush1.msra.mxu0 %v4480_v43 }
 0xf1a   :  { %1834 = vmatprep.subr.mxu0 %v4341_v19 }
 0xf1b   :  { %1835 = vmatpush1.msra.mxu0 %v4484_v44 }
 0xf1c   :  { %1836 = vmatprep.subr.mxu0 %v4343_v20 }
 0xf1d   :  { %1837 = vmatpush1.msra.mxu0 %v4494_v51 }
 0xf67   :  { %v4699_v12 = vpop.f32.mrf.mxu1 }
 0xf69   :  { %v3827_v15 = vpop.f32.mrf.mxu1 }
 0xfce   :  { %v4701_v16 = vpop.f32.mrf.mxu0 }
 0xfcf   :  { %v1627_v17 = vrot.slane %v4701_v16, %v4433_v22 }
 0xfd0   :  { %v1621_v48 = vpop.f32.mrf.mxu0 }
 0xfd1   :  { %v1628_v18 = vadd.f32 %v1627_v17, %v4431_v11 }
 0xfd3   :  { %3994 = vtanh.f32 %v1628_v18 }
 0xfe0   :  { %v3995_v23 = vpop.eup %3994 }
 0xfe1   :  { %3829 = vmatpush3.xpose.msk.msra.mxu1 %vm116_vm1, %v3995_v23 }
 0xfe2   :  { %3833 = vmatprep.subr.mxu1 %v4200_v0 }
 0xfe4   :  { %3831 = vmatmul.mubr.msk.f32.vlgmr.msra.gmra.mxu1 %vm116_vm1, %v4444_v27 }
 0xfe5   :  { %3834 = vmatpush3.msra.mxu1 %v4405_v53  ;;  %3835 = vmatprep.mubr.msk.f32.mxu1 %vm4202_vm0, %v4200_v0 }
 0xfe6   :  { %3838 = vmatprep.subr.mxu1 %v4200_v0 }
0x10a4   :  { %v1699_v19 = vpop.f32.mrf.mxu1 }
0x10a5   :  { %v1703_v20 = vsel %vm691_vm6, %v1699_v19, -inf }
0x10a6   :  { %1704 = vmax.xlane.f32.xlu1 %v1703_v20  ;;  %v3832_v2 = vpop.f32.mrf.mxu1  ;;  %v4762_v20 = vld [vmem:[%s5225_s3 + $0x50] sm:$0xff] }
0x10a7   :  { %2081 = vmatprep.subr.mxu0 %v4762_v20  ;;  %v4768_v2 = vld [vmem:[%s5225_s3 + $0x48] sm:$0xff] }
0x10b7   :  { %1983 = vrot.lane.b32.xlu1 %v1621_v48, %s4201_s5  ;;  %v4773_v48 = vld [vmem:[%s5225_s3 + $0x38] sm:$0xff] }
0x112f   :  { %v1705_v6 = vpop.xlane.xlu1 %1704 }
0x1130   :  { %v1706_v62 = vsub.f32 %v1699_v19, %v1705_v6  ;;  %v4784_v6 = vld [vmem:[%s5225_s3 + $0x20] sm:$0xff] }
0x1132   :  { %v1707_v63 = vmul.f32 1.442695, %v1706_v62  ;;  %v4791_v62 = vld [vmem:[%s5225_s3 + $0x8] sm:$0xff] }
0x1133   :  { %v1984_v14 = vpop.permute.xlu1 %1983 }
0x1134   :  { %3996 = vpow2.f32 %v1707_v63 }
0x1141   :  { %v3997_v8 = vpop.eup %3996 }
0x1142   :  { %v1709_v3 = vsel %vm691_vm6, %v3997_v8, 0.0 }
0x1143   :  { %1710 = vadd.xlane.f32.xlu0 %v1709_v3  ;;  %v1877_v3 = vld [vmem:[#allocation4 + $0x2] sm:$0x1] }
0x1159   :  { %1981 = vrot.lane.b32.xlu0 %v4701_v16, %s4201_s5 }
0x11cc   :  { %v1711_v4 = vpop.xlane.xlu0 %1710 }
0x11cd   :  { %3998 = vrcp.f32 %v1711_v4 }
0x11d0   :  { %v1982_v21 = vpop.permute.xlu0 %1981 }
0x11d1   :  { %v1985_v1 = vsel %vm116_vm1, %v1982_v21, %v1984_v14 }
0x11d2   :  { %v1987_v26 = vadd.f32 %v1985_v1, %v1979_v25 }
0x11da   :  { %v3999_v9 = vpop.eup %3998 }
0x11db   :  { %v1713_v5 = vmul.f32 %v3999_v9, %v3997_v8 }
0x11dd   :  { %3836 = vmatmul.mubr.msk.f32.vlgmr.msra.gmra.mxu1 %vm703_vm7, %v1713_v5  ;;  %2043 = vst.msk [vmem:[#allocation14 + $0x22] sm:$0x1] %vm691_vm6, %v1713_v5 }
0x11de   :  { %3839 = vmatpush3.msra.mxu1 %v4527_v36  ;;  %3854 = vmatprep.mubr.msk.f32.mxu1 %vm4202_vm0, %v4200_v0 }
0x11df   :  { %3840 = vmatprep.subr.mxu1 %v4200_v0 }
0x11e0   :  { %3841 = vmatpush3.msra.mxu1 %v4534_v37 }
0x11e1   :  { %3842 = vmatprep.subr.mxu1 %v4200_v0 }
0x11e2   :  { %3843 = vmatpush3.msra.mxu1 %v4539_v45 }
0x11e3   :  { %3844 = vmatprep.subr.mxu1 %v4200_v0 }
0x11e4   :  { %3845 = vmatpush3.msra.mxu1 %v4546_v46 }
0x11e5   :  { %3846 = vmatprep.subr.mxu1 %v4200_v0 }
0x11e6   :  { %3847 = vmatpush3.msra.mxu1 %v4553_v54 }
0x11e7   :  { %3848 = vmatprep.subr.mxu1 %v4200_v0 }
0x11e8   :  { %3849 = vmatpush3.msra.mxu1 %v4561_v55 }
0x11e9   :  { %3850 = vmatprep.subr.mxu1 %v4200_v0 }
0x11ea   :  { %3851 = vmatpush3.msra.mxu1 %v4568_v57 }
0x11eb   :  { %3852 = vmatprep.subr.mxu1 %v4200_v0 }
0x11ec   :  { %3853 = vmatpush3.msra.mxu1 %v4577_v58 }
0x11ed   :  { %3857 = vmatprep.subr.mxu1 %v4200_v0 }
0x129d   :  { %v1783_v56 = vpop.f32.mrf.mxu1 }
0x129e   :  { %2040 = vst.msk [vmem:[#allocation14 + $0xa] sm:$0x1] %vm1031_vm8, %v1783_v56  ;;  %3600 = vmatmul.mubr.msk.f32.vlgmr.msra.gmra.mxu0 %vm261_vm2, %v1783_v56 }
0x129f   :  { %v3837_v35 = vpop.f32.mrf.mxu1  ;;  %2121 = vmatprep.mubr.f32.mxu0 %v4200_v0  ;;  %2082 = vmatpush1.msra.mxu0 %v4768_v2 }
0x12a0   :  { %2083 = vmatprep.subr.mxu0 %v4773_v48 }
0x135e   :  { %v1872_v7 = vpop.f32.mrf.mxu0 }
0x135f   :  { %1990 = vrot.lane.b32.xlu1 %v1872_v7, %s4203_s1 }
0x1360   :  { %v1874_v13 = vpop.f32.mrf.mxu0 }
0x1361   :  { %1992 = vrot.lane.b32.xlu0 %v1874_v13, %s4203_s1 }
0x1363   :  { %1531 = vrot.lane.b32.xlu1 %v4670_v29, %s4204_s16 }
0x13d1   :  { %v1991_v24 = vpop.permute.xlu1 %1990 }
0x13d3   :  { %v1993_v28 = vpop.permute.xlu0 %1992 }
0x13d4   :  { %v1994_v30 = vsel %vm261_vm2, %v1991_v24, %v1993_v28 }
0x13d5   :  { %v1996_v31 = vadd.f32 %v1994_v30, %v1987_v26  ;;  %v1532_v32 = vpop.permute.xlu1 %1531 }
0x13d6   :  { %1534 = vst.msk [vmem:[#allocation3] sm:$0x1] %vm201_vm4, %v1532_v32  ;;  %1538 = vst.msk [vmem:[#allocation14 + $0x19] sm:$0x1] %vm201_vm4, %v1532_v32 }
0x13d7   :  { %4000 = vtanh.f32 %v1996_v31  ;;  %v3602_v34 = vmul.f32 -1.442695, %v1996_v31 }
0x13d9   :  { %4002 = vpow2.f32 %v3602_v34  ;;  %v4831_v34 = vld [vmem:[#allocation11 + $0x58] sm:$0xff] }
0x13dd   :  { %v3603_v33 = vld [vmem:[#allocation3] ss:$0 sm:$0xff] }
0x13de   :  { %2009 = vrot.lane.b32.xlu1 %v3603_v33, %s4201_s5  ;;  %v4825_v33 = vld [vmem:[#allocation11 + $0x78] sm:$0xff] }
0x13e4   :  { %v4001_v29 = vpop.eup %4000 }
0x13e5   :  { %2014 = vrot.lane.b32.xlu0 %v4001_v29, %s4203_s1  ;;  %v4827_v29 = vld [vmem:[#allocation11 + $0x68] sm:$0xff] }
0x13e6   :  { %v4003_v49 = vpop.eup %4002 }
0x13e7   :  { %v2000_v60 = vadd.f32 1.0, %v4003_v49  ;;  %v4835_v49 = vld [vmem:[#allocation11 + $0x48] sm:$0xff] }
0x13e9   :  { %4004 = vrcp.f32 %v2000_v60  ;;  %v4839_v60 = vld [vmem:[#allocation11 + $0x38] sm:$0xff] }
0x13f6   :  { %v4005_v61 = vpop.eup %4004 }
0x1450   :  { %v2010_v15 = vpop.permute.xlu1 %2009 }
0x1451   :  { %v2012_v17 = vmul.f32 %v4005_v61, %v2010_v15 }
0x1457   :  { %v2015_v47 = vpop.permute.xlu0 %2014 }
0x1458   :  { %v2017_v10 = vmul.f32 %v4005_v61, %v2015_v47 }
0x145a   :  { %2019 = vrot.lane.b32.xlu0 %v2017_v10, %s4201_s5 }
0x14cc   :  { %v2020_v18 = vpop.permute.xlu0 %2019 }
0x14cd   :  { %v4753_v23 = vadd.f32 %v2020_v18, %v2012_v17 }
0x14cf   :  { %4006 = vtanh.f32 %v4753_v23 }
0x14dc   :  { %v4007_v19 = vpop.eup %4006 }
0x14dd   :  { %2025 = vrot.lane.b32.xlu1 %v4007_v19, %s4203_s1 }
0x14e1   :  { %1879 = vrot.lane.b32.xlu1 %v4701_v16, %s4204_s16  ;;  %v4778_v16 = vld [vmem:[%s5225_s3 + $0x30] sm:$0xff] }
0x14e2   :  { %2084 = vmatpush1.msra.mxu0 %v4778_v16 }
0x14e3   :  { %2085 = vmatprep.subr.mxu0 %v4784_v6 }
0x14e4   :  { %2086 = vmatpush1.msra.mxu0 %v4391_v50 }
0x14e5   :  { %2087 = vmatprep.subr.mxu0 %v4791_v62 }
0x14e6   :  { %2088 = vmatpush1.msra.mxu0 %v4399_v52 }
0x14e7   :  { %2326 = vmatprep.subr.mxu0 %v4825_v33 }
0x154f   :  { %v2026_v63 = vpop.permute.xlu1 %2025 }
0x1550   :  { %v2028_v8 = vmul.f32 %v4005_v61, %v2026_v63  ;;  %v4843_v61 = vld [vmem:[#allocation11 + $0x28] sm:$0xff] }
0x1552   :  { %2030 = vrot.lane.b32.xlu0 %v2028_v8, %s4201_s5 }
0x1553   :  { %v1880_v4 = vpop.permute.xlu1 %1879 }
0x1554   :  { %v1882_v9 = vadd.f32 %v1880_v4, %v1877_v3 }
0x1556   :  { %v1883_v5 = vadd.f32 %v1882_v9, %v1872_v7 }
0x1558   :  { %4008 = vtanh.f32 %v1883_v5 }
0x1565   :  { %v4009_v56 = vpop.eup %4008 }
0x1566   :  { %3855 = vmatmul.mubr.msk.f32.vlgmr.msra.gmra.mxu1 %vm261_vm2, %v4009_v56 }
0x1567   :  { %3859 = vmatprep.mubr.msk.f32.mxu1 %vm4202_vm0, %v4200_v0 }
0x15c4   :  { %v2031_v50 = vpop.permute.xlu0 %2030 }
0x15c5   :  { %2033 = vst.msk [vmem:[#allocation2] sm:$0x1] %vm201_vm4, %v2031_v50  ;;  %2041 = vst.msk [vmem:[#allocation14 + $0x12] sm:$0x1] %vm201_vm4, %v2031_v50 }
0x15cc   :  { %v2044_v52 = vld [vmem:[#allocation2] sm:$0x1] }
0x15cd   :  { %3604 = vmatmul.mubr.msk.f32.vlgmr.msra.gmra.mxu0 %vm116_vm1, %v2044_v52 }
0x15ce   :  { %2374 = vmatprep.mubr.f32.mxu0 %v4200_v0  ;;  %2327 = vmatpush1.msra.mxu0 %v4462_v38  ;;  %v4847_v38 = vld [vmem:[#allocation11 + $0x18] sm:$0xff] }
0x15cf   :  { %2328 = vmatprep.subr.mxu0 %v4827_v29 }
0x15d0   :  { %2329 = vmatpush1.msra.mxu0 %v4464_v39  ;;  %v4851_v39 = vld [vmem:[#allocation11 + $0x8] sm:$0xff] }
0x15d1   :  { %2330 = vmatprep.subr.mxu0 %v4831_v34 }
0x15d2   :  { %2331 = vmatpush1.msra.mxu0 %v4468_v40 }
0x15d3   :  { %2332 = vmatprep.subr.mxu0 %v4835_v49 }
0x15d4   :  { %2333 = vmatpush1.msra.mxu0 %v4472_v41 }
0x15d5   :  { %2334 = vmatprep.subr.mxu0 %v4839_v60 }
0x15d6   :  { %2335 = vmatpush1.msra.mxu0 %v4476_v42 }
0x15d7   :  { %2336 = vmatprep.subr.mxu0 %v4843_v61 }
0x15d8   :  { %2337 = vmatpush1.msra.mxu0 %v4480_v43 }
0x15d9   :  { %2338 = vmatprep.subr.mxu0 %v4847_v38 }
0x15da   :  { %2339 = vmatpush1.msra.mxu0 %v4484_v44 }
0x15db   :  { %2340 = vmatprep.subr.mxu0 %v4851_v39 }
0x15dc   :  { %2341 = vmatpush1.msra.mxu0 %v4494_v51 }
0x15dd   :  { %2585 = vmatprep.subr.mxu0 %v4762_v20 }
0x1626   :  { %v4805_v35 = vpop.f32.mrf.mxu1 }
0x1628   :  { %v3856_v7 = vpop.f32.mrf.mxu1 }
0x1629   :  { %v4905_v7 = vld [vmem:[%s5225_s3 + $0x18] sm:$0xff] }
0x168d   :  { %v4807_v13 = vpop.f32.mrf.mxu0 }
0x168e   :  { %v2131_v14 = vrot.slane %v4807_v13, %v4433_v22 }
0x168f   :  { %v2125_v32 = vpop.f32.mrf.mxu0 }
0x1690   :  { %v2132_v21 = vadd.f32 %v2131_v14, %v4431_v11  ;;  %v4910_v14 = vld [vmem:[%s5225_s3] sm:$0xff] }
0x1692   :  { %4010 = vtanh.f32 %v2132_v21 }
0x169f   :  { %v4011_v1 = vpop.eup %4010 }
0x16a0   :  { %3858 = vmatpush3.xpose.msk.msra.mxu1 %vm116_vm1, %v4011_v1  ;;  %v2381_v1 = vld [vmem:[#allocation4 + $0x3] sm:$0x1] }
0x16a1   :  { %3862 = vmatprep.subr.mxu1 %v4200_v0 }
0x16a3   :  { %3860 = vmatmul.mubr.msk.f32.vlgmr.msra.gmra.mxu1 %vm116_vm1, %v4444_v27 }
0x16a4   :  { %3863 = vmatpush3.msra.mxu1 %v4405_v53  ;;  %3864 = vmatprep.mubr.msk.f32.mxu1 %vm4202_vm0, %v4200_v0 }
0x16a5   :  { %3867 = vmatprep.subr.mxu1 %v4200_v0 }
0x1763   :  { %v2203_v24 = vpop.f32.mrf.mxu1 }
0x1764   :  { %v2207_v25 = vsel %vm691_vm6, %v2203_v24, -inf }
0x1765   :  { %2208 = vmax.xlane.f32.xlu0 %v2207_v25  ;;  %v3861_v26 = vpop.f32.mrf.mxu1 }
0x177b   :  { %2485 = vrot.lane.b32.xlu0 %v4807_v13, %s4201_s5 }
0x17ee   :  { %v2209_v28 = vpop.xlane.xlu0 %2208 }
0x17ef   :  { %v2210_v30 = vsub.f32 %v2203_v24, %v2209_v28 }
0x17f1   :  { %v2211_v31 = vmul.f32 1.442695, %v2210_v30 }
0x17f3   :  { %4012 = vpow2.f32 %v2211_v31 }
0x1800   :  { %v4013_v27 = vpop.eup %4012 }
0x1801   :  { %v2213_v53 = vsel %vm691_vm6, %v4013_v27, 0.0 }
0x1802   :  { %2214 = vadd.xlane.f32.xlu1 %v2213_v53 }
0x1813   :  { %2487 = vrot.lane.b32.xlu1 %v2125_v32, %s4201_s5 }
0x188b   :  { %v2215_v40 = vpop.xlane.xlu1 %2214 }
0x188c   :  { %4014 = vrcp.f32 %v2215_v40 }
0x1899   :  { %v4015_v41 = vpop.eup %4014 }
0x189a   :  { %v2217_v42 = vmul.f32 %v4015_v41, %v4013_v27 }
0x189c   :  { %3865 = vmatmul.mubr.msk.f32.vlgmr.msra.gmra.mxu1 %vm703_vm7, %v2217_v42  ;;  %2547 = vst.msk [vmem:[#allocation14 + $0x23] sm:$0x1] %vm691_vm6, %v2217_v42 }
0x189d   :  { %3868 = vmatpush3.msra.mxu1 %v4527_v36  ;;  %3883 = vmatprep.mubr.msk.f32.mxu1 %vm4202_vm0, %v4200_v0 }
0x189e   :  { %3869 = vmatprep.subr.mxu1 %v4200_v0 }
0x189f   :  { %3870 = vmatpush3.msra.mxu1 %v4534_v37  ;;  %v2486_v37 = vpop.permute.xlu0 %2485 }
0x18a0   :  { %3871 = vmatprep.subr.mxu1 %v4200_v0 }
0x18a1   :  { %3872 = vmatpush3.msra.mxu1 %v4539_v45  ;;  %v2488_v45 = vpop.permute.xlu1 %2487 }
0x18a2   :  { %3873 = vmatprep.subr.mxu1 %v4200_v0 }
0x18a3   :  { %3874 = vmatpush3.msra.mxu1 %v4546_v46  ;;  %v2489_v46 = vsel %vm116_vm1, %v2486_v37, %v2488_v45 }
0x18a4   :  { %3875 = vmatprep.subr.mxu1 %v4200_v0 }
0x18a5   :  { %3876 = vmatpush3.msra.mxu1 %v4553_v54 }
0x18a6   :  { %3877 = vmatprep.subr.mxu1 %v4200_v0 }
0x18a7   :  { %3878 = vmatpush3.msra.mxu1 %v4561_v55  ;;  %v2483_v55 = vld [vmem:[#allocation5 + $0x3] sm:$0x1] }
0x18a8   :  { %3879 = vmatprep.subr.mxu1 %v4200_v0 }
0x18a9   :  { %3880 = vmatpush3.msra.mxu1 %v4568_v57  ;;  %v2491_v57 = vadd.f32 %v2489_v46, %v2483_v55 }
0x18aa   :  { %3881 = vmatprep.subr.mxu1 %v4200_v0 }
0x18ab   :  { %3882 = vmatpush3.msra.mxu1 %v4577_v58 }
0x18ac   :  { %3886 = vmatprep.subr.mxu1 %v4200_v0 }
0x195c   :  { %v2287_v43 = vpop.f32.mrf.mxu1 }
0x195d   :  { %2544 = vst.msk [vmem:[#allocation14 + $0xb] sm:$0x1] %vm1031_vm8, %v2287_v43  ;;  %3608 = vmatmul.mubr.msk.f32.vlgmr.msra.gmra.mxu0 %vm261_vm2, %v2287_v43  ;;  %v4936_v43 = vld [vmem:[%s5229_s7] sm:$0x1] }
0x195e   :  { %v3866_v44 = vpop.f32.mrf.mxu1  ;;  %2586 = vmatpush1.msra.mxu0 %v4768_v2  ;;  %2625 = vmatprep.mubr.f32.mxu0 %v4200_v0 }
0x195f   :  { %2587 = vmatprep.subr.mxu0 %v4773_v48  ;;  %v4943_v44 = vld [vmem:[%s5224_s2] sm:$0xff] }
0x1960   :  { %2588 = vmatpush1.msra.mxu0 %v4778_v16 }
0x1961   :  { %2589 = vmatprep.subr.mxu0 %v4784_v6 }
0x1962   :  { %2590 = vmatpush1.msra.mxu0 %v4905_v7 }
0x1963   :  { %2591 = vmatprep.subr.mxu0 %v4791_v62 }
0x1964   :  { %2592 = vmatpush1.msra.mxu0 %v4910_v14 }
0x1965   :  { %2830 = vmatprep.subr.mxu0 %v4825_v33 }
0x1a1d   :  { %v2376_v51 = vpop.f32.mrf.mxu0 }
0x1a1e   :  { %2494 = vrot.lane.b32.xlu0 %v2376_v51, %s4203_s1 }
0x1a1f   :  { %v2378_v36 = vpop.f32.mrf.mxu0 }
0x1a20   :  { %2496 = vrot.lane.b32.xlu1 %v2378_v36, %s4203_s1 }
0x1a22   :  { %2035 = vrot.lane.b32.xlu0 %v4753_v23, %s4204_s16 }
0x1a90   :  { %v2495_v54 = vpop.permute.xlu0 %2494 }
0x1a92   :  { %v2497_v58 = vpop.permute.xlu1 %2496 }
0x1a93   :  { %v2498_v47 = vsel %vm261_vm2, %v2495_v54, %v2497_v58 }
0x1a94   :  { %v2500_v10 = vadd.f32 %v2498_v47, %v2491_v57  ;;  %v2036_v15 = vpop.permute.xlu0 %2035  ;;  %v4954_v47 = vld [vmem:[#allocation11 + $0x70] sm:$0xff] }
0x1a95   :  { %2038 = vst.msk [vmem:[#allocation3] sm:$0x1] %vm201_vm4, %v2036_v15  ;;  %2042 = vst.msk [vmem:[#allocation14 + $0x1a] sm:$0x1] %vm201_vm4, %v2036_v15  ;;  %v4960_v15 = vld [vmem:[#allocation11 + $0x50] sm:$0xff] }
0x1a96   :  { %4016 = vtanh.f32 %v2500_v10  ;;  %v3610_v23 = vmul.f32 -1.442695, %v2500_v10  ;;  %v4956_v10 = vld [vmem:[#allocation11 + $0x60] sm:$0xff] }
0x1a98   :  { %4018 = vpow2.f32 %v3610_v23  ;;  %v4972_v23 = vld [vmem:[#allocation11 + $0x20] sm:$0xff] }
0x1a9c   :  { %v3611_v17 = vld [vmem:[#allocation3] ss:$0 sm:$0xff] }
0x1a9d   :  { %2513 = vrot.lane.b32.xlu0 %v3611_v17, %s4201_s5  ;;  %v4964_v17 = vld [vmem:[#allocation11 + $0x40] sm:$0xff] }
0x1aa3   :  { %v4017_v18 = vpop.eup %4016 }
0x1aa4   :  { %2518 = vrot.lane.b32.xlu1 %v4017_v18, %s4203_s1  ;;  %v4968_v18 = vld [vmem:[#allocation11 + $0x30] sm:$0xff] }
0x1aa5   :  { %v4019_v19 = vpop.eup %4018 }
0x1aa6   :  { %v2504_v63 = vadd.f32 1.0, %v4019_v19  ;;  %v4976_v19 = vld [vmem:[#allocation11 + $0x10] sm:$0xff] }
0x1aa8   :  { %4020 = vrcp.f32 %v2504_v63 }
0x1ab5   :  { %v4021_v8 = vpop.eup %4020 }
0x1b0f   :  { %v2514_v9 = vpop.permute.xlu0 %2513 }
0x1b10   :  { %v2516_v5 = vmul.f32 %v4021_v8, %v2514_v9 }
0x1b16   :  { %v2519_v3 = vpop.permute.xlu1 %2518 }
0x1b17   :  { %v2521_v4 = vmul.f32 %v4021_v8, %v2519_v3 }
0x1b19   :  { %2523 = vrot.lane.b32.xlu1 %v2521_v4, %s4201_s5  ;;  %v4986_v4 = vld [vmem:[#allocation11] sm:$0xff] }
0x1b8b   :  { %v2524_v56 = vpop.permute.xlu1 %2523 }
0x1b8c   :  { %v4896_v50 = vadd.f32 %v2524_v56, %v2516_v5  ;;  %v2987_v56 = vld [vmem:[#allocation5 + $0x4] sm:$0x1] }
0x1b8e   :  { %4022 = vtanh.f32 %v4896_v50 }
0x1b9b   :  { %v4023_v52 = vpop.eup %4022 }
0x1b9c   :  { %2529 = vrot.lane.b32.xlu0 %v4023_v52, %s4203_s1 }
0x1ba0   :  { %2383 = vrot.lane.b32.xlu0 %v4807_v13, %s4204_s16 }
0x1c0e   :  { %v2530_v21 = vpop.permute.xlu0 %2529 }
0x1c0f   :  { %v2532_v13 = vmul.f32 %v4021_v8, %v2530_v21 }
0x1c11   :  { %2534 = vrot.lane.b32.xlu1 %v2532_v13, %s4201_s5 }
0x1c12   :  { %v2384_v24 = vpop.permute.xlu0 %2383 }
0x1c13   :  { %v2386_v25 = vadd.f32 %v2384_v24, %v2381_v1 }
0x1c15   :  { %v2387_v26 = vadd.f32 %v2386_v25, %v2376_v51 }
0x1c17   :  { %4024 = vtanh.f32 %v2387_v26 }
0x1c24   :  { %v4025_v28 = vpop.eup %4024 }
0x1c25   :  { %3884 = vmatmul.mubr.msk.f32.vlgmr.msra.gmra.mxu1 %vm261_vm2, %v4025_v28 }
0x1c26   :  { %3888 = vmatprep.mubr.msk.f32.mxu1 %vm4202_vm0, %v4200_v0 }
0x1c83   :  { %v2535_v30 = vpop.permute.xlu1 %2534 }
0x1c84   :  { %2537 = vst.msk [vmem:[#allocation2] sm:$0x1] %vm201_vm4, %v2535_v30  ;;  %2545 = vst.msk [vmem:[#allocation14 + $0x13] sm:$0x1] %vm201_vm4, %v2535_v30 }
0x1c8b   :  { %v2548_v31 = vld [vmem:[#allocation2] sm:$0x1] }
0x1c8c   :  { %3612 = vmatmul.mubr.msk.f32.vlgmr.msra.gmra.mxu0 %vm116_vm1, %v2548_v31 }
0x1c8d   :  { %2878 = vmatprep.mubr.f32.mxu0 %v4200_v0  ;;  %2831 = vmatpush1.msra.mxu0 %v4954_v47 }
0x1c8e   :  { %2832 = vmatprep.subr.mxu0 %v4827_v29 }
0x1c8f   :  { %2833 = vmatpush1.msra.mxu0 %v4956_v10 }
0x1c90   :  { %2834 = vmatprep.subr.mxu0 %v4831_v34 }
0x1c91   :  { %2835 = vmatpush1.msra.mxu0 %v4960_v15 }
0x1c92   :  { %2836 = vmatprep.subr.mxu0 %v4835_v49 }
0x1c93   :  { %2837 = vmatpush1.msra.mxu0 %v4964_v17 }
0x1c94   :  { %2838 = vmatprep.subr.mxu0 %v4839_v60 }
0x1c95   :  { %2839 = vmatpush1.msra.mxu0 %v4968_v18 }
0x1c96   :  { %2840 = vmatprep.subr.mxu0 %v4843_v61 }
0x1c97   :  { %2841 = vmatpush1.msra.mxu0 %v4972_v23 }
0x1c98   :  { %2842 = vmatprep.subr.mxu0 %v4847_v38 }
0x1c99   :  { %2843 = vmatpush1.msra.mxu0 %v4976_v19 }
0x1c9a   :  { %2844 = vmatprep.subr.mxu0 %v4851_v39 }
0x1c9b   :  { %2845 = vmatpush1.msra.mxu0 %v4986_v4 }
0x1c9c   :  { %3089 = vmatprep.subr.mxu0 %v4762_v20 }
0x1ce5   :  { %v4924_v27 = vpop.f32.mrf.mxu1 }
0x1ce7   :  { %v3885_v53 = vpop.f32.mrf.mxu1 }
0x1d4c   :  { %v4926_v32 = vpop.f32.mrf.mxu0 }
0x1d4d   :  { %v2635_v40 = vrot.slane %v4926_v32, %v4433_v22 }
0x1d4e   :  { %v2629_v45 = vpop.f32.mrf.mxu0 }
0x1d4f   :  { %v2636_v41 = vadd.f32 %v2635_v40, %v4431_v11 }
0x1d51   :  { %4026 = vtanh.f32 %v2636_v41 }
0x1d5e   :  { %v4027_v42 = vpop.eup %4026 }
0x1d5f   :  { %3887 = vmatpush3.xpose.msk.msra.mxu1 %vm116_vm1, %v4027_v42  ;;  %v5021_v42 = vld [vmem:[%s5228_s6 + $0x38] sm:$0xff] }
0x1d60   :  { %3891 = vmatprep.subr.mxu1 %v4200_v0 }
0x1d62   :  { %3889 = vmatmul.mubr.msk.f32.vlgmr.msra.gmra.mxu1 %vm116_vm1, %v4936_v43 }
0x1d63   :  { %3892 = vmatpush3.msra.mxu1 %v4943_v44  ;;  %3893 = vmatprep.mubr.msk.f32.mxu1 %vm4202_vm0, %v4200_v0 }
0x1d64   :  { %3896 = vmatprep.subr.mxu1 %v4200_v0 }
0x1e22   :  { %v2707_v51 = vpop.f32.mrf.mxu1 }
0x1e23   :  { %v2711_v36 = vsel %vm691_vm6, %v2707_v51, -inf }
0x1e24   :  { %2712 = vmax.xlane.f32.xlu1 %v2711_v36  ;;  %v3890_v37 = vpop.f32.mrf.mxu1  ;;  %v5033_v36 = vld [vmem:[%s5228_s6 + $0x28] sm:$0xff] }
0x1e25   :  { %v5040_v37 = vld [vmem:[%s5228_s6 + $0x20] sm:$0xff] }
0x1e35   :  { %2991 = vrot.lane.b32.xlu1 %v2629_v45, %s4201_s5 }
0x1ead   :  { %v2713_v46 = vpop.xlane.xlu1 %2712 }
0x1eae   :  { %v2714_v54 = vsub.f32 %v2707_v51, %v2713_v46  ;;  %v5028_v51 = vld [vmem:[%s5228_s6 + $0x30] sm:$0xff]  ;;  %v5047_v46 = vld [vmem:[%s5228_s6 + $0x18] sm:$0xff] }
0x1eb0   :  { %v2715_v55 = vmul.f32 1.442695, %v2714_v54  ;;  %v5055_v54 = vld [vmem:[%s5228_s6 + $0x10] sm:$0xff] }
0x1eb2   :  { %4028 = vpow2.f32 %v2715_v55  ;;  %v5062_v55 = vld [vmem:[%s5228_s6 + $0x8] sm:$0xff] }
0x1ebf   :  { %v4029_v57 = vpop.eup %4028 }
0x1ec0   :  { %v2717_v58 = vsel %vm691_vm6, %v4029_v57, 0.0 }
0x1ec1   :  { %2718 = vadd.xlane.f32.xlu0 %v2717_v58 }
0x1ed7   :  { %2989 = vrot.lane.b32.xlu0 %v4926_v32, %s4201_s5 }
0x1f4a   :  { %v2719_v63 = vpop.xlane.xlu0 %2718 }
0x1f4b   :  { %4030 = vrcp.f32 %v2719_v63 }
0x1f58   :  { %v4031_v8 = vpop.eup %4030 }
0x1f59   :  { %v2721_v3 = vmul.f32 %v4031_v8, %v4029_v57  ;;  %v5071_v57 = vld [vmem:[%s5228_s6] sm:$0xff] }
0x1f5b   :  { %3894 = vmatmul.mubr.msk.f32.vlgmr.msra.gmra.mxu1 %vm703_vm7, %v2721_v3  ;;  %3051 = vst.msk [vmem:[#allocation14 + $0x24] sm:$0x1] %vm691_vm6, %v2721_v3 }
0x1f5c   :  { %3912 = vmatprep.mubr.msk.f32.mxu1 %vm4202_vm0, %v4200_v0  ;;  %3897 = vmatpush3.msra.mxu1 %v5021_v42 }
0x1f5d   :  { %3898 = vmatprep.subr.mxu1 %v4200_v0 }
0x1f5e   :  { %3899 = vmatpush3.msra.mxu1 %v5028_v51 }
0x1f5f   :  { %3900 = vmatprep.subr.mxu1 %v4200_v0 }
0x1f60   :  { %3901 = vmatpush3.msra.mxu1 %v5033_v36 }
0x1f61   :  { %3902 = vmatprep.subr.mxu1 %v4200_v0 }
0x1f62   :  { %3903 = vmatpush3.msra.mxu1 %v5040_v37 }
0x1f63   :  { %3904 = vmatprep.subr.mxu1 %v4200_v0 }
0x1f64   :  { %3905 = vmatpush3.msra.mxu1 %v5047_v46 }
0x1f65   :  { %3906 = vmatprep.subr.mxu1 %v4200_v0 }
0x1f66   :  { %3907 = vmatpush3.msra.mxu1 %v5055_v54 }
0x1f67   :  { %3908 = vmatprep.subr.mxu1 %v4200_v0 }
0x1f68   :  { %3909 = vmatpush3.msra.mxu1 %v5062_v55 }
0x1f69   :  { %3910 = vmatprep.subr.mxu1 %v4200_v0 }
0x1f6a   :  { %3911 = vmatpush3.msra.mxu1 %v5071_v57 }
0x1f6b   :  { %3915 = vmatprep.subr.mxu1 %v4200_v0 }
0x201b   :  { %v2791_v9 = vpop.f32.mrf.mxu1 }
0x201c   :  { %3048 = vst.msk [vmem:[#allocation14 + $0xc] sm:$0x1] %vm1031_vm8, %v2791_v9  ;;  %3616 = vmatmul.mubr.msk.f32.vlgmr.msra.gmra.mxu0 %vm261_vm2, %v2791_v9 }
0x201d   :  { %v3895_v5 = vpop.f32.mrf.mxu1  ;;  %3090 = vmatpush1.msra.mxu0 %v4768_v2  ;;  %3129 = vmatprep.mubr.f32.mxu0 %v4200_v0 }
0x201e   :  { %3091 = vmatprep.subr.mxu0 %v4773_v48  ;;  %v2992_v48 = vpop.permute.xlu1 %2991 }
0x201f   :  { %3092 = vmatpush1.msra.mxu0 %v4778_v16  ;;  %v2990_v16 = vpop.permute.xlu0 %2989 }
0x2020   :  { %3093 = vmatprep.subr.mxu0 %v4784_v6  ;;  %v2993_v6 = vsel %vm116_vm1, %v2990_v16, %v2992_v48 }
0x2021   :  { %3094 = vmatpush1.msra.mxu0 %v4905_v7  ;;  %v2995_v52 = vadd.f32 %v2993_v6, %v2987_v56  ;;  %v3389_v6 = vld [vmem:[#allocation4 + $0x5] sm:$0x1] }
0x2022   :  { %3095 = vmatprep.subr.mxu0 %v4791_v62 }
0x2023   :  { %3096 = vmatpush1.msra.mxu0 %v4910_v14 }
0x2024   :  { %3334 = vmatprep.subr.mxu0 %v4825_v33 }
0x20dc   :  { %v5001_v20 = vpop.f32.mrf.mxu0 }
0x20dd   :  { %2998 = vrot.lane.b32.xlu1 %v5001_v20, %s4203_s1 }
0x20de   :  { %v2882_v2 = vpop.f32.mrf.mxu0 }
0x20df   :  { %3000 = vrot.lane.b32.xlu0 %v2882_v2, %s4203_s1 }
0x20e1   :  { %2539 = vrot.lane.b32.xlu1 %v4896_v50, %s4204_s16 }
0x214f   :  { %v2999_v62 = vpop.permute.xlu1 %2998 }
0x2151   :  { %v3001_v7 = vpop.permute.xlu0 %3000 }
0x2152   :  { %v3002_v33 = vsel %vm261_vm2, %v2999_v62, %v3001_v7 }
0x2153   :  { %v3004_v14 = vadd.f32 %v3002_v33, %v2995_v52  ;;  %v2540_v21 = vpop.permute.xlu1 %2539  ;;  %v336_v33 = vld [vmem:[%s5229_s7 + $0x1] sm:$0x1]  ;;  %s4205_s7 = smov [#allocation14]  }
0x2154   :  { %2542 = vst.msk [vmem:[#allocation3] sm:$0x1] %vm201_vm4, %v2540_v21  ;;  %2546 = vst.msk [vmem:[#allocation14 + $0x1b] sm:$0x1] %vm201_vm4, %v2540_v21 }
0x2155   :  { %4032 = vtanh.f32 %v3004_v14  ;;  %v3618_v1 = vmul.f32 -1.442695, %v3004_v14  ;;  %v5148_v14 = vadd.f32 %v4699_v12, %v336_v33 }
0x2157   :  { %4034 = vpow2.f32 %v3618_v1  ;;  %v1462_v21 = vsel %vm956_vm10, %v5148_v14, -inf }
0x215b   :  { %v3619_v13 = vld [vmem:[#allocation3] ss:$0 sm:$0xff] }
0x215c   :  { %3017 = vrot.lane.b32.xlu1 %v3619_v13, %s4201_s5 }
0x2162   :  { %v4033_v50 = vpop.eup %4032 }
0x2163   :  { %3022 = vrot.lane.b32.xlu0 %v4033_v50, %s4203_s1 }
0x2164   :  { %v4035_v24 = vpop.eup %4034 }
0x2165   :  { %v3008_v25 = vadd.f32 1.0, %v4035_v24 }
0x2167   :  { %4036 = vrcp.f32 %v3008_v25  ;;  %v3491_v25 = vld [vmem:[#allocation5 + $0x5] sm:$0x1] }
0x2174   :  { %v4037_v26 = vpop.eup %4036 }
0x21ce   :  { %v3018_v31 = vpop.permute.xlu1 %3017 }
0x21cf   :  { %v3020_v53 = vmul.f32 %v4037_v26, %v3018_v31 }
0x21d5   :  { %v3023_v28 = vpop.permute.xlu0 %3022 }
0x21d6   :  { %v3025_v30 = vmul.f32 %v4037_v26, %v3023_v28 }
0x21d8   :  { %3027 = vrot.lane.b32.xlu0 %v3025_v30, %s4201_s5 }
0x224a   :  { %v3028_v40 = vpop.permute.xlu0 %3027 }
0x224b   :  { %v5015_v41 = vadd.f32 %v3028_v40, %v3020_v53 }
0x224d   :  { %4038 = vtanh.f32 %v5015_v41 }
0x225a   :  { %v4039_v45 = vpop.eup %4038 }
0x225b   :  { %3033 = vrot.lane.b32.xlu1 %v4039_v45, %s4203_s1 }
0x225f   :  { %2887 = vrot.lane.b32.xlu1 %v4926_v32, %s4204_s16  ;;  %v2885_v32 = vld [vmem:[#allocation4 + $0x4] sm:$0x1] }
0x22cd   :  { %v3034_v58 = vpop.permute.xlu1 %3033 }
0x22ce   :  { %v3036_v63 = vmul.f32 %v4037_v26, %v3034_v58 }
0x22d0   :  { %3038 = vrot.lane.b32.xlu0 %v3036_v63, %s4201_s5 }
0x22d1   :  { %v2888_v8 = vpop.permute.xlu1 %2887 }
0x22d2   :  { %v2890_v3 = vadd.f32 %v2888_v8, %v2885_v32 }
0x22d4   :  { %v2891_v9 = vadd.f32 %v2890_v3, %v5001_v20 }
0x22d6   :  { %4040 = vtanh.f32 %v2891_v9 }
0x22e3   :  { %v4041_v5 = vpop.eup %4040 }
0x22e4   :  { %3913 = vmatmul.mubr.msk.f32.vlgmr.msra.gmra.mxu1 %vm261_vm2, %v4041_v5 }
0x22e5   :  { %3917 = vmatprep.mubr.msk.f32.mxu1 %vm4202_vm0, %v4200_v0 }
0x2342   :  { %v3039_v2 = vpop.permute.xlu0 %3038 }
0x2343   :  { %3041 = vst.msk [vmem:[#allocation2] sm:$0x1] %vm201_vm4, %v3039_v2  ;;  %3049 = vst.msk [vmem:[#allocation14 + $0x14] sm:$0x1] %vm201_vm4, %v3039_v2 }
0x234a   :  { %v3052_v48 = vld [vmem:[#allocation2] sm:$0x1] }
0x234b   :  { %3620 = vmatmul.mubr.msk.f32.vlgmr.msra.gmra.mxu0 %vm116_vm1, %v3052_v48 }
0x234c   :  { %3335 = vmatpush1.msra.mxu0 %v4954_v47  ;;  %3382 = vmatprep.mubr.f32.mxu0 %v4200_v0 }
0x234d   :  { %3336 = vmatprep.subr.mxu0 %v4827_v29 }
0x234e   :  { %3337 = vmatpush1.msra.mxu0 %v4956_v10 }
0x234f   :  { %3338 = vmatprep.subr.mxu0 %v4831_v34 }
0x2350   :  { %3339 = vmatpush1.msra.mxu0 %v4960_v15 }
0x2351   :  { %3340 = vmatprep.subr.mxu0 %v4835_v49 }
0x2352   :  { %3341 = vmatpush1.msra.mxu0 %v4964_v17 }
0x2353   :  { %3342 = vmatprep.subr.mxu0 %v4839_v60 }
0x2354   :  { %3343 = vmatpush1.msra.mxu0 %v4968_v18 }
0x2355   :  { %3344 = vmatprep.subr.mxu0 %v4843_v61 }
0x2356   :  { %3345 = vmatpush1.msra.mxu0 %v4972_v23 }
0x2357   :  { %3346 = vmatprep.subr.mxu0 %v4847_v38 }
0x2358   :  { %3347 = vmatpush1.msra.mxu0 %v4976_v19 }
0x2359   :  { %3348 = vmatprep.subr.mxu0 %v4851_v39 }
0x235a   :  { %3349 = vmatpush1.msra.mxu0 %v4986_v4 }
0x23a4   :  { %v5101_v29 = vpop.f32.mrf.mxu1 }
0x23a5   :  { %v5184_v48 = vadd.f32 %v5101_v29, %v336_v33 }
0x23a6   :  { %v3914_v34 = vpop.f32.mrf.mxu1 }
0x23a7   :  { %v2974_v34 = vsel %vm956_vm10, %v5184_v48, -inf }
0x240b   :  { %v3131_v49 = vpop.f32.mrf.mxu0 }
0x240c   :  { %v3139_v60 = vrot.slane %v3131_v49, %v4433_v22 }
0x240d   :  { %v3133_v39 = vpop.f32.mrf.mxu0 }
0x240e   :  { %v3140_v47 = vadd.f32 %v3139_v60, %v4431_v11 }
0x2410   :  { %4042 = vtanh.f32 %v3140_v47 }
0x241d   :  { %v4043_v61 = vpop.eup %4042 }
0x241e   :  { %3916 = vmatpush3.xpose.msk.msra.mxu1 %vm116_vm1, %v4043_v61 }
0x241f   :  { %3920 = vmatprep.subr.mxu1 %v4200_v0 }
0x2421   :  { %3918 = vmatmul.mubr.msk.f32.vlgmr.msra.gmra.mxu1 %vm116_vm1, %v4936_v43 }
0x2422   :  { %3921 = vmatpush3.msra.mxu1 %v4943_v44  ;;  %3922 = vmatprep.mubr.msk.f32.mxu1 %vm4202_vm0, %v4200_v0 }
0x2423   :  { %3925 = vmatprep.subr.mxu1 %v4200_v0 }
0x24e1   :  { %v3211_v38 = vpop.f32.mrf.mxu1 }
0x24e2   :  { %v3215_v22 = vsel %vm691_vm6, %v3211_v38, -inf }
0x24e3   :  { %3216 = vmax.xlane.f32.xlu0 %v3215_v22  ;;  %v3919_v11 = vpop.f32.mrf.mxu1 }
0x24f9   :  { %3391 = vrot.lane.b32.xlu0 %v3131_v49, %s4204_s16 }
0x24fd   :  { %3495 = vrot.lane.b32.xlu0 %v3133_v39, %s4201_s5 }
0x256c   :  { %v3217_v10 = vpop.xlane.xlu0 %3216 }
0x256d   :  { %v3218_v15 = vsub.f32 %v3211_v38, %v3217_v10 }
0x256f   :  { %v3219_v43 = vmul.f32 1.442695, %v3218_v15 }
0x2570   :  { %v3392_v16 = vpop.permute.xlu0 %3391 }
0x2571   :  { %4044 = vpow2.f32 %v3219_v43  ;;  %v3394_v62 = vadd.f32 %v3392_v16, %v3389_v6 }
0x2574   :  { %v3496_v50 = vpop.permute.xlu0 %3495 }
0x257e   :  { %v4045_v44 = vpop.eup %4044 }
0x257f   :  { %v3221_v17 = vsel %vm691_vm6, %v4045_v44, 0.0 }
0x2580   :  { %3222 = vadd.xlane.f32.xlu1 %v3221_v17 }
0x2591   :  { %3493 = vrot.lane.b32.xlu1 %v3131_v49, %s4201_s5 }
0x2609   :  { %v3223_v18 = vpop.xlane.xlu1 %3222 }
0x260a   :  { %4046 = vrcp.f32 %v3223_v18 }
0x260d   :  { %v3494_v13 = vpop.permute.xlu1 %3493 }
0x260e   :  { %v3497_v1 = vsel %vm116_vm1, %v3494_v13, %v3496_v50 }
0x260f   :  { %v3499_v26 = vadd.f32 %v3497_v1, %v3491_v25 }
0x2617   :  { %v4047_v23 = vpop.eup %4046 }
0x2618   :  { %v3225_v19 = vmul.f32 %v4047_v23, %v4045_v44 }
0x261a   :  { %3923 = vmatmul.mubr.msk.f32.vlgmr.msra.gmra.mxu1 %vm703_vm7, %v3225_v19  ;;  %3555 = vst.msk [vmem:[#allocation14 + $0x25] sm:$0x1] %vm691_vm6, %v3225_v19 }
0x261b   :  { %3926 = vmatpush3.msra.mxu1 %v5021_v42  ;;  %3941 = vmatprep.mubr.msk.f32.mxu1 %vm4202_vm0, %v4200_v0  ;;  %v5162_v42 = vadd.f32 %v4805_v35, %v336_v33 }
0x261c   :  { %3927 = vmatprep.subr.mxu1 %v4200_v0 }
0x261d   :  { %3928 = vmatpush3.msra.mxu1 %v5028_v51  ;;  %v5165_v51 = vadd.f32 %v4924_v27, %v336_v33 }
0x261e   :  { %3929 = vmatprep.subr.mxu1 %v4200_v0 }
0x261f   :  { %3930 = vmatpush3.msra.mxu1 %v5033_v36  ;;  %v2470_v45 = vsel %vm956_vm10, %v5165_v51, -inf }
0x2620   :  { %3931 = vmatprep.subr.mxu1 %v4200_v0 }
0x2621   :  { %3932 = vmatpush3.msra.mxu1 %v5040_v37  ;;  %v1966_v37 = vsel %vm956_vm10, %v5162_v42, -inf }
0x2622   :  { %3933 = vmatprep.subr.mxu1 %v4200_v0 }
0x2623   :  { %3934 = vmatpush3.msra.mxu1 %v5047_v46 }
0x2624   :  { %3935 = vmatprep.subr.mxu1 %v4200_v0 }
0x2625   :  { %3936 = vmatpush3.msra.mxu1 %v5055_v54 }
0x2626   :  { %3937 = vmatprep.subr.mxu1 %v4200_v0 }
0x2627   :  { %3938 = vmatpush3.msra.mxu1 %v5062_v55 }
0x2628   :  { %3939 = vmatprep.subr.mxu1 %v4200_v0 }
0x2629   :  { %3940 = vmatpush3.msra.mxu1 %v5071_v57 }
0x26da   :  { %v3295_v4 = vpop.f32.mrf.mxu1 }
0x26db   :  { %3552 = vst.msk [vmem:[#allocation14 + $0xd] sm:$0x1] %vm1031_vm8, %v3295_v4  ;;  %3624 = vmatmul.mubr.msk.f32.vlgmr.msra.gmra.mxu0 %vm261_vm2, %v3295_v4 }
0x26dc   :  { %v3924_v20 = vpop.f32.mrf.mxu1 }
0x279b   :  { %v3384_v56 = vpop.f32.mrf.mxu0 }
0x279c   :  { %v3395_v52 = vadd.f32 %v3394_v62, %v3384_v56  ;;  %3502 = vrot.lane.b32.xlu1 %v3384_v56, %s4203_s1 }
0x279d   :  { %v3386_v7 = vpop.f32.mrf.mxu0 }
0x279e   :  { %4048 = vtanh.f32 %v3395_v52  ;;  %3504 = vrot.lane.b32.xlu0 %v3386_v7, %s4203_s1 }
0x27a0   :  { %3043 = vrot.lane.b32.xlu1 %v5015_v41, %s4204_s16  ;;  %v5159_v41 = vadd.f32 %v4608_v59, %v336_v33 }
0x27a2   :  { %v957_v36 = vsel %vm956_vm10, %v5159_v41, -inf }
0x27ab   :  { %v4049_v0 = vpop.eup %4048 }
0x27ac   :  { %3942 = vmatmul.mubr.msk.f32.vlgmr.msra.gmra.mxu1 %vm261_vm2, %v4049_v0 }
0x27bd   :  { %1463 = vmax.xlane.f32.xlu0 %v1462_v21 }
0x280e   :  { %v3503_v24 = vpop.permute.xlu1 %3502 }
0x2810   :  { %v3505_v28 = vpop.permute.xlu0 %3504 }
0x2811   :  { %v3506_v30 = vsel %vm261_vm2, %v3503_v24, %v3505_v28 }
0x2812   :  { %v3508_v31 = vadd.f32 %v3506_v30, %v3499_v26  ;;  %v3044_v53 = vpop.permute.xlu1 %3043 }
0x2813   :  { %3046 = vst.msk [vmem:[#allocation3] sm:$0x1] %vm201_vm4, %v3044_v53  ;;  %3050 = vst.msk [vmem:[#allocation14 + $0x1c] sm:$0x1] %vm201_vm4, %v3044_v53 }
0x2814   :  { %4050 = vtanh.f32 %v3508_v31  ;;  %v3626_v57 = vmul.f32 -1.442695, %v3508_v31 }
0x281a   :  { %v3627_v12 = vld [vmem:[#allocation3] ss:$0 sm:$0xff] }
0x281b   :  { %3521 = vrot.lane.b32.xlu1 %v3627_v12, %s4201_s5 }
0x2821   :  { %v4051_v40 = vpop.eup %4050 }
0x2822   :  { %3526 = vrot.lane.b32.xlu0 %v4051_v40, %s4203_s1 }
0x283f   :  { %958 = vmax.xlane.f32.xlu1 %v957_v36 }
0x2841   :  { %1967 = vmax.xlane.f32.xlu0 %v1966_v37 }
0x2843   :  { %2471 = vmax.xlane.f32.xlu1 %v2470_v45 }
0x2846   :  { %v1464_v59 = vpop.xlane.xlu0 %1463 }
0x2847   :  { %v1465_v46 = vsub.f32 %v5148_v14, %v1464_v59 }
0x2849   :  { %v1466_v35 = vmul.f32 1.442695, %v1465_v46 }
0x284b   :  { %4052 = vpow2.f32 %v1466_v35 }
0x284c   :  { %4054 = vpow2.f32 %v3626_v57 }
0x2858   :  { %v4053_v63 = vpop.eup %4052 }
0x2859   :  { %v1468_v32 = vsel %vm956_vm10, %v4053_v63, 0.0  ;;  %v4055_v8 = vpop.eup %4054 }
0x285a   :  { %v3512_v3 = vadd.f32 1.0, %v4055_v8 }
0x285c   :  { %4056 = vrcp.f32 %v3512_v3 }
0x2869   :  { %v5179_v9 = vpop.eup %4056 }
0x286c   :  { %v3474_v54 = vpop.f32.mrf.mxu1 }
0x286d   :  { %v5174_v27 = vadd.f32 %v3474_v54, %v336_v33 }
0x286e   :  { %v3943_v55 = vpop.f32.mrf.mxu1 }
0x286f   :  { %v3478_v58 = vsel %vm956_vm10, %v5174_v27, -inf }
0x2870   :  { %3479 = vmax.xlane.f32.xlu1 %v3478_v58 }
0x2874   :  { %1469 = vadd.xlane.f32.xlu1 %v1468_v32 }
0x288d   :  { %v3522_v49 = vpop.permute.xlu1 %3521 }
0x288e   :  { %v3524_v25 = vmul.f32 %v5179_v9, %v3522_v49 }
0x2894   :  { %v3527_v5 = vpop.permute.xlu0 %3526 }
0x2895   :  { %v3529_v2 = vmul.f32 %v5179_v9, %v3527_v5 }
0x2897   :  { %3531 = vrot.lane.b32.xlu0 %v3529_v2, %s4201_s5 }
0x28b6   :  { %2975 = vmax.xlane.f32.xlu0 %v2974_v34 }
0x28c8   :  { %v959_v60 = vpop.xlane.xlu1 %958 }
0x28c9   :  { %v960_v47 = vsub.f32 %v5159_v41, %v959_v60 }
0x28ca   :  { %v1968_v61 = vpop.xlane.xlu0 %1967 }
0x28cb   :  { %v961_v38 = vmul.f32 1.442695, %v960_v47  ;;  %v1969_v22 = vsub.f32 %v5162_v42, %v1968_v61 }
0x28cc   :  { %v2472_v11 = vpop.xlane.xlu1 %2471 }
0x28cd   :  { %4058 = vpow2.f32 %v961_v38  ;;  %v1970_v39 = vmul.f32 1.442695, %v1969_v22  ;;  %v2473_v10 = vsub.f32 %v5165_v51, %v2472_v11 }
0x28cf   :  { %4060 = vpow2.f32 %v1970_v39  ;;  %v2474_v29 = vmul.f32 1.442695, %v2473_v10 }
0x28d1   :  { %4062 = vpow2.f32 %v2474_v29 }
0x28da   :  { %v4059_v15 = vpop.eup %4058 }
0x28db   :  { %v963_v43 = vsel %vm956_vm10, %v4059_v15, 0.0 }
0x28dc   :  { %v4061_v44 = vpop.eup %4060  ;;  %964 = vadd.xlane.f32.xlu0 %v963_v43 }
0x28dd   :  { %v1972_v18 = vsel %vm956_vm10, %v4061_v44, 0.0 }
0x28de   :  { %v4063_v17 = vpop.eup %4062 }
0x28df   :  { %v2476_v23 = vsel %vm956_vm10, %v4063_v17, 0.0 }
0x28e0   :  { %1973 = vadd.xlane.f32.xlu0 %v1972_v18  ;;  %2477 = vadd.xlane.f32.xlu1 %v2476_v23 }
0x28f9   :  { %v3480_v19 = vpop.xlane.xlu1 %3479 }
0x28fa   :  { %v3481_v4 = vsub.f32 %v5174_v27, %v3480_v19 }
0x28fc   :  { %v3482_v20 = vmul.f32 1.442695, %v3481_v4 }
0x28fd   :  { %v1470_v16 = vpop.xlane.xlu1 %1469 }
0x28fe   :  { %4064 = vpow2.f32 %v3482_v20 }
0x28ff   :  { %4066 = vlog2.f32 %v1470_v16 }
0x2909   :  { %v3532_v33 = vpop.permute.xlu0 %3531 }
0x290a   :  { %v3534_v26 = vadd.f32 %v3532_v33, %v3524_v25 }
0x290b   :  { %v4065_v6 = vpop.eup %4064 }
0x290c   :  { %v4067_v62 = vpop.eup %4066  ;;  %v3484_v56 = vsel %vm956_vm10, %v4065_v6, 0.0 }
0x290d   :  { %v1472_v52 = vmul.f32 0.6931472, %v4067_v62  ;;  %3485 = vadd.xlane.f32.xlu1 %v3484_v56 }
0x290f   :  { %v1473_v7 = vadd.f32 %v1472_v52, %v1464_v59 }
0x2911   :  { %v1474_v0 = vsub.f32 %v5148_v14, %v1473_v7 }
0x2913   :  { %1535 = vst.msk [vmem:[#allocation14 + $0x1] sm:$0x1] %vm956_vm10, %v1474_v0 }
0x293f   :  { %v2976_v21 = vpop.xlane.xlu0 %2975 }
0x2940   :  { %v2977_v13 = vsub.f32 %v5184_v48, %v2976_v21 }
0x2942   :  { %v2978_v50 = vmul.f32 1.442695, %v2977_v13 }
0x2944   :  { %4068 = vpow2.f32 %v2978_v50 }
0x2945   :  { %4070 = vtanh.f32 %v3534_v26 }
0x2951   :  { %v4069_v1 = vpop.eup %4068 }
0x2952   :  { %v2980_v24 = vsel %vm956_vm10, %v4069_v1, 0.0  ;;  %v4071_v30 = vpop.eup %4070 }
0x2953   :  { %2981 = vadd.xlane.f32.xlu0 %v2980_v24 }
0x2965   :  { %v965_v28 = vpop.xlane.xlu0 %964 }
0x2966   :  { %4072 = vlog2.f32 %v965_v28 }
0x2969   :  { %3537 = vrot.lane.b32.xlu0 %v4071_v30, %s4203_s1  ;;  %v1974_v14 = vpop.xlane.xlu0 %1973  ;;  %v2478_v31 = vpop.xlane.xlu1 %2477  ;;  %s3562_s1 = sshll.u32 %s4205_s7, 4  ;;  %s3563_s1 = int_to_ptr.vmem [resolvable:$true] %s3562_s1 }
0x296a   :  { %4074 = vlog2.f32 %v1974_v14  ;;  %p4169_p7 = scmp.lt.s32.totalorder %s3563_s1, %s3563_s1 }
0x296b   :  { %4076 = vlog2.f32 %v2478_v31 }
0x2973   :  { %v4073_v53 = vpop.eup %4072 }
0x2974   :  { %v967_v12 = vmul.f32 0.6931472, %v4073_v53 }
0x2976   :  { %v968_v40 = vadd.f32 %v967_v12, %v959_v60 }
0x2977   :  { %v4075_v36 = vpop.eup %4074 }
0x2978   :  { %v4077_v37 = vpop.eup %4076  ;;  %v969_v45 = vsub.f32 %v5159_v41, %v968_v40  ;;  %v1976_v59 = vmul.f32 0.6931472, %v4075_v36 }
0x2979   :  { %v2480_v46 = vmul.f32 0.6931472, %v4077_v37 }
0x297a   :  { %1030 = vst.msk [vmem:[#allocation14] sm:$0x1] %vm956_vm10, %v969_v45  ;;  %v1977_v35 = vadd.f32 %v1976_v59, %v1968_v61 }
0x297b   :  { %v2481_v54 = vadd.f32 %v2480_v46, %v2472_v11 }
0x297c   :  { %v1978_v55 = vsub.f32 %v5162_v42, %v1977_v35 }
0x297d   :  { %v2482_v57 = vsub.f32 %v5165_v51, %v2481_v54 }
0x297e   :  { %2039 = vst.msk [vmem:[#allocation14 + $0x2] sm:$0x1] %vm956_vm10, %v1978_v55 }
0x297f   :  { %2543 = vst.msk [vmem:[#allocation14 + $0x3] sm:$0x1] %vm956_vm10, %v2482_v57 }
0x2996   :  { %v3486_v58 = vpop.xlane.xlu1 %3485 }
0x2997   :  { %4078 = vlog2.f32 %v3486_v58 }
0x29a4   :  { %v4079_v63 = vpop.eup %4078 }
0x29a5   :  { %v3488_v32 = vmul.f32 0.6931472, %v4079_v63 }
0x29a7   :  { %v3489_v8 = vadd.f32 %v3488_v32, %v3480_v19 }
0x29a9   :  { %v3490_v41 = vsub.f32 %v5174_v27, %v3489_v8 }
0x29ab   :  { %3551 = vst.msk [vmem:[#allocation14 + $0x5] sm:$0x1] %vm956_vm10, %v3490_v41 }
0x29dc   :  { %v2982_v3 = vpop.xlane.xlu0 %2981 }
0x29dd   :  { %4080 = vlog2.f32 %v2982_v3 }
0x29e0   :  { %v3538_v5 = vpop.permute.xlu0 %3537 }
0x29e1   :  { %v3540_v42 = vmul.f32 %v5179_v9, %v3538_v5 }
0x29e3   :  { %3542 = vrot.lane.b32.xlu1 %v3540_v42, %s4201_s5  ;;  %s4164_s5 = scalar_lea.vmem %s3563_s1, 640 }
0x29e4   :  { %p4165_p6 = scmp.ne.s32.totalorder %s3563_s1, %s4164_s5  ;;  %p4170_p8 = scmp.lt.s32.totalorder %s4164_s5, %s4164_s5 }
0x29e6   :  { %p4171_p9 = por %p4170_p8, %p4169_p7 }
0x29e7   :  { %3547 = vrot.lane.b32.xlu1 %v3534_v26, %s4204_s16 }
0x29e8   :  { %p4172_p10 = pnand %p4171_p9, %p4165_p6 }
0x29ea   :  { %v4081_v51 = vpop.eup %4080 }
0x29eb   :  { %v2984_v2 = vmul.f32 0.6931472, %v4081_v51 }
0x29ed   :  { %v2985_v34 = vadd.f32 %v2984_v2, %v2976_v21 }
0x29ef   :  { %v2986_v49 = vsub.f32 %v5184_v48, %v2985_v34 }
0x29f1   :  { %3047 = vst.msk [vmem:[#allocation14 + $0x4] sm:$0x1] %vm956_vm10, %v2986_v49 }
0x2a55   :  { %v3543_v60 = vpop.permute.xlu1 %3542 }
0x2a56   :  { %3545 = vst.msk [vmem:[#allocation2] sm:$0x1] %vm201_vm4, %v3543_v60  ;;  %3553 = vst.msk [vmem:[#allocation14 + $0x15] sm:$0x1] %vm201_vm4, %v3543_v60 }
0x2a59   :  { %v3548_v27 = vpop.permute.xlu1 %3547 }
0x2a5a   :  { %3550 = vst.msk [vmem:[#allocation3] sm:$0x1] %vm201_vm4, %v3548_v27  ;;  %3554 = vst.msk [vmem:[#allocation14 + $0x1d] sm:$0x1] %vm201_vm4, %v3548_v27 }
0x2a5b   :  { %4175 = shalt.err (!%p4172_p10)
}
0x2a5c   :  { %3565 = dma.vmem_to_hbm [thread:$0]  %s3563_s1, 640, %s5230_s8, [#allocation8]  }
0x2a5d   :  { %4190 = dma.done.wait [#allocation8], 640  }
0x2a5e   :  { %4191 = vsyncadd [#allocation8], 4294966656 }
0x2a5f   :  { %3569 = vsyncpa [#allocation7], 1 }
0x2a60   :  { %3570 = vsyncpa [#allocation10], 1 }
0x2a61   :  { %3571 = vsyncpa [#allocation13], 1 }
0x2a62   :  { %3572 = vsyncpa [#allocation8], 1 }

</bundles_post_ra>
